<compile_context>
chip_gen: v5e
topology: v5e:2x2
jax: 0.10.0
libtpu: 0.0.40
codegen_flags: <defaults>
</compile_context>

<pallas_src>
import math

import jax
import jax.numpy as jnp
from jax import lax
from jax.experimental import pallas as pl
from jax.experimental.pallas import tpu as pltpu

# TODO(synk): `dropout_p` is undefined in the original module; inference
# semantics (p = 0.0 -> identity) are used, so no RNG masking is emitted.
SCALE = 1.0 / math.sqrt(512.0)      # hard-coded in the reference forward
COMPUTE_DTYPE = jnp.bfloat16        # MXU operand dtype (accumulation stays f32)


def _flash_attn_kernel(xq_ref, xkv_ref, wq_ref, wk_ref, wv_ref,
                       bq_ref, bk_ref, bv_ref, o_ref,
                       q_scr, m_scr, l_scr, acc_scr):
    # xq_ref: (tq, D)  xkv_ref: (tk, D)  w*_ref: (D, H) bf16  b*_ref: (1, H)
    # o_ref: (tq, H)   scratch: q (tq,H) f32, m/l (tq,1) f32, acc (tq,H) f32
    kv_idx = pl.program_id(2)

    @pl.when(kv_idx == 0)
    def _init():
        # q projection computed once per (batch, q-tile); SCALE folded in here.
        q = jnp.dot(xq_ref[...].astype(COMPUTE_DTYPE), wq_ref[...],
                    preferred_element_type=jnp.float32) + bq_ref[...]
        q_scr[...] = q * SCALE
        m_scr[...] = jnp.full(m_scr.shape, -jnp.inf, dtype=jnp.float32)
        l_scr[...] = jnp.zeros(l_scr.shape, dtype=jnp.float32)
        acc_scr[...] = jnp.zeros(acc_scr.shape, dtype=jnp.float32)

    # k / v projections for this kv tile.
    xkv = xkv_ref[...].astype(COMPUTE_DTYPE)
    k = jnp.dot(xkv, wk_ref[...], preferred_element_type=jnp.float32) + bk_ref[...]
    v = jnp.dot(xkv, wv_ref[...], preferred_element_type=jnp.float32) + bv_ref[...]

    # scores: contract the last (feature) dims directly -> MXU consumes k as-is,
    # no explicit transpose on the XLU.
    s = lax.dot_general(q_scr[...].astype(COMPUTE_DTYPE), k.astype(COMPUTE_DTYPE),
                        dimension_numbers=(((1,), (1,)), ((), ())),
                        preferred_element_type=jnp.float32)

    # online softmax update
    m_prev = m_scr[...]
    m_new = jnp.maximum(m_prev, jnp.max(s, axis=-1, keepdims=True))
    alpha = jnp.exp(m_prev - m_new)
    p = jnp.exp(s - m_new)

    l_scr[...] = alpha * l_scr[...] + jnp.sum(p, axis=-1, keepdims=True)
    acc_scr[...] = alpha * acc_scr[...] + jnp.dot(
        p.astype(COMPUTE_DTYPE), v.astype(COMPUTE_DTYPE),
        preferred_element_type=jnp.float32)
    m_scr[...] = m_new

    # dropout with p = 0.0 is identity (see TODO above)

    @pl.when(kv_idx == pl.num_programs(2) - 1)
    def _finalize():
        inv_l = pl.reciprocal(l_scr[...], approx=True)   # EUP slot, ~free
        o_ref[...] = (acc_scr[...] * inv_l).astype(o_ref.dtype)


def attention_model(x, w_t, b, *, tq=128, tk=128):
    """x: [B, S, D] f32; w_t: [D, 3H] (transposed Linear weight); b: [3H]."""
    B, S, D = x.shape
    threeH = w_t.shape[1]
    H = threeH // 3

    tq = min(tq, S)
    tk = min(tk, S)
    assert S % tq == 0 and S % tk == 0, "sequence length must divide tile sizes"

    # Split the fused QKV weight into three lane-aligned per-projection blocks
    # and cast the constant weights to bf16 once on the host.
    wq = w_t[:, 0 * H:1 * H].astype(COMPUTE_DTYPE)
    wk = w_t[:, 1 * H:2 * H].astype(COMPUTE_DTYPE)
    wv = w_t[:, 2 * H:3 * H].astype(COMPUTE_DTYPE)
    bq = b[0 * H:1 * H].reshape(1, H).astype(jnp.float32)
    bk = b[1 * H:2 * H].reshape(1, H).astype(jnp.float32)
    bv = b[2 * H:3 * H].reshape(1, H).astype(jnp.float32)

    grid = (B, S // tq, S // tk)
    const = lambda b_, qi, ki: (0, 0)   # weights/bias never move (no re-DMA)

    return pl.pallas_call(
        _flash_attn_kernel,
        out_shape=jax.ShapeDtypeStruct((B, S, H), x.dtype),
        grid_spec=pltpu.PrefetchScalarGridSpec(
            num_scalar_prefetch=0,
            grid=grid,
            in_specs=[
                # x rows feeding the q projection (batch dim squeezed)
                pl.BlockSpec((None, tq, D), lambda b_, qi, ki: (b_, qi, 0)),
                # x rows feeding the k/v projections
                pl.BlockSpec((None, tk, D), lambda b_, qi, ki: (b_, ki, 0)),
                pl.BlockSpec((D, H), const),     # Wq
                pl.BlockSpec((D, H), const),     # Wk
                pl.BlockSpec((D, H), const),     # Wv
                pl.BlockSpec((1, H), const),     # bq
                pl.BlockSpec((1, H), const),     # bk
                pl.BlockSpec((1, H), const),     # bv
            ],
            out_specs=pl.BlockSpec((None, tq, H), lambda b_, qi, ki: (b_, qi, 0)),
            scratch_shapes=[
                pltpu.VMEM((tq, H), jnp.float32),   # cached scaled q
                pltpu.VMEM((tq, 1), jnp.float32),   # running max
                pltpu.VMEM((tq, 1), jnp.float32),   # running denominator
                pltpu.VMEM((tq, H), jnp.float32),   # output accumulator
            ],
        ),
        compiler_params=pltpu.CompilerParams(
            # batch and q-tile axes parallel (megacore on v7x); kv is reduction
            dimension_semantics=("parallel", "parallel", "arbitrary"),
            vmem_limit_bytes=32 * 1024 * 1024,
        ),
    )(x, x, wq, wk, wv, bq, bk, bv)


def _reference(x, w_t, b):
    # plain-JAX f32 reference of the same semantics, for a sanity check
    qkv = jnp.einsum("bsd,dh->bsh", x, w_t) + b
    H = w_t.shape[1] // 3
    q, k, v = qkv[..., :H], qkv[..., H:2 * H], qkv[..., 2 * H:]
    s = jnp.einsum("bqd,bkd->bqk", q, k) * SCALE
    p = jax.nn.softmax(s, axis=-1)
    return jnp.einsum("bqk,bkd->bqd", p, v)


if __name__ == "__main__":
    # small but lane-/MXU-aligned shapes: batch=2, seq=256, feature=512, head=128
    # (feature = 512 matches the module's x1 = randn(8, 512) and the sqrt(512) scale)
    B, S, D, H = 2, 256, 512, 128

    key = jax.random.PRNGKey(0)
    kx, kw, kb = jax.random.split(key, 3)

    x = jax.random.normal(kx, (B, S, D), dtype=jnp.float32)

    # deterministic Linear(D, 3H) init (PyTorch-style uniform(+-1/sqrt(fan_in)))
    bound = 1.0 / math.sqrt(D)
    w = jax.random.uniform(kw, (3 * H, D), minval=-bound, maxval=bound,
                           dtype=jnp.float32)          # torch layout [out, in]
    b = jax.random.uniform(kb, (3 * H,), minval=-bound, maxval=bound,
                           dtype=jnp.float32)
    w_t = w.T                                          # [D, 3H] for the kernel

    out = jax.block_until_ready(attention_model(x, w_t, b))
    ref = _reference(x, w_t, b)

    assert out.shape == (B, S, H)
    max_err = float(jnp.max(jnp.abs(out - ref)))
    # bf16 MXU operands with f32 accumulation -> relaxed tolerance vs f32 ref
    assert jnp.allclose(out, ref, atol=5e-2, rtol=5e-2), f"max abs err {max_err}"

    print("KERNEL_OK")
</pallas_src>

<mosaic_0001>
module attributes {stable_mosaic.version = 11 : i64} {
  func.func @_flash_attn_kernel(%arg0: i32, %arg1: i32, %arg2: i32, %arg3: memref<1x128x512xf32, #tpu.memory_space<vmem>>, %arg4: memref<1x128x512xf32, #tpu.memory_space<vmem>>, %arg5: memref<512x128xbf16, #tpu.memory_space<vmem>>, %arg6: memref<512x128xbf16, #tpu.memory_space<vmem>>, %arg7: memref<512x128xbf16, #tpu.memory_space<vmem>>, %arg8: memref<1x128xf32, #tpu.memory_space<vmem>>, %arg9: memref<1x128xf32, #tpu.memory_space<vmem>>, %arg10: memref<1x128xf32, #tpu.memory_space<vmem>>, %arg11: memref<1x128x128xf32, #tpu.memory_space<vmem>>, %arg12: memref<128x128xf32, #tpu.memory_space<vmem>>, %arg13: memref<128x1xf32, #tpu.memory_space<vmem>>, %arg14: memref<128x1xf32, #tpu.memory_space<vmem>>, %arg15: memref<128x128xf32, #tpu.memory_space<vmem>>) attributes {dimension_semantics = [#tpu.dimension_semantics<parallel>, #tpu.dimension_semantics<parallel>, #tpu.dimension_semantics<arbitrary>], iteration_bounds = array<i64: 2, 2, 2>, scalar_prefetch = 0 : i64, scratch_operands = 4 : i64, tpu.core_type = #tpu.core_type<tc>, window_params = [{transform_indices = @transform_0, window_bounds = array<i64: 1, 128, 512>}, {transform_indices = @transform_1, window_bounds = array<i64: 1, 128, 512>}, {pipeline_mode = #tpu.pipeline_mode<synchronous>, transform_indices = @transform_2, window_bounds = array<i64: 512, 128>}, {pipeline_mode = #tpu.pipeline_mode<synchronous>, transform_indices = @transform_3, window_bounds = array<i64: 512, 128>}, {pipeline_mode = #tpu.pipeline_mode<synchronous>, transform_indices = @transform_4, window_bounds = array<i64: 512, 128>}, {pipeline_mode = #tpu.pipeline_mode<synchronous>, transform_indices = @transform_5, window_bounds = array<i64: 1, 128>}, {pipeline_mode = #tpu.pipeline_mode<synchronous>, transform_indices = @transform_6, window_bounds = array<i64: 1, 128>}, {pipeline_mode = #tpu.pipeline_mode<synchronous>, transform_indices = @transform_7, window_bounds = array<i64: 1, 128>}, {transform_indices = @transform_8, window_bounds = array<i64: 1, 128, 128>}]} {
    %c0_i32 = arith.constant 0 : i32
    %0 = arith.cmpi eq, %arg2, %c0_i32 : i32
    %1 = arith.extui %0 : i1 to i32
    %c0_i32_0 = arith.constant 0 : i32
    %2 = arith.cmpi ne, %1, %c0_i32_0 : i32
    scf.if %2 {
      %c0_31 = arith.constant 0 : index
      %c0_32 = arith.constant 0 : index
      %c0_33 = arith.constant 0 : index
      %47 = vector.load %arg3[%c0_31, %c0_32, %c0_33] : memref<1x128x512xf32, #tpu.memory_space<vmem>>, vector<1x128x512xf32>
      %48 = vector.shape_cast %47 : vector<1x128x512xf32> to vector<128x512xf32>
      %49 = arith.truncf %48 : vector<128x512xf32> to vector<128x512xbf16>
      %c0_34 = arith.constant 0 : index
      %c0_35 = arith.constant 0 : index
      %50 = vector.load %arg5[%c0_34, %c0_35] : memref<512x128xbf16, #tpu.memory_space<vmem>>, vector<512x128xbf16>
      %cst_36 = arith.constant dense<0.000000e+00> : vector<128x128xf32>
      %51 = tpu.matmul %49, %50, %cst_36 {dimension_numbers = #tpu.dot_dimension_numbers<[1], [0], [0], [1], [0, 0, 1, 1], [], []>} : vector<128x512xbf16>, vector<512x128xbf16>, vector<128x128xf32> -> vector<128x128xf32>
      %c0_37 = arith.constant 0 : index
      %c0_38 = arith.constant 0 : index
      %52 = vector.load %arg8[%c0_37, %c0_38] : memref<1x128xf32, #tpu.memory_space<vmem>>, vector<1x128xf32>
      %53 = vector.broadcast %52 : vector<1x128xf32> to vector<128x128xf32>
      %54 = arith.addf %51, %53 : vector<128x128xf32>
      %cst_39 = arith.constant 0.0441941731 : f32
      %55 = vector.broadcast %cst_39 : f32 to vector<128x128xf32>
      %56 = arith.mulf %54, %55 : vector<128x128xf32>
      %c0_40 = arith.constant 0 : index
      %c0_41 = arith.constant 0 : index
      %57 = vector.load %arg12[%c0_40, %c0_41] : memref<128x128xf32, #tpu.memory_space<vmem>>, vector<128x128xf32>
      tpu.vector_store %arg12[%c0_40, %c0_41], %56 {strides = array<i32>} : memref<128x128xf32, #tpu.memory_space<vmem>>, vector<128x128xf32>,
      %cst_42 = arith.constant 0xFF800000 : f32
      %58 = vector.broadcast %cst_42 : f32 to vector<128x1xf32>
      %c0_43 = arith.constant 0 : index
      %c0_44 = arith.constant 0 : index
      %59 = vector.load %arg13[%c0_43, %c0_44] : memref<128x1xf32, #tpu.memory_space<vmem>>, vector<128x1xf32>
      tpu.vector_store %arg13[%c0_43, %c0_44], %58 {strides = array<i32>} : memref<128x1xf32, #tpu.memory_space<vmem>>, vector<128x1xf32>,
      %cst_45 = arith.constant 0.000000e+00 : f32
      %60 = vector.broadcast %cst_45 : f32 to vector<128x1xf32>
      %c0_46 = arith.constant 0 : index
      %c0_47 = arith.constant 0 : index
      %61 = vector.load %arg14[%c0_46, %c0_47] : memref<128x1xf32, #tpu.memory_space<vmem>>, vector<128x1xf32>
      tpu.vector_store %arg14[%c0_46, %c0_47], %60 {strides = array<i32>} : memref<128x1xf32, #tpu.memory_space<vmem>>, vector<128x1xf32>,
      %cst_48 = arith.constant 0.000000e+00 : f32
      %62 = vector.broadcast %cst_48 : f32 to vector<128x128xf32>
      %c0_49 = arith.constant 0 : index
      %c0_50 = arith.constant 0 : index
      %63 = vector.load %arg15[%c0_49, %c0_50] : memref<128x128xf32, #tpu.memory_space<vmem>>, vector<128x128xf32>
      tpu.vector_store %arg15[%c0_49, %c0_50], %62 {strides = array<i32>} : memref<128x128xf32, #tpu.memory_space<vmem>>, vector<128x128xf32>,
    } else {
    }
    %c0 = arith.constant 0 : index
    %c0_1 = arith.constant 0 : index
    %c0_2 = arith.constant 0 : index
    %3 = vector.load %arg4[%c0, %c0_1, %c0_2] : memref<1x128x512xf32, #tpu.memory_space<vmem>>, vector<1x128x512xf32>
    %4 = vector.shape_cast %3 : vector<1x128x512xf32> to vector<128x512xf32>
    %5 = arith.truncf %4 : vector<128x512xf32> to vector<128x512xbf16>
    %c0_3 = arith.constant 0 : index
    %c0_4 = arith.constant 0 : index
    %6 = vector.load %arg6[%c0_3, %c0_4] : memref<512x128xbf16, #tpu.memory_space<vmem>>, vector<512x128xbf16>
    %cst = arith.constant dense<0.000000e+00> : vector<128x128xf32>
    %7 = tpu.matmul %5, %6, %cst {dimension_numbers = #tpu.dot_dimension_numbers<[1], [0], [0], [1], [0, 0, 1, 1], [], []>} : vector<128x512xbf16>, vector<512x128xbf16>, vector<128x128xf32> -> vector<128x128xf32>
    %c0_5 = arith.constant 0 : index
    %c0_6 = arith.constant 0 : index
    %8 = vector.load %arg9[%c0_5, %c0_6] : memref<1x128xf32, #tpu.memory_space<vmem>>, vector<1x128xf32>
    %9 = vector.broadcast %8 : vector<1x128xf32> to vector<128x128xf32>
    %10 = arith.addf %7, %9 : vector<128x128xf32>
    %c0_7 = arith.constant 0 : index
    %c0_8 = arith.constant 0 : index
    %11 = vector.load %arg7[%c0_7, %c0_8] : memref<512x128xbf16, #tpu.memory_space<vmem>>, vector<512x128xbf16>
    %cst_9 = arith.constant dense<0.000000e+00> : vector<128x128xf32>
    %12 = tpu.matmul %5, %11, %cst_9 {dimension_numbers = #tpu.dot_dimension_numbers<[1], [0], [0], [1], [0, 0, 1, 1], [], []>} : vector<128x512xbf16>, vector<512x128xbf16>, vector<128x128xf32> -> vector<128x128xf32>
    %c0_10 = arith.constant 0 : index
    %c0_11 = arith.constant 0 : index
    %13 = vector.load %arg10[%c0_10, %c0_11] : memref<1x128xf32, #tpu.memory_space<vmem>>, vector<1x128xf32>
    %14 = vector.broadcast %13 : vector<1x128xf32> to vector<128x128xf32>
    %15 = arith.addf %12, %14 : vector<128x128xf32>
    %c0_12 = arith.constant 0 : index
    %c0_13 = arith.constant 0 : index
    %16 = vector.load %arg12[%c0_12, %c0_13] : memref<128x128xf32, #tpu.memory_space<vmem>>, vector<128x128xf32>
    %17 = arith.truncf %16 : vector<128x128xf32> to vector<128x128xbf16>
    %18 = arith.truncf %10 : vector<128x128xf32> to vector<128x128xbf16>
    %cst_14 = arith.constant dense<0.000000e+00> : vector<128x128xf32>
    %19 = tpu.matmul %17, %18, %cst_14 {dimension_numbers = #tpu.dot_dimension_numbers<[1], [1], [0], [0], [0, 0, 1, 0], [], []>} : vector<128x128xbf16>, vector<128x128xbf16>, vector<128x128xf32> -> vector<128x128xf32>
    %c0_15 = arith.constant 0 : index
    %c0_16 = arith.constant 0 : index
    %20 = vector.load %arg13[%c0_15, %c0_16] : memref<128x1xf32, #tpu.memory_space<vmem>>, vector<128x1xf32>
    %cst_17 = arith.constant dense<0xFF800000> : vector<128xf32>
    %21 = vector.multi_reduction <maximumf>, %19, %cst_17 [1] : vector<128x128xf32> to vector<128xf32>
    %22 = vector.shape_cast %21 : vector<128xf32> to vector<128x1xf32>
    %23 = arith.maximumf %20, %22 : vector<128x1xf32>
    %24 = arith.subf %20, %23 : vector<128x1xf32>
    %25 = math.exp %24 : vector<128x1xf32>
    %26 = vector.broadcast %23 : vector<128x1xf32> to vector<128x128xf32>
    %27 = arith.subf %19, %26 : vector<128x128xf32>
    %28 = math.exp %27 : vector<128x128xf32>
    %c0_18 = arith.constant 0 : index
    %c0_19 = arith.constant 0 : index
    %29 = vector.load %arg14[%c0_18, %c0_19] : memref<128x1xf32, #tpu.memory_space<vmem>>, vector<128x1xf32>
    %30 = arith.mulf %25, %29 : vector<128x1xf32>
    %cst_20 = arith.constant dense<0.000000e+00> : vector<128xf32>
    %31 = vector.multi_reduction <add>, %28, %cst_20 [1] : vector<128x128xf32> to vector<128xf32>
    %32 = vector.shape_cast %31 : vector<128xf32> to vector<128x1xf32>
    %33 = arith.addf %30, %32 : vector<128x1xf32>
    %c0_21 = arith.constant 0 : index
    %c0_22 = arith.constant 0 : index
    %34 = vector.load %arg14[%c0_21, %c0_22] : memref<128x1xf32, #tpu.memory_space<vmem>>, vector<128x1xf32>
    tpu.vector_store %arg14[%c0_21, %c0_22], %33 {strides = array<i32>} : memref<128x1xf32, #tpu.memory_space<vmem>>, vector<128x1xf32>,
    %c0_23 = arith.constant 0 : index
    %c0_24 = arith.constant 0 : index
    %35 = vector.load %arg15[%c0_23, %c0_24] : memref<128x128xf32, #tpu.memory_space<vmem>>, vector<128x128xf32>
    %36 = vector.broadcast %25 : vector<128x1xf32> to vector<128x128xf32>
    %37 = arith.mulf %36, %35 : vector<128x128xf32>
    %38 = arith.truncf %28 : vector<128x128xf32> to vector<128x128xbf16>
    %39 = arith.truncf %15 : vector<128x128xf32> to vector<128x128xbf16>
    %cst_25 = arith.constant dense<0.000000e+00> : vector<128x128xf32>
    %40 = tpu.matmul %38, %39, %cst_25 {dimension_numbers = #tpu.dot_dimension_numbers<[1], [0], [0], [1], [0, 0, 1, 1], [], []>} : vector<128x128xbf16>, vector<128x128xbf16>, vector<128x128xf32> -> vector<128x128xf32>
    %41 = arith.addf %37, %40 : vector<128x128xf32>
    %c0_26 = arith.constant 0 : index
    %c0_27 = arith.constant 0 : index
    %42 = vector.load %arg15[%c0_26, %c0_27] : memref<128x128xf32, #tpu.memory_space<vmem>>, vector<128x128xf32>
    tpu.vector_store %arg15[%c0_26, %c0_27], %41 {strides = array<i32>} : memref<128x128xf32, #tpu.memory_space<vmem>>, vector<128x128xf32>,
    %c0_28 = arith.constant 0 : index
    %c0_29 = arith.constant 0 : index
    %43 = vector.load %arg13[%c0_28, %c0_29] : memref<128x1xf32, #tpu.memory_space<vmem>>, vector<128x1xf32>
    tpu.vector_store %arg13[%c0_28, %c0_29], %23 {strides = array<i32>} : memref<128x1xf32, #tpu.memory_space<vmem>>, vector<128x1xf32>,
    %c1_i32 = arith.constant 1 : i32
    %44 = arith.cmpi eq, %arg2, %c1_i32 : i32
    %45 = arith.extui %44 : i1 to i32
    %c0_i32_30 = arith.constant 0 : i32
    %46 = arith.cmpi ne, %45, %c0_i32_30 : i32
    scf.if %46 {
      %c0_31 = arith.constant 0 : index
      %c0_32 = arith.constant 0 : index
      %47 = vector.load %arg14[%c0_31, %c0_32] : memref<128x1xf32, #tpu.memory_space<vmem>>, vector<128x1xf32>
      %48 = tpu.reciprocal %47 {approx = true} : vector<128x1xf32> -> vector<128x1xf32>
      %c0_33 = arith.constant 0 : index
      %c0_34 = arith.constant 0 : index
      %49 = vector.load %arg15[%c0_33, %c0_34] : memref<128x128xf32, #tpu.memory_space<vmem>>, vector<128x128xf32>
      %50 = vector.broadcast %48 : vector<128x1xf32> to vector<128x128xf32>
      %51 = arith.mulf %49, %50 : vector<128x128xf32>
      %c0_35 = arith.constant 0 : index
      %c0_36 = arith.constant 0 : index
      %c0_37 = arith.constant 0 : index
      %52 = vector.load %arg11[%c0_35, %c0_36, %c0_37] : memref<1x128x128xf32, #tpu.memory_space<vmem>>, vector<1x128x128xf32>
      %53 = vector.shape_cast %52 : vector<1x128x128xf32> to vector<128x128xf32>
      %54 = vector.shape_cast %51 : vector<128x128xf32> to vector<1x128x128xf32>
      tpu.vector_store %arg11[%c0_35, %c0_36, %c0_37], %54 {strides = array<i32>} : memref<1x128x128xf32, #tpu.memory_space<vmem>>, vector<1x128x128xf32>,
    } else {
    }
    return
  }
  func.func @transform_0(%arg0: i32, %arg1: i32, %arg2: i32) -> (i32, i32, i32) {
    %c0_i32 = arith.constant 0 : i32
    %c0_i32_0 = arith.constant 0 : i32
    return %arg0, %arg1, %c0_i32 : i32, i32, i32
  }
  func.func @transform_1(%arg0: i32, %arg1: i32, %arg2: i32) -> (i32, i32, i32) {
    %c0_i32 = arith.constant 0 : i32
    %c0_i32_0 = arith.constant 0 : i32
    return %arg0, %arg2, %c0_i32 : i32, i32, i32
  }
  func.func @transform_2(%arg0: i32, %arg1: i32, %arg2: i32) -> (i32, i32) {
    %c0_i32 = arith.constant 0 : i32
    %c0_i32_0 = arith.constant 0 : i32
    %c0_i32_1 = arith.constant 0 : i32
    return %c0_i32, %c0_i32_0 : i32, i32
  }
  func.func @transform_3(%arg0: i32, %arg1: i32, %arg2: i32) -> (i32, i32) {
    %c0_i32 = arith.constant 0 : i32
    %c0_i32_0 = arith.constant 0 : i32
    %c0_i32_1 = arith.constant 0 : i32
    return %c0_i32, %c0_i32_0 : i32, i32
  }
  func.func @transform_4(%arg0: i32, %arg1: i32, %arg2: i32) -> (i32, i32) {
    %c0_i32 = arith.constant 0 : i32
    %c0_i32_0 = arith.constant 0 : i32
    %c0_i32_1 = arith.constant 0 : i32
    return %c0_i32, %c0_i32_0 : i32, i32
  }
  func.func @transform_5(%arg0: i32, %arg1: i32, %arg2: i32) -> (i32, i32) {
    %c0_i32 = arith.constant 0 : i32
    %c0_i32_0 = arith.constant 0 : i32
    %c0_i32_1 = arith.constant 0 : i32
    return %c0_i32, %c0_i32_0 : i32, i32
  }
  func.func @transform_6(%arg0: i32, %arg1: i32, %arg2: i32) -> (i32, i32) {
    %c0_i32 = arith.constant 0 : i32
    %c0_i32_0 = arith.constant 0 : i32
    %c0_i32_1 = arith.constant 0 : i32
    return %c0_i32, %c0_i32_0 : i32, i32
  }
  func.func @transform_7(%arg0: i32, %arg1: i32, %arg2: i32) -> (i32, i32) {
    %c0_i32 = arith.constant 0 : i32
    %c0_i32_0 = arith.constant 0 : i32
    %c0_i32_1 = arith.constant 0 : i32
    return %c0_i32, %c0_i32_0 : i32, i32
  }
  func.func @transform_8(%arg0: i32, %arg1: i32, %arg2: i32) -> (i32, i32, i32) {
    %c0_i32 = arith.constant 0 : i32
    %c0_i32_0 = arith.constant 0 : i32
    return %arg0, %arg1, %c0_i32 : i32, i32, i32
  }
}

</mosaic_0001>

<bundles_post_ra>
// kernel: tpu_custom_call.1
= control target key start
LH: loop header
LB: loop body
LE: loop exit
PB: predicated region body
PF: predicated region fallthrough
CT: control target
= control target key end

     0   :  { %s5390_s0 = inlined_call_operand.hbm [shape: f32[2,256,512], index: 0, kind: input, shape index: {}]   ;;  %s5391_s1 = inlined_call_operand.hbm [shape: f32[2,256,512], index: 1, kind: input, shape index: {}]   ;;  %s5392_s2 = inlined_call_operand.hbm [shape: bf16[512,128], index: 2, kind: input, shape index: {}]   ;;  %s5393_s3 = inlined_call_operand.hbm [shape: bf16[512,128], index: 3, kind: input, shape index: {}]   ;;  %s5394_s4 = inlined_call_operand.hbm [shape: bf16[512,128], index: 4, kind: input, shape index: {}]   ;;  %s5395_s5 = inlined_call_operand.vmem [shape: f32[1,128], index: 5, kind: input, shape index: {}]   ;;  %s5396_s6 = inlined_call_operand.vmem [shape: f32[1,128], index: 6, kind: input, shape index: {}]   ;;  %s5397_s7 = inlined_call_operand.vmem [shape: f32[1,128], index: 7, kind: input, shape index: {}]   ;;  %s5398_s8 = inlined_call_operand.hbm [shape: f32[2,256,128], index: 8, kind: output, shape index: {}]  }
   0x1   :  { %5409 = sst [smem:[#allocation32_spill]] %s5390_s0 }
   0x2   :  { %5410 = sst [smem:[#allocation33_spill]] %s5392_s2 }
   0x3   :  { %5411 = sst [smem:[#allocation34_spill]] %s5393_s3 }
   0x4   :  { %5412 = sst [smem:[#allocation35_spill]] %s5394_s4 }
   0x5   :  { %5413 = sst [smem:[#allocation36_spill]] %s5395_s5 }
   0x6   :  { %5414 = sst [smem:[#allocation37_spill]] %s5396_s6 }
   0x7   :  { %5415 = sst [smem:[#allocation38_spill]] %s5397_s7 }
   0x8   :  { %5416 = sst [smem:[#allocation39_spill]] %s5398_s8 }
   0x9   :  { %13 = vsyncpa [#allocation7], 0 }
   0xa   :  { %15 = vsyncpa [#allocation7 + $0x1], 0 }
   0xb   :  { %16 = vsyncpa [#allocation10], 0 }
   0xc   :  { %18 = vsyncpa [#allocation10 + $0x1], 0 }
   0xd   :  { %19 = vsyncpa [#allocation13], 0 }
   0xe   :  { %20 = vsyncpa [#allocation8], 0 }
   0xf   :  { %22 = vsyncpa [#allocation8 + $0x1], 0  ;;  %s4230_s27 = smov 0   ;;  %s4232_s28 = smov 0  }
  0x10   :  { %s4234_s29 = smov 0   ;;  %s4236_s30 = smov 0  }
  0x11   :  { %s4238_s9 = smov 0   ;;  %s4240_s10 = smov 0  }
  0x12   :  { %s4242_s11 = smov 0   ;;  %s4244_s12 = smov 0  }
  0x13   :  { %s4246_s13 = smov 0   ;;  %s4248_s14 = smov 0  }
  0x14   :  { %s4250_s15 = smov 0   ;;  %s4252_s16 = smov 0  }
  0x15   :  { %s4254_s17 = smov 0  }
  0x16 LB: > { %5417 = sst [smem:[#allocation21_spill]] %s4134_s30  ;;  %s4294_s18 = sadd.s32 4294967295, %s4170_s17   ;;  %s4170_s17 = sphi %s4254_s17, %s28_s17   ;;  %s4166_s16 = sphi %s4252_s16, %s5455_s16   ;;  %s4162_s15 = sphi %s4250_s15, %s5454_s15   ;;  %s4158_s14 = sphi %s4248_s14, %s5466_s14   ;;  %s4154_s13 = sphi %s4246_s13, %s5465_s13   ;;  %s4150_s12 = sphi %s4244_s12, %s5464_s12   ;;  %s4146_s11 = sphi %s4242_s11, %s5463_s11   ;;  %s4142_s10 = sphi %s4240_s10, %s5462_s10   ;;  %s4138_s9 = sphi %s4238_s9, %s5461_s9   ;;  %s4134_s30 = sphi %s4236_s30, %s5460_s30   ;;  %s4130_s29 = sphi %s4234_s29, %s5459_s29   ;;  %s4126_s28 = sphi %s4232_s28, %s5458_s28   ;;  %s4122_s27 = sphi %s4230_s27, %s5457_s27  }
  0x17   : > { %5418 = sst [smem:[#allocation22_spill]] %s4146_s11  ;;  %p97_p0 = scmp.ne.s32.totalorder %s4126_s28, %s4122_s27 }
  0x18   : > { %5419 = sst [smem:[#allocation23_spill]] %s4150_s12  ;;  %p70_p1 = scmp.eq.s32.totalorder %s4294_s18, 0 }
  0x19   : > { %5420 = sst [smem:[#allocation24_spill]] %s4154_s13  ;;  %p249_p2 = scmp.eq.s32.totalorder %s4294_s18, 7 }
  0x1a   : > { %5421 = sst [smem:[#allocation25_spill]] %s4162_s15  ;;  %p3073_p3 = scmp.ge.s32.totalorder %s4170_s17, 1 }
  0x1b   : > { %5422 = sst [smem:[#allocation26_spill]] %s4166_s16  ;;  %p262_p4 = scmp.lt.s32.totalorder %s4170_s17, 9 }
  0x1c   : > { %p4303_p5 = por %p97_p0, %p70_p1  ;;  %s5425_s2 = sld [smem:[#allocation33_spill]] }
  0x1d   : > { %p4307_p6 = pnand %p3073_p3, %p262_p4  ;;  %s4172_s24 = smov [#allocation11]  }
  0x1e   : > { %s275_s25 = sshll.u32 %s4172_s24, 4  ;;  %s5427_s3 = sld [smem:[#allocation34_spill]]  ;;  %s276_s25 = int_to_ptr.vmem [resolvable:$true] %s275_s25 }
  0x1f   : > { %p3619_p7 = pneg %p4307_p6  ;;  %s4173_s22 = smov 64  }
  0x20   : > { %s5428_s4 = sld [smem:[#allocation35_spill]]  ;;  %s4175_s7 = smov [#allocation12]  }
  0x21   : > { %p4318_p8 = pnand %p3619_p7, %p70_p1  ;;  %s289_s8 = sshll.u32 %s4175_s7, 4  ;;  %s290_s8 = int_to_ptr.vmem [resolvable:$true] %s289_s8 }
  0x22   : > { %s273_s23 = sshll.u32 %s5425_s2, 4  ;;  %s4174_s2 = smov 4   ;;  %s274_s23 = int_to_ptr.hbm [resolvable:$true] %s273_s23 }
  0x23   : > { %3622 = dma.hbm_to_vmem [thread:$0]  (!%p4318_p8), %s274_s23, 4096, %s276_s25, [#allocation10], %s4173_s22, %s4173_s22, %s4174_s2  }
  0x24   : > { %s287_s21 = sshll.u32 %s5427_s3, 4  ;;  %s4176_s27 = smov [#allocation14]   ;;  %s288_s21 = int_to_ptr.hbm [resolvable:$true] %s287_s21 }
  0x25   : > { %3625 = dma.hbm_to_vmem [thread:$0]  (!%p4318_p8), %s288_s21, 4096, %s290_s8, [#allocation13], %s4173_s22, %s4173_s22, %s4174_s2  }
  0x26   : > { %s301_s12 = sshll.u32 %s5428_s4, 4  ;;  %s303_s23 = sshll.u32 %s4176_s27, 4  ;;  %s302_s12 = int_to_ptr.hbm [resolvable:$true] %s301_s12  ;;  %s304_s23 = int_to_ptr.vmem [resolvable:$true] %s303_s23 }
  0x27   : > { %3628 = dma.hbm_to_vmem [thread:$0]  (!%p4318_p8), %s302_s12, 4096, %s304_s23, [#allocation13], %s4173_s22, %s4173_s22, %s4174_s2  }
  0x28   : > { %s3072_s13 = sadd.s32 4294967294, %s4170_s17   ;;  %s40_s7 = sadd.s32 1, %s4158_s14 }
  0x29   : > { %p41_p9 = scmp.ge.s32.totalorder %s40_s7, 2  ;;  %s43_s25 = sadd.s32 1, %s4162_s15 }
  0x2a   : > { %s47_s24 = sadd.s32 1, %s4166_s16  ;;  %s56_s3 = sadd.s32 1, %s4142_s10 }
  0x2b   : > { %s5468_s7 = smov (%p41_p9, %s40_s7), 0  ;;  %s5470_s25 = smov (!%p41_p9, %s43_s25), %s4162_s15 }
  0x2c   : > { %5429 = sst [smem:[#allocation27_spill]] %s5468_s7  ;;  %p63_p10 = scmp.ne.s32.totalorder %s4142_s10, %s4138_s9 }
  0x2d   : > { %p64_p11 = scmp.eq.s32.totalorder %s4170_s17, 0  ;;  %p45_p12 = scmp.ge.s32.totalorder %s5470_s25, 2 }
  0x2e   : > { %p69_p13 = scmp.ne.s32.totalorder %s4138_s9, %s4134_s30  ;;  %s80_s12 = ssub.s32 %s4158_s14, %s5468_s7 }
  0x2f   : > { %p4349_p0 = por %p64_p11, %p63_p10  ;;  %s5472_s25 = smov (%p45_p12, %s5470_s25), 0 }
  0x30   : > { %5431 = sst [smem:[#allocation28_spill]] %s5472_s25  ;;  %s5474_s24 = smov (!%p45_p12, %s47_s24), %s4166_s16 }
  0x31   : > { %s52_s26 = ssub.s32 %s4162_s15, %s5472_s25  ;;  %p4362_p3 = por %p70_p1, %p69_p13 }
  0x32   : > { %p49_p4 = scmp.ge.s32.totalorder %s5474_s24, 2  ;;  %p4368_p7 = por %p249_p2, %p63_p10 }
  0x33   : > { %p255_p8 = scmp.eq.s32.totalorder %s3072_s13, 7  ;;  %p3643_p9 = scmp.lt.s32.totalorder %s4170_s17, 8 }
  0x34   : > { %s5433_s22 = scalar_select %p4368_p7, 1, 0 }
  0x35   : > { %s5476_s24 = smov (%p49_p4, %s5474_s24), 0  ;;  %p4375_p12 = por %p255_p8, %p69_p13 }
  0x36   : > { %5434 = sst [smem:[#allocation29_spill]] %s5433_s22  ;;  %s326_s27 = sand.u32 1, %s4142_s10  }
  0x37   : > { %5435 = sst [smem:[#allocation30_spill]] %s5476_s24  ;;  %s51_s23 = ssub.s32 %s4166_s16, %s5476_s24 }
  0x38   : > { %s5436_s8 = scalar_select %p4375_p12, 1, 0 }
  0x39   : > { %s53_s4 = sor.u32 %s52_s26, %s51_s23  ;;  %s81_s25 = sor.u32 %s80_s12, %s51_s23 }
  0x3a   : > { %5437 = sst [smem:[#allocation31_spill]] %s5436_s8  ;;  %p54_p2 = scmp.eq.s32.totalorder %s53_s4, 0 }
  0x3b   : > { %p82_p10 = scmp.eq.s32.totalorder %s81_s25, 0  ;;  %s3078_s7 = sshll.u32 %s326_s27, 9 }
  0x3c   : > { %s3487_s30 = sshll.u32 %s4162_s15, 6  ;;  %s3081_s22 = sshll.u32 %s4166_s16, 7 }
  0x3d   : > { %s4384_s13 = scalar_select %p54_p2, %s4142_s10, %s56_s3  }
  0x3e   : > { %s336_s6 = sadd.s32 %s3487_s30, %s3081_s22  ;;  %s330_s5 = scalar_lea.vmem [#allocation6], %s3078_s7 }
  0x3f   : > { %s341_s11 = sshll.u32 %s330_s5, 4  ;;  %s3082_s8 = sshll.u32 %s336_s6, 3  ;;  %s342_s11 = int_to_ptr.vmem [resolvable:$true] %s341_s11 }
  0x40   : > { %s5438_s0 = sld [smem:[#allocation32_spill]]  ;;  %p3630_p13 = pnand %p3643_p9, %p4349_p0 }
  0x41   : > { %s3488_s30 = sshll.u32 %s4158_s14, 6  ;;  %s327_s7 = scalar_lea.sflag [#allocation7], %s326_s27 }
  0x42   : > { %s4177_s5 = smov 512   ;;  %s4178_s12 = smov 32  }
  0x43   : > { %s361_s6 = sadd.s32 %s3488_s30, %s3081_s22  ;;  %p91_p0 = scmp.ne.s32.totalorder %s4130_s29, %s4126_s28 }
  0x44   : > { %s3087_s23 = sshll.u32 %s361_s6, 3  ;;  %s351_s26 = sand.u32 1, %s4170_s17  }
  0x45   : > { %s363_s24 = scalar_lea.hbm %s5391_s1, %s3087_s23  ;;  %p93_p4 = por %p91_p0, %p64_p11 }
  0x46   : > { %s338_s4 = scalar_lea.hbm %s5438_s0, %s3082_s8  ;;  %s84_s8 = sadd.s32 1, %s4130_s29 }
  0x47   : > { %s339_s3 = sshll.u32 %s338_s4, 4  ;;  %s353_s4 = sand.u32 1, %s4130_s29   ;;  %s340_s3 = int_to_ptr.hbm [resolvable:$true] %s339_s3 }
  0x48   : > { %3632 = dma.hbm_to_vmem [thread:$0]  (!%p3630_p13), %s340_s3, 8192, %s342_s11, %s327_s7, %s4177_s5, %s4177_s5, %s4178_s12  }
  0x49   : > { %s4401_s2 = scalar_select %p82_p10, %s4130_s29, %s84_s8  }
  0x4a   : > { %s3083_s27 = sshll.u32 %s353_s4, 9  ;;  %s364_s0 = sshll.u32 %s363_s24, 4  ;;  %s365_s0 = int_to_ptr.hbm [resolvable:$true] %s364_s0 }
  0x4b   : > { %s355_s11 = scalar_lea.vmem [#allocation9], %s3083_s27  ;;  %p3633_p8 = pnand %p3643_p9, %p93_p4 }
  0x4c   : > { %s366_s3 = sshll.u32 %s355_s11, 4  ;;  %s352_s22 = scalar_lea.sflag [#allocation10], %s351_s26  ;;  %s367_s3 = int_to_ptr.vmem [resolvable:$true] %s366_s3 }
  0x4d   : > { %3635 = dma.hbm_to_vmem [thread:$0]  (!%p3633_p8), %s365_s0, 8192, %s367_s3, %s352_s22, %s4177_s5, %s4177_s5, %s4178_s12  }
  0x4e   : > { %378 = sbr.rel (%p4307_p6) target bundleno = 1845 (0x735), region = 52  ;;  %s4414_s15 = sand.u32 (!%p4307_p6), 1, %s4138_s9  }
  0x4f   : > { %s3089_s16 = sshll.u32 (!%p4307_p6), %s4414_s15, 9  ;;  %s381_s25 = scalar_lea.sflag (!%p4307_p6), [#allocation7], %s4414_s15 }
  0x50   : > { %s4418_s30 = scalar_lea.vmem (!%p4307_p6), [#allocation6], %s3089_s16 }
  0x53   : > { %4101 = dma.done.wait (%p4362_p3), %s381_s25, 8192  }
  0x54   : > { %4103 = vsyncadd (%p4362_p3), %s381_s25, 4294959104  ;;  %s390_s0 = sand.u32 1, %s4294_s18   ;;  %s392_s20 = sand.u32 1, %s4126_s28  }
  0x55   : > { %s3090_s7 = sshll.u32 %s392_s20, 9  ;;  %s391_s5 = scalar_lea.sflag [#allocation10], %s390_s0 }
  0x56   : > { %s4426_s12 = scalar_lea.vmem [#allocation9], %s3090_s7 }
  0x57   : > { %4105 = dma.done.wait (%p4303_p5), %s391_s5, 8192  }
  0x58   : > { %4107 = vsyncadd (%p4303_p5), %s391_s5, 4294959104 }
  0x59   : > { %4109 = dma.done.wait (%p70_p1), [#allocation10], 4096  }
  0x5a   : > { %4111 = vsyncadd (%p70_p1), [#allocation10], 4294963200 }
  0x5b   : > { %4113 = dma.done.wait (%p70_p1), [#allocation13], 8192  }
  0x5c   : > { %4115 = vsyncadd (%p70_p1), [#allocation13], 4294959104  ;;  %s3094_s21 = sshll.u32 %s4414_s15, 7  ;;  %s5439_s23 = sld [smem:[#allocation22_spill]] }
  0x5d   : > { %s4441_s6 = scalar_lea.vmem [#allocation15], %s3094_s21 }
  0x62   : > { %p3095_p6 = scmp.ne.s32.totalorder %s5439_s23, 0 }
  0x63   : > { %s5440_s24 = sld [smem:[#allocation36_spill]] (!%p3095_p6) }
  0x64   : > { %454 = sbr.rel (%p3095_p6) target bundleno = 398 (0x18e), region = 76 }
  0x69   : > { %v3496_v0 = vld [vmem:[#allocation11 + $0x38] sm:$0xff]  ;;  %v3495_v4 = vld [vmem:[#allocation11 + $0x30] sm:$0xff]  ;;  %v3494_v8 = vld [vmem:[#allocation11 + $0x28] sm:$0xff]  ;;  %vm1039_vm0 = vcmask 7168  }
  0x6a   : > { %v3504_v1 = vld [vmem:[#allocation11 + $0x78] sm:$0xff]  ;;  %811 = vmatpush.bf16.msra.mxu0 %v3496_v0  ;;  %v3503_v5 = vld [vmem:[#allocation11 + $0x70] sm:$0xff]  ;;  %v3502_v9 = vld [vmem:[#allocation11 + $0x68] sm:$0xff] }
  0x6b   : > { %v3512_v2 = vld [vmem:[#allocation11 + $0xb8] sm:$0xff]  ;;  %860 = vmatpush.bf16.msra.mxu1 %v3504_v1  ;;  %v3511_v6 = vld [vmem:[#allocation11 + $0xb0] sm:$0xff]  ;;  %v3510_v10 = vld [vmem:[#allocation11 + $0xa8] sm:$0xff] }
  0x6c   : > { %v3520_v3 = vld [vmem:[#allocation11 + $0xf8] sm:$0xff]  ;;  %909 = vmatpush.bf16.msra.mxu2 %v3512_v2  ;;  %v3519_v7 = vld [vmem:[#allocation11 + $0xf0] sm:$0xff]  ;;  %v3518_v11 = vld [vmem:[#allocation11 + $0xe8] sm:$0xff] }
  0x6d   : > { %958 = vmatpush.bf16.msra.mxu3 %v3520_v3  ;;  %v3493_v12 = vld [vmem:[#allocation11 + $0x20] sm:$0xff]  ;;  %v3492_v16 = vld [vmem:[#allocation11 + $0x18] sm:$0xff]  ;;  %v3491_v20 = vld [vmem:[#allocation11 + $0x10] sm:$0xff] }
  0x6e   : > { %812 = vmatpush.bf16.msra.mxu0 %v3495_v4  ;;  %v3501_v13 = vld [vmem:[#allocation11 + $0x60] sm:$0xff]  ;;  %v3500_v17 = vld [vmem:[#allocation11 + $0x58] sm:$0xff]  ;;  %v3499_v21 = vld [vmem:[#allocation11 + $0x50] sm:$0xff] }
  0x6f   : > { %861 = vmatpush.bf16.msra.mxu1 %v3503_v5  ;;  %v3509_v14 = vld [vmem:[#allocation11 + $0xa0] sm:$0xff]  ;;  %v3508_v18 = vld [vmem:[#allocation11 + $0x98] sm:$0xff]  ;;  %v3507_v22 = vld [vmem:[#allocation11 + $0x90] sm:$0xff] }
  0x70   : > { %910 = vmatpush.bf16.msra.mxu2 %v3511_v6  ;;  %v3517_v15 = vld [vmem:[#allocation11 + $0xe0] sm:$0xff]  ;;  %v3516_v19 = vld [vmem:[#allocation11 + $0xd8] sm:$0xff]  ;;  %v3515_v23 = vld [vmem:[#allocation11 + $0xd0] sm:$0xff] }
  0x71   : > { %959 = vmatpush.bf16.msra.mxu3 %v3519_v7  ;;  %v3490_v24 = vld [vmem:[#allocation11 + $0x8] sm:$0xff]  ;;  %v3489_v28 = vld [vmem:[#allocation11] sm:$0xff]  ;;  %v457_v36 = vld [vmem:[%s4418_s30 + $0x10] sm:$0xff] }
  0x72   : > { %813 = vmatpush.bf16.msra.mxu0 %v3494_v8  ;;  %v3498_v25 = vld [vmem:[#allocation11 + $0x48] sm:$0xff]  ;;  %v3497_v29 = vld [vmem:[#allocation11 + $0x40] sm:$0xff]  ;;  %v461_v37 = vld [vmem:[%s4418_s30 + $0x30] sm:$0xff] }
  0x73   : > { %862 = vmatpush.bf16.msra.mxu1 %v3502_v9  ;;  %v3506_v26 = vld [vmem:[#allocation11 + $0x88] sm:$0xff]  ;;  %v3505_v30 = vld [vmem:[#allocation11 + $0x80] sm:$0xff]  ;;  %v458_v38 = vld [vmem:[%s4418_s30 + $0x18] sm:$0xff]  ;;  %v521_v42 = vpack.c.bf16 %v461_v37, %v457_v36 }
  0x74   : > { %911 = vmatpush.bf16.msra.mxu2 %v3510_v10  ;;  %v3514_v27 = vld [vmem:[#allocation11 + $0xc8] sm:$0xff]  ;;  %v3513_v31 = vld [vmem:[#allocation11 + $0xc0] sm:$0xff]  ;;  %v462_v39 = vld [vmem:[%s4418_s30 + $0x38] sm:$0xff] }
  0x75   : > { %960 = vmatpush.bf16.msra.mxu3 %v3518_v11  ;;  %v455_v32 = vld [vmem:[%s4418_s30] sm:$0xff]  ;;  %v456_v34 = vld [vmem:[%s4418_s30 + $0x8] sm:$0xff]  ;;  %v522_v43 = vpack.c.bf16 %v462_v39, %v458_v38  ;;  %v465_v48 = vld [vmem:[%s4418_s30 + $0x50] sm:$0xff] }
  0x76   : > { %814 = vmatpush.bf16.msra.mxu0 %v3493_v12  ;;  %v459_v33 = vld [vmem:[%s4418_s30 + $0x20] sm:$0xff]  ;;  %v460_v35 = vld [vmem:[%s4418_s30 + $0x28] sm:$0xff]  ;;  %v469_v49 = vld [vmem:[%s4418_s30 + $0x70] sm:$0xff] }
  0x77   : > { %863 = vmatpush.bf16.msra.mxu1 %v3501_v13  ;;  %v519_v40 = vpack.c.bf16 %v459_v33, %v455_v32  ;;  %v520_v41 = vpack.c.bf16 %v460_v35, %v456_v34  ;;  %v463_v44 = vld [vmem:[%s4418_s30 + $0x40] sm:$0xff]  ;;  %v464_v46 = vld [vmem:[%s4418_s30 + $0x48] sm:$0xff]  ;;  %v466_v50 = vld [vmem:[%s4418_s30 + $0x58] sm:$0xff]  ;;  %v525_v54 = vpack.c.bf16 %v469_v49, %v465_v48 }
  0x78   : > { %912 = vmatpush.bf16.msra.mxu2 %v3509_v14  ;;  %v467_v45 = vld [vmem:[%s4418_s30 + $0x60] sm:$0xff]  ;;  %v468_v47 = vld [vmem:[%s4418_s30 + $0x68] sm:$0xff]  ;;  %v470_v51 = vld [vmem:[%s4418_s30 + $0x78] sm:$0xff] }
  0x79   : > { %961 = vmatpush.bf16.msra.mxu3 %v3517_v15  ;;  %v523_v52 = vpack.c.bf16 %v467_v45, %v463_v44  ;;  %v524_v53 = vpack.c.bf16 %v468_v47, %v464_v46  ;;  %v526_v55 = vpack.c.bf16 %v470_v51, %v466_v50  ;;  %v471_v56 = vld [vmem:[%s4418_s30 + $0x80] sm:$0xff]  ;;  %v472_v58 = vld [vmem:[%s4418_s30 + $0x88] sm:$0xff]  ;;  %v473_v60 = vld [vmem:[%s4418_s30 + $0x90] sm:$0xff] }
  0x7a   : > { %815 = vmatpush.bf16.msra.mxu0 %v3492_v16  ;;  %v475_v57 = vld [vmem:[%s4418_s30 + $0xa0] sm:$0xff]  ;;  %v476_v59 = vld [vmem:[%s4418_s30 + $0xa8] sm:$0xff]  ;;  %v477_v61 = vld [vmem:[%s4418_s30 + $0xb0] sm:$0xff] }
  0x7b   : > { %864 = vmatpush.bf16.msra.mxu1 %v3500_v17  ;;  %v474_v62 = vld [vmem:[%s4418_s30 + $0x98] sm:$0xff]  ;;  %v527_v0 = vpack.c.bf16 %v475_v57, %v471_v56  ;;  %v528_v1 = vpack.c.bf16 %v476_v59, %v472_v58  ;;  %v529_v2 = vpack.c.bf16 %v477_v61, %v473_v60  ;;  %v479_v4 = vld [vmem:[%s4418_s30 + $0xc0] sm:$0xff]  ;;  %v480_v6 = vld [vmem:[%s4418_s30 + $0xc8] sm:$0xff] }
  0x7c   : > { %913 = vmatpush.bf16.msra.mxu2 %v3508_v18  ;;  %v478_v63 = vld [vmem:[%s4418_s30 + $0xb8] sm:$0xff]  ;;  %v483_v5 = vld [vmem:[%s4418_s30 + $0xe0] sm:$0xff]  ;;  %v484_v7 = vld [vmem:[%s4418_s30 + $0xe8] sm:$0xff] }
  0x7d   : > { %962 = vmatpush.bf16.msra.mxu3 %v3516_v19  ;;  %v530_v3 = vpack.c.bf16 %v478_v63, %v474_v62  ;;  %v481_v8 = vld [vmem:[%s4418_s30 + $0xd0] sm:$0xff]  ;;  %v482_v10 = vld [vmem:[%s4418_s30 + $0xd8] sm:$0xff]  ;;  %v531_v12 = vpack.c.bf16 %v483_v5, %v479_v4  ;;  %v532_v13 = vpack.c.bf16 %v484_v7, %v480_v6  ;;  %v487_v16 = vld [vmem:[%s4418_s30 + $0x100] sm:$0xff] }
  0x7e   : > { %816 = vmatpush.bf16.msra.mxu0 %v3491_v20  ;;  %v485_v9 = vld [vmem:[%s4418_s30 + $0xf0] sm:$0xff]  ;;  %v486_v11 = vld [vmem:[%s4418_s30 + $0xf8] sm:$0xff]  ;;  %v491_v17 = vld [vmem:[%s4418_s30 + $0x120] sm:$0xff] }
  0x7f   : > { %865 = vmatpush.bf16.msra.mxu1 %v3499_v21  ;;  %v533_v14 = vpack.c.bf16 %v485_v9, %v481_v8  ;;  %v534_v15 = vpack.c.bf16 %v486_v11, %v482_v10  ;;  %v488_v18 = vld [vmem:[%s4418_s30 + $0x108] sm:$0xff]  ;;  %v489_v20 = vld [vmem:[%s4418_s30 + $0x110] sm:$0xff]  ;;  %v498_v34 = vld [vmem:[%s4418_s30 + $0x158] sm:$0xff] }
  0x80   : > { %914 = vmatpush.bf16.msra.mxu2 %v3507_v22  ;;  %v492_v19 = vld [vmem:[%s4418_s30 + $0x128] sm:$0xff]  ;;  %v493_v21 = vld [vmem:[%s4418_s30 + $0x130] sm:$0xff]  ;;  %v490_v22 = vld [vmem:[%s4418_s30 + $0x118] sm:$0xff] }
  0x81   : > { %963 = vmatpush.bf16.msra.mxu3 %v3515_v23  ;;  %v494_v23 = vld [vmem:[%s4418_s30 + $0x138] sm:$0xff]  ;;  %v497_v32 = vld [vmem:[%s4418_s30 + $0x150] sm:$0xff] }
  0x82   : > { %817 = vmatpush.bf16.msra.mxu0 %v3490_v24  ;;  %v535_v24 = vpack.c.bf16 %v491_v17, %v487_v16  ;;  %v501_v33 = vld [vmem:[%s4418_s30 + $0x170] sm:$0xff]  ;;  %v502_v35 = vld [vmem:[%s4418_s30 + $0x178] sm:$0xff] }
  0x83   : > { %866 = vmatpush.bf16.msra.mxu1 %v3498_v25  ;;  %v536_v25 = vpack.c.bf16 %v492_v19, %v488_v18  ;;  %v541_v38 = vpack.c.bf16 %v501_v33, %v497_v32  ;;  %v542_v39 = vpack.c.bf16 %v502_v35, %v498_v34  ;;  %v505_v44 = vld [vmem:[%s4418_s30 + $0x190] sm:$0xff]  ;;  %v506_v46 = vld [vmem:[%s4418_s30 + $0x198] sm:$0xff] }
  0x84   : > { %915 = vmatpush.bf16.msra.mxu2 %v3506_v26  ;;  %v537_v26 = vpack.c.bf16 %v493_v21, %v489_v20  ;;  %v509_v45 = vld [vmem:[%s4418_s30 + $0x1b0] sm:$0xff]  ;;  %v510_v47 = vld [vmem:[%s4418_s30 + $0x1b8] sm:$0xff] }
  0x85   : > { %964 = vmatpush.bf16.msra.mxu3 %v3514_v27  ;;  %v538_v27 = vpack.c.bf16 %v494_v23, %v490_v22  ;;  %v545_v50 = vpack.c.bf16 %v509_v45, %v505_v44  ;;  %v546_v51 = vpack.c.bf16 %v510_v47, %v506_v46  ;;  %v513_v56 = vld [vmem:[%s4418_s30 + $0x1d0] sm:$0xff]  ;;  %v514_v58 = vld [vmem:[%s4418_s30 + $0x1d8] sm:$0xff] }
  0x86   : > { %818 = vmatpush.bf16.msra.mxu0 %v3489_v28  ;;  %v495_v28 = vld [vmem:[%s4418_s30 + $0x140] sm:$0xff]  ;;  %v517_v57 = vld [vmem:[%s4418_s30 + $0x1f0] sm:$0xff]  ;;  %v518_v59 = vld [vmem:[%s4418_s30 + $0x1f8] sm:$0xff] }
  0x87   : > { %867 = vmatpush.bf16.msra.mxu1 %v3497_v29  ;;  %v499_v29 = vld [vmem:[%s4418_s30 + $0x160] sm:$0xff]  ;;  %v549_v62 = vpack.c.bf16 %v517_v57, %v513_v56  ;;  %v550_v63 = vpack.c.bf16 %v518_v59, %v514_v58 }
  0x88   : > { %916 = vmatpush.bf16.msra.mxu2 %v3505_v30  ;;  %v496_v30 = vld [vmem:[%s4418_s30 + $0x148] sm:$0xff]  ;;  %v539_v36 = vpack.c.bf16 %v499_v29, %v495_v28 }
  0x89   : > { %965 = vmatpush.bf16.msra.mxu3 %v3513_v31  ;;  %819 = vmatmul.bf16.vlgmr.msra.gmra.mxu0 %v519_v40  ;;  %v500_v31 = vld [vmem:[%s4418_s30 + $0x168] sm:$0xff]  ;;  %v503_v40 = vld [vmem:[%s4418_s30 + $0x180] sm:$0xff] }
  0x8a   : > { %868 = vmatmul.bf16.vlgmr.msra.gmra.mxu1 %v520_v41  ;;  %v540_v37 = vpack.c.bf16 %v500_v31, %v496_v30  ;;  %v507_v41 = vld [vmem:[%s4418_s30 + $0x1a0] sm:$0xff] }
  0x8b   : > { %917 = vmatmul.bf16.vlgmr.msra.gmra.mxu2 %v521_v42  ;;  %v504_v42 = vld [vmem:[%s4418_s30 + $0x188] sm:$0xff]  ;;  %v543_v48 = vpack.c.bf16 %v507_v41, %v503_v40 }
  0x8c   : > { %966 = vmatmul.bf16.vlgmr.msra.gmra.mxu3 %v522_v43  ;;  %v508_v43 = vld [vmem:[%s4418_s30 + $0x1a8] sm:$0xff] }
  0x8d   : > { %v544_v49 = vpack.c.bf16 %v508_v43, %v504_v42 }
  0x99   : > { %824 = vmatmul.bf16.gmra.mxu0 %v523_v52  ;;  %v511_v52 = vld [vmem:[%s4418_s30 + $0x1c0] sm:$0xff] }
  0x9a   : > { %873 = vmatmul.bf16.gmra.mxu1 %v524_v53  ;;  %v515_v53 = vld [vmem:[%s4418_s30 + $0x1e0] sm:$0xff] }
  0x9b   : > { %922 = vmatmul.bf16.gmra.mxu2 %v525_v54  ;;  %v512_v54 = vld [vmem:[%s4418_s30 + $0x1c8] sm:$0xff]  ;;  %v547_v60 = vpack.c.bf16 %v515_v53, %v511_v52 }
  0x9c   : > { %971 = vmatmul.bf16.gmra.mxu3 %v526_v55  ;;  %v516_v55 = vld [vmem:[%s4418_s30 + $0x1e8] sm:$0xff] }
  0x9d   : > { %v548_v61 = vpack.c.bf16 %v516_v55, %v512_v54 }
  0xa9   : > { %829 = vmatmul.bf16.gmra.mxu0 %v527_v0  ;;  %v4511_v0 = vld [vmem:[%s5440_s24] ss:$0 sm:$0xff] }
  0xaa   : > { %878 = vmatmul.bf16.gmra.mxu1 %v528_v1 }
  0xab   : > { %927 = vmatmul.bf16.gmra.mxu2 %v529_v2 }
  0xac   : > { %976 = vmatmul.bf16.gmra.mxu3 %v530_v3 }
  0xb9   : > { %834 = vmatmul.bf16.gmra.mxu0 %v531_v12 }
  0xba   : > { %883 = vmatmul.bf16.gmra.mxu1 %v532_v13 }
  0xbb   : > { %932 = vmatmul.bf16.gmra.mxu2 %v533_v14 }
  0xbc   : > { %981 = vmatmul.bf16.gmra.mxu3 %v534_v15 }
  0xc9   : > { %839 = vmatmul.bf16.gmra.mxu0 %v535_v24 }
  0xca   : > { %888 = vmatmul.bf16.gmra.mxu1 %v536_v25 }
  0xcb   : > { %937 = vmatmul.bf16.gmra.mxu2 %v537_v26 }
  0xcc   : > { %986 = vmatmul.bf16.gmra.mxu3 %v538_v27 }
  0xd9   : > { %844 = vmatmul.bf16.gmra.mxu0 %v539_v36 }
  0xda   : > { %893 = vmatmul.bf16.gmra.mxu1 %v540_v37 }
  0xdb   : > { %942 = vmatmul.bf16.gmra.mxu2 %v541_v38 }
  0xdc   : > { %991 = vmatmul.bf16.gmra.mxu3 %v542_v39 }
  0xe9   : > { %849 = vmatmul.bf16.gmra.mxu0 %v543_v48 }
  0xea   : > { %898 = vmatmul.bf16.gmra.mxu1 %v544_v49 }
  0xeb   : > { %947 = vmatmul.bf16.gmra.mxu2 %v545_v50 }
  0xec   : > { %996 = vmatmul.bf16.gmra.mxu3 %v546_v51 }
  0xf9   : > { %854 = vmatmul.bf16.gmra.mxu0 %v547_v60 }
  0xfa   : > { %903 = vmatmul.bf16.gmra.mxu1 %v548_v61 }
  0xfb   : > { %952 = vmatmul.bf16.gmra.mxu2 %v549_v62 }
  0xfc   : > { %1001 = vmatmul.bf16.gmra.mxu3 %v550_v63 }
 0x106   : > { %v820_v1 = vpop.f32.mrf.mxu0 }
 0x107   : > { %v869_v2 = vpop.f32.mrf.mxu1  ;;  %v821_v3 = vadd.f32 %v4511_v0, %v820_v1 }
 0x109   : > { %v870_v4 = vadd.f32 %v869_v2, %v821_v3 }
 0x10e   : > { %v918_v5 = vpop.f32.mrf.mxu2  ;;  %v822_v8 = vpop.f32.mrf.mxu0 }
 0x10f   : > { %v967_v6 = vpop.f32.mrf.mxu3  ;;  %v919_v7 = vadd.f32 %v918_v5, %v870_v4  ;;  %v871_v9 = vpop.f32.mrf.mxu1  ;;  %v823_v11 = vadd.f32 %v4511_v0, %v822_v8 }
 0x111   : > { %v968_v10 = vadd.f32 %v967_v6, %v919_v7  ;;  %v872_v13 = vadd.f32 %v871_v9, %v823_v11 }
 0x113   : > { %v1007_v12 = vmul.f32 0.044194173, %v968_v10 }
 0x115   : > { %1023 = vst [vmem:[#allocation2 + $0x30] sm:$0xff] %v1007_v12 }
 0x116   : > { %v920_v14 = vpop.f32.mrf.mxu2  ;;  %v825_v17 = vpop.f32.mrf.mxu0 }
 0x117   : > { %v969_v15 = vpop.f32.mrf.mxu3  ;;  %v921_v16 = vadd.f32 %v920_v14, %v872_v13  ;;  %v874_v18 = vpop.f32.mrf.mxu1  ;;  %v826_v19 = vadd.f32 %v4511_v0, %v825_v17 }
 0x119   : > { %v970_v20 = vadd.f32 %v969_v15, %v921_v16  ;;  %v875_v22 = vadd.f32 %v874_v18, %v826_v19 }
 0x11b   : > { %v1008_v21 = vmul.f32 0.044194173, %v970_v20 }
 0x11d   : > { %1024 = vst [vmem:[#allocation2] sm:$0xff] %v1008_v21 }
 0x11e   : > { %v923_v23 = vpop.f32.mrf.mxu2  ;;  %v827_v26 = vpop.f32.mrf.mxu0 }
 0x11f   : > { %v972_v24 = vpop.f32.mrf.mxu3  ;;  %v924_v25 = vadd.f32 %v923_v23, %v875_v22  ;;  %v876_v27 = vpop.f32.mrf.mxu1  ;;  %v828_v29 = vadd.f32 %v4511_v0, %v827_v26 }
 0x121   : > { %v973_v28 = vadd.f32 %v972_v24, %v924_v25  ;;  %v877_v31 = vadd.f32 %v876_v27, %v828_v29 }
 0x123   : > { %v1009_v30 = vmul.f32 0.044194173, %v973_v28 }
 0x125   : > { %1025 = vst [vmem:[#allocation2 + $0x58] sm:$0xff] %v1009_v30 }
 0x126   : > { %v925_v32 = vpop.f32.mrf.mxu2  ;;  %v830_v35 = vpop.f32.mrf.mxu0 }
 0x127   : > { %v974_v33 = vpop.f32.mrf.mxu3  ;;  %v926_v34 = vadd.f32 %v925_v32, %v877_v31  ;;  %v879_v36 = vpop.f32.mrf.mxu1  ;;  %v831_v37 = vadd.f32 %v4511_v0, %v830_v35 }
 0x129   : > { %v975_v38 = vadd.f32 %v974_v33, %v926_v34  ;;  %v880_v40 = vadd.f32 %v879_v36, %v831_v37 }
 0x12b   : > { %v1010_v39 = vmul.f32 0.044194173, %v975_v38 }
 0x12d   : > { %1026 = vst [vmem:[#allocation2 + $0x18] sm:$0xff] %v1010_v39 }
 0x12e   : > { %v928_v41 = vpop.f32.mrf.mxu2  ;;  %v832_v44 = vpop.f32.mrf.mxu0 }
 0x12f   : > { %v977_v42 = vpop.f32.mrf.mxu3  ;;  %v929_v43 = vadd.f32 %v928_v41, %v880_v40  ;;  %v881_v45 = vpop.f32.mrf.mxu1  ;;  %v833_v47 = vadd.f32 %v4511_v0, %v832_v44 }
 0x131   : > { %v978_v46 = vadd.f32 %v977_v42, %v929_v43  ;;  %v882_v49 = vadd.f32 %v881_v45, %v833_v47 }
 0x133   : > { %v1011_v48 = vmul.f32 0.044194173, %v978_v46 }
 0x135   : > { %1027 = vst [vmem:[#allocation2 + $0x50] sm:$0xff] %v1011_v48 }
 0x136   : > { %v930_v50 = vpop.f32.mrf.mxu2  ;;  %v835_v53 = vpop.f32.mrf.mxu0 }
 0x137   : > { %v979_v51 = vpop.f32.mrf.mxu3  ;;  %v931_v52 = vadd.f32 %v930_v50, %v882_v49  ;;  %v884_v54 = vpop.f32.mrf.mxu1  ;;  %v836_v55 = vadd.f32 %v4511_v0, %v835_v53 }
 0x139   : > { %v980_v56 = vadd.f32 %v979_v51, %v931_v52  ;;  %v885_v58 = vadd.f32 %v884_v54, %v836_v55  ;;  %v4179_v52 = vmov -inf  }
 0x13a   : > { %1040 = vst.msk [vmem:[#allocation3] sm:$0xff] %vm1039_vm0, %v4179_v52 }
 0x13b   : > { %v1012_v57 = vmul.f32 0.044194173, %v980_v56  ;;  %1041 = vst.msk [vmem:[#allocation3 + $0x8] sm:$0xff] %vm1039_vm0, %v4179_v52 }
 0x13c   : > { %1042 = vst.msk [vmem:[#allocation3 + $0x10] sm:$0xff] %vm1039_vm0, %v4179_v52 }
 0x13d   : > { %1028 = vst [vmem:[#allocation2 + $0x68] sm:$0xff] %v1012_v57 }
 0x13e   : > { %v933_v59 = vpop.f32.mrf.mxu2  ;;  %v837_v62 = vpop.f32.mrf.mxu0  ;;  %1043 = vst.msk [vmem:[#allocation3 + $0x18] sm:$0xff] %vm1039_vm0, %v4179_v52 }
 0x13f   : > { %v982_v60 = vpop.f32.mrf.mxu3  ;;  %v934_v61 = vadd.f32 %v933_v59, %v885_v58  ;;  %v886_v63 = vpop.f32.mrf.mxu1  ;;  %v838_v2 = vadd.f32 %v4511_v0, %v837_v62  ;;  %1044 = vst.msk [vmem:[#allocation3 + $0x20] sm:$0xff] %vm1039_vm0, %v4179_v52 }
 0x140   : > { %1045 = vst.msk [vmem:[#allocation3 + $0x28] sm:$0xff] %vm1039_vm0, %v4179_v52 }
 0x141   : > { %v983_v1 = vadd.f32 %v982_v60, %v934_v61  ;;  %v887_v4 = vadd.f32 %v886_v63, %v838_v2  ;;  %1046 = vst.msk [vmem:[#allocation3 + $0x30] sm:$0xff] %vm1039_vm0, %v4179_v52 }
 0x142   : > { %1047 = vst.msk [vmem:[#allocation3 + $0x38] sm:$0xff] %vm1039_vm0, %v4179_v52 }
 0x143   : > { %v1013_v3 = vmul.f32 0.044194173, %v983_v1  ;;  %1048 = vst.msk [vmem:[#allocation3 + $0x40] sm:$0xff] %vm1039_vm0, %v4179_v52 }
 0x144   : > { %1049 = vst.msk [vmem:[#allocation3 + $0x48] sm:$0xff] %vm1039_vm0, %v4179_v52 }
 0x145   : > { %1029 = vst [vmem:[#allocation2 + $0x8] sm:$0xff] %v1013_v3 }
 0x146   : > { %v935_v5 = vpop.f32.mrf.mxu2  ;;  %v840_v8 = vpop.f32.mrf.mxu0  ;;  %1050 = vst.msk [vmem:[#allocation3 + $0x50] sm:$0xff] %vm1039_vm0, %v4179_v52 }
 0x147   : > { %v984_v6 = vpop.f32.mrf.mxu3  ;;  %v936_v7 = vadd.f32 %v935_v5, %v887_v4  ;;  %v889_v9 = vpop.f32.mrf.mxu1  ;;  %v841_v10 = vadd.f32 %v4511_v0, %v840_v8  ;;  %1051 = vst.msk [vmem:[#allocation3 + $0x58] sm:$0xff] %vm1039_vm0, %v4179_v52 }
 0x148   : > { %1052 = vst.msk [vmem:[#allocation3 + $0x60] sm:$0xff] %vm1039_vm0, %v4179_v52 }
 0x149   : > { %v985_v11 = vadd.f32 %v984_v6, %v936_v7  ;;  %v890_v13 = vadd.f32 %v889_v9, %v841_v10  ;;  %1053 = vst.msk [vmem:[#allocation3 + $0x68] sm:$0xff] %vm1039_vm0, %v4179_v52  ;;  %v4180_v10 = vmov 0.0  }
 0x14a   : > { %1054 = vst.msk [vmem:[#allocation3 + $0x70] sm:$0xff] %vm1039_vm0, %v4179_v52 }
 0x14b   : > { %v1014_v12 = vmul.f32 0.044194173, %v985_v11  ;;  %1055 = vst.msk [vmem:[#allocation3 + $0x78] sm:$0xff] %vm1039_vm0, %v4179_v52 }
 0x14c   : > { %1056 = vst.msk [vmem:[#allocation4] sm:$0xff] %vm1039_vm0, %v4180_v10 }
 0x14d   : > { %1030 = vst [vmem:[#allocation2 + $0x48] sm:$0xff] %v1014_v12 }
 0x14e   : > { %v938_v14 = vpop.f32.mrf.mxu2  ;;  %v842_v17 = vpop.f32.mrf.mxu0  ;;  %1057 = vst.msk [vmem:[#allocation4 + $0x8] sm:$0xff] %vm1039_vm0, %v4180_v10 }
 0x14f   : > { %v987_v15 = vpop.f32.mrf.mxu3  ;;  %v939_v16 = vadd.f32 %v938_v14, %v890_v13  ;;  %v891_v18 = vpop.f32.mrf.mxu1  ;;  %v843_v20 = vadd.f32 %v4511_v0, %v842_v17  ;;  %1058 = vst.msk [vmem:[#allocation4 + $0x10] sm:$0xff] %vm1039_vm0, %v4180_v10 }
 0x150   : > { %1059 = vst.msk [vmem:[#allocation4 + $0x18] sm:$0xff] %vm1039_vm0, %v4180_v10 }
 0x151   : > { %v988_v19 = vadd.f32 %v987_v15, %v939_v16  ;;  %v892_v22 = vadd.f32 %v891_v18, %v843_v20  ;;  %1060 = vst.msk [vmem:[#allocation4 + $0x20] sm:$0xff] %vm1039_vm0, %v4180_v10 }
 0x152   : > { %1061 = vst.msk [vmem:[#allocation4 + $0x28] sm:$0xff] %vm1039_vm0, %v4180_v10 }
 0x153   : > { %v1015_v21 = vmul.f32 0.044194173, %v988_v19  ;;  %1062 = vst.msk [vmem:[#allocation4 + $0x30] sm:$0xff] %vm1039_vm0, %v4180_v10 }
 0x154   : > { %1063 = vst.msk [vmem:[#allocation4 + $0x38] sm:$0xff] %vm1039_vm0, %v4180_v10 }
 0x155   : > { %1031 = vst [vmem:[#allocation2 + $0x40] sm:$0xff] %v1015_v21 }
 0x156   : > { %v940_v23 = vpop.f32.mrf.mxu2  ;;  %v845_v26 = vpop.f32.mrf.mxu0  ;;  %1064 = vst.msk [vmem:[#allocation4 + $0x40] sm:$0xff] %vm1039_vm0, %v4180_v10 }
 0x157   : > { %v989_v24 = vpop.f32.mrf.mxu3  ;;  %v941_v25 = vadd.f32 %v940_v23, %v892_v22  ;;  %v894_v27 = vpop.f32.mrf.mxu1  ;;  %v846_v28 = vadd.f32 %v4511_v0, %v845_v26  ;;  %1065 = vst.msk [vmem:[#allocation4 + $0x48] sm:$0xff] %vm1039_vm0, %v4180_v10 }
 0x158   : > { %1066 = vst.msk [vmem:[#allocation4 + $0x50] sm:$0xff] %vm1039_vm0, %v4180_v10 }
 0x159   : > { %v990_v29 = vadd.f32 %v989_v24, %v941_v25  ;;  %v895_v31 = vadd.f32 %v894_v27, %v846_v28  ;;  %1067 = vst.msk [vmem:[#allocation4 + $0x58] sm:$0xff] %vm1039_vm0, %v4180_v10 }
 0x15a   : > { %1068 = vst.msk [vmem:[#allocation4 + $0x60] sm:$0xff] %vm1039_vm0, %v4180_v10 }
 0x15b   : > { %v1016_v30 = vmul.f32 0.044194173, %v990_v29  ;;  %1069 = vst.msk [vmem:[#allocation4 + $0x68] sm:$0xff] %vm1039_vm0, %v4180_v10 }
 0x15c   : > { %1070 = vst.msk [vmem:[#allocation4 + $0x70] sm:$0xff] %vm1039_vm0, %v4180_v10 }
 0x15d   : > { %1032 = vst [vmem:[#allocation2 + $0x20] sm:$0xff] %v1016_v30 }
 0x15e   : > { %v943_v32 = vpop.f32.mrf.mxu2  ;;  %v847_v35 = vpop.f32.mrf.mxu0  ;;  %1071 = vst.msk [vmem:[#allocation4 + $0x78] sm:$0xff] %vm1039_vm0, %v4180_v10 }
 0x15f   : > { %v992_v33 = vpop.f32.mrf.mxu3  ;;  %v944_v34 = vadd.f32 %v943_v32, %v895_v31  ;;  %v896_v36 = vpop.f32.mrf.mxu1  ;;  %v848_v38 = vadd.f32 %v4511_v0, %v847_v35  ;;  %1072 = vst [vmem:[#allocation5 + $0x28] sm:$0xff] %v4180_v10 }
 0x160   : > { %1073 = vst [vmem:[#allocation5 + $0x68] sm:$0xff] %v4180_v10 }
 0x161   : > { %v993_v37 = vadd.f32 %v992_v33, %v944_v34  ;;  %v897_v40 = vadd.f32 %v896_v36, %v848_v38  ;;  %1074 = vst [vmem:[#allocation5 + $0x10] sm:$0xff] %v4180_v10 }
 0x162   : > { %1075 = vst [vmem:[#allocation5 + $0x40] sm:$0xff] %v4180_v10 }
 0x163   : > { %v1017_v39 = vmul.f32 0.044194173, %v993_v37  ;;  %1076 = vst [vmem:[#allocation5 + $0x48] sm:$0xff] %v4180_v10 }
 0x164   : > { %1077 = vst [vmem:[#allocation5 + $0x30] sm:$0xff] %v4180_v10 }
 0x165   : > { %1033 = vst [vmem:[#allocation2 + $0x10] sm:$0xff] %v1017_v39 }
 0x166   : > { %v945_v41 = vpop.f32.mrf.mxu2  ;;  %v850_v44 = vpop.f32.mrf.mxu0  ;;  %1078 = vst [vmem:[#allocation5 + $0x70] sm:$0xff] %v4180_v10 }
 0x167   : > { %v994_v42 = vpop.f32.mrf.mxu3  ;;  %v946_v43 = vadd.f32 %v945_v41, %v897_v40  ;;  %v899_v45 = vpop.f32.mrf.mxu1  ;;  %v851_v46 = vadd.f32 %v4511_v0, %v850_v44  ;;  %1079 = vst [vmem:[#allocation5 + $0x38] sm:$0xff] %v4180_v10 }
 0x168   : > { %1080 = vst [vmem:[#allocation5 + $0x20] sm:$0xff] %v4180_v10 }
 0x169   : > { %v995_v47 = vadd.f32 %v994_v42, %v946_v43  ;;  %v900_v49 = vadd.f32 %v899_v45, %v851_v46  ;;  %1081 = vst [vmem:[#allocation5 + $0x78] sm:$0xff] %v4180_v10 }
 0x16a   : > { %1082 = vst [vmem:[#allocation5 + $0x18] sm:$0xff] %v4180_v10 }
 0x16b   : > { %v1018_v48 = vmul.f32 0.044194173, %v995_v47  ;;  %1083 = vst [vmem:[#allocation5 + $0x58] sm:$0xff] %v4180_v10 }
 0x16c   : > { %1084 = vst [vmem:[#allocation5] sm:$0xff] %v4180_v10 }
 0x16d   : > { %1034 = vst [vmem:[#allocation2 + $0x38] sm:$0xff] %v1018_v48 }
 0x16e   : > { %v948_v50 = vpop.f32.mrf.mxu2  ;;  %v852_v54 = vpop.f32.mrf.mxu0  ;;  %1085 = vst [vmem:[#allocation5 + $0x8] sm:$0xff] %v4180_v10 }
 0x16f   : > { %v997_v51 = vpop.f32.mrf.mxu3  ;;  %v949_v53 = vadd.f32 %v948_v50, %v900_v49  ;;  %v901_v55 = vpop.f32.mrf.mxu1  ;;  %v853_v57 = vadd.f32 %v4511_v0, %v852_v54  ;;  %1086 = vst [vmem:[#allocation5 + $0x60] sm:$0xff] %v4180_v10 }
 0x170   : > { %1087 = vst [vmem:[#allocation5 + $0x50] sm:$0xff] %v4180_v10 }
 0x171   : > { %v998_v56 = vadd.f32 %v997_v51, %v949_v53  ;;  %v902_v59 = vadd.f32 %v901_v55, %v853_v57 }
 0x173   : > { %v1019_v58 = vmul.f32 0.044194173, %v998_v56 }
 0x175   : > { %1035 = vst [vmem:[#allocation2 + $0x60] sm:$0xff] %v1019_v58 }
 0x176   : > { %v950_v60 = vpop.f32.mrf.mxu2  ;;  %v855_v63 = vpop.f32.mrf.mxu0 }
 0x177   : > { %v999_v61 = vpop.f32.mrf.mxu3  ;;  %v951_v62 = vadd.f32 %v950_v60, %v902_v59  ;;  %v856_v1 = vadd.f32 %v4511_v0, %v855_v63  ;;  %v904_v3 = vpop.f32.mrf.mxu1 }
 0x179   : > { %v1000_v2 = vadd.f32 %v999_v61, %v951_v62  ;;  %v905_v5 = vadd.f32 %v904_v3, %v856_v1 }
 0x17b   : > { %v1020_v4 = vmul.f32 0.044194173, %v1000_v2 }
 0x17d   : > { %1036 = vst [vmem:[#allocation2 + $0x70] sm:$0xff] %v1020_v4 }
 0x17e   : > { %v953_v6 = vpop.f32.mrf.mxu2  ;;  %v857_v9 = vpop.f32.mrf.mxu0 }
 0x17f   : > { %v1002_v7 = vpop.f32.mrf.mxu3  ;;  %v954_v8 = vadd.f32 %v953_v6, %v905_v5  ;;  %v858_v12 = vadd.f32 %v4511_v0, %v857_v9  ;;  %v906_v14 = vpop.f32.mrf.mxu1 }
 0x181   : > { %v1003_v11 = vadd.f32 %v1002_v7, %v954_v8  ;;  %v907_v15 = vadd.f32 %v906_v14, %v858_v12 }
 0x183   : > { %v1021_v13 = vmul.f32 0.044194173, %v1003_v11 }
 0x185   : > { %1037 = vst [vmem:[#allocation2 + $0x78] sm:$0xff] %v1021_v13 }
 0x186   : > { %v955_v16 = vpop.f32.mrf.mxu2 }
 0x187   : > { %v956_v17 = vadd.f32 %v955_v16, %v907_v15  ;;  %v1004_v18 = vpop.f32.mrf.mxu3 }
 0x189   : > { %v1005_v0 = vadd.f32 %v1004_v18, %v956_v17 }
 0x18b   : > { %v1022_v19 = vmul.f32 0.044194173, %v1005_v0 }
 0x18d   : > { %1038 = vst [vmem:[#allocation2 + $0x28] sm:$0xff] %v1022_v19 }
 0x18e PF: > { %v3528_v20 = vld [vmem:[#allocation12 + $0x38] sm:$0xff]  ;;  %v3527_v22 = vld [vmem:[#allocation12 + $0x30] sm:$0xff]  ;;  %v3526_v24 = vld [vmem:[#allocation12 + $0x28] sm:$0xff]  ;;  %s5441_s4 = sld [smem:[#allocation37_spill]]  ;;  %vm2497_vm1 = vcmask 7168  }
 0x18f   : > { %v3536_v21 = vld [vmem:[#allocation12 + $0x78] sm:$0xff]  ;;  %3585 = vmatpush.bf16.msra.mxu2 %v3528_v20  ;;  %v3535_v23 = vld [vmem:[#allocation12 + $0x70] sm:$0xff]  ;;  %1444 = vmatpush.bf16.msra.mxu0 %v3528_v20  ;;  %v3534_v25 = vld [vmem:[#allocation12 + $0x68] sm:$0xff]  ;;  %s5442_s3 = sld [smem:[#allocation38_spill]] }
 0x190   : > { %3593 = vmatpush.bf16.msra.mxu3 %v3536_v21  ;;  %1493 = vmatpush.bf16.msra.mxu1 %v3536_v21  ;;  %v3525_v26 = vld [vmem:[#allocation12 + $0x20] sm:$0xff]  ;;  %v3524_v28 = vld [vmem:[#allocation12 + $0x18] sm:$0xff]  ;;  %v3523_v30 = vld [vmem:[#allocation12 + $0x10] sm:$0xff]  ;;  %s5443_s22 = sld [smem:[#allocation22_spill]] }
 0x191   : > { %v3533_v27 = vld [vmem:[#allocation12 + $0x60] sm:$0xff]  ;;  %v3532_v29 = vld [vmem:[#allocation12 + $0x58] sm:$0xff]  ;;  %v3531_v31 = vld [vmem:[#allocation12 + $0x50] sm:$0xff] }
 0x192   : > { %v3522_v32 = vld [vmem:[#allocation12 + $0x8] sm:$0xff]  ;;  %v3521_v34 = vld [vmem:[#allocation12] sm:$0xff]  ;;  %v3544_v42 = vld [vmem:[#allocation12 + $0xb8] sm:$0xff] }
 0x193   : > { %3586 = vmatpush.bf16.msra.mxu2 %v3527_v22  ;;  %1445 = vmatpush.bf16.msra.mxu0 %v3527_v22  ;;  %v3530_v33 = vld [vmem:[#allocation12 + $0x48] sm:$0xff]  ;;  %v3529_v35 = vld [vmem:[#allocation12 + $0x40] sm:$0xff]  ;;  %v3552_v43 = vld [vmem:[#allocation12 + $0xf8] sm:$0xff] }
 0x194   : > { %3594 = vmatpush.bf16.msra.mxu3 %v3535_v23  ;;  %1494 = vmatpush.bf16.msra.mxu1 %v3535_v23  ;;  %v1120_v36 = vld [vmem:[%s4426_s12 + $0x100] sm:$0xff]  ;;  %v1121_v38 = vld [vmem:[%s4426_s12 + $0x108] sm:$0xff]  ;;  %v3543_v44 = vld [vmem:[#allocation12 + $0xb0] sm:$0xff] }
 0x195   : > { %v1124_v37 = vld [vmem:[%s4426_s12 + $0x120] sm:$0xff]  ;;  %v1125_v39 = vld [vmem:[%s4426_s12 + $0x128] sm:$0xff]  ;;  %v3551_v45 = vld [vmem:[#allocation12 + $0xf0] sm:$0xff] }
 0x196   : > { %v4565_v40 = vpack.c.bf16 %v1124_v37, %v1120_v36  ;;  %v4567_v41 = vpack.c.bf16 %v1125_v39, %v1121_v38  ;;  %v3542_v46 = vld [vmem:[#allocation12 + $0xa8] sm:$0xff]  ;;  %v1128_v48 = vld [vmem:[%s4426_s12 + $0x140] sm:$0xff]  ;;  %v3540_v56 = vld [vmem:[#allocation12 + $0x98] sm:$0xff]  ;;  %p3480_p1 = scmp.ne.s32.totalorder %s5443_s22, 1 }
 0x197   : > { %3587 = vmatpush.bf16.msra.mxu2 %v3526_v24  ;;  %1446 = vmatpush.bf16.msra.mxu0 %v3526_v24  ;;  %v3550_v47 = vld [vmem:[#allocation12 + $0xe8] sm:$0xff]  ;;  %v1132_v49 = vld [vmem:[%s4426_s12 + $0x160] sm:$0xff]  ;;  %v3548_v57 = vld [vmem:[#allocation12 + $0xd8] sm:$0xff] }
 0x198   : > { %3595 = vmatpush.bf16.msra.mxu3 %v3534_v25  ;;  %1495 = vmatpush.bf16.msra.mxu1 %v3534_v25  ;;  %v1129_v50 = vld [vmem:[%s4426_s12 + $0x148] sm:$0xff]  ;;  %v3541_v52 = vld [vmem:[#allocation12 + $0xa0] sm:$0xff]  ;;  %v4575_v54 = vpack.c.bf16 %v1132_v49, %v1128_v48  ;;  %v3539_v58 = vld [vmem:[#allocation12 + $0x90] sm:$0xff] }
 0x199   : > { %v1133_v51 = vld [vmem:[%s4426_s12 + $0x168] sm:$0xff]  ;;  %v3549_v53 = vld [vmem:[#allocation12 + $0xe0] sm:$0xff]  ;;  %v3547_v59 = vld [vmem:[#allocation12 + $0xd0] sm:$0xff] }
 0x19a   : > { %v4577_v55 = vpack.c.bf16 %v1133_v51, %v1129_v50  ;;  %v3538_v60 = vld [vmem:[#allocation12 + $0x88] sm:$0xff]  ;;  %v1136_v62 = vld [vmem:[%s4426_s12 + $0x180] sm:$0xff]  ;;  %v1090_v24 = vld [vmem:[%s4426_s12 + $0x10] sm:$0xff] }
 0x19b   : > { %3588 = vmatpush.bf16.msra.mxu2 %v3525_v26  ;;  %1447 = vmatpush.bf16.msra.mxu0 %v3525_v26  ;;  %v3546_v61 = vld [vmem:[#allocation12 + $0xc8] sm:$0xff]  ;;  %v1140_v63 = vld [vmem:[%s4426_s12 + $0x1a0] sm:$0xff]  ;;  %v1094_v25 = vld [vmem:[%s4426_s12 + $0x30] sm:$0xff] }
 0x19c   : > { %3596 = vmatpush.bf16.msra.mxu3 %v3533_v27  ;;  %1496 = vmatpush.bf16.msra.mxu1 %v3533_v27  ;;  %v1137_v1 = vld [vmem:[%s4426_s12 + $0x188] sm:$0xff]  ;;  %v3537_v3 = vld [vmem:[#allocation12 + $0x80] sm:$0xff]  ;;  %v4585_v5 = vpack.c.bf16 %v1140_v63, %v1136_v62  ;;  %v1091_v26 = vld [vmem:[%s4426_s12 + $0x18] sm:$0xff] }
 0x19d   : > { %v1141_v2 = vld [vmem:[%s4426_s12 + $0x1a8] sm:$0xff]  ;;  %v3545_v4 = vld [vmem:[#allocation12 + $0xc0] sm:$0xff]  ;;  %v1095_v27 = vld [vmem:[%s4426_s12 + $0x38] sm:$0xff] }
 0x19e   : > { %v4587_v6 = vpack.c.bf16 %v1141_v2, %v1137_v1  ;;  %v1088_v7 = vld [vmem:[%s4426_s12] sm:$0xff]  ;;  %v1089_v10 = vld [vmem:[%s4426_s12 + $0x8] sm:$0xff]  ;;  %v1098_v36 = vld [vmem:[%s4426_s12 + $0x50] sm:$0xff] }
 0x19f   : > { %3589 = vmatpush.bf16.msra.mxu2 %v3524_v28  ;;  %1448 = vmatpush.bf16.msra.mxu0 %v3524_v28  ;;  %v1092_v8 = vld [vmem:[%s4426_s12 + $0x20] sm:$0xff]  ;;  %v1093_v11 = vld [vmem:[%s4426_s12 + $0x28] sm:$0xff]  ;;  %v4625_v28 = vpack.c.bf16 %v1094_v25, %v1090_v24  ;;  %v1102_v37 = vld [vmem:[%s4426_s12 + $0x70] sm:$0xff] }
 0x1a0   : > { %3597 = vmatpush.bf16.msra.mxu3 %v3532_v29  ;;  %1497 = vmatpush.bf16.msra.mxu1 %v3532_v29  ;;  %v4593_v9 = vpack.c.bf16 %v1092_v8, %v1088_v7  ;;  %v4597_v12 = vpack.c.bf16 %v1093_v11, %v1089_v10  ;;  %v1144_v13 = vld [vmem:[%s4426_s12 + $0x1c0] sm:$0xff]  ;;  %v1145_v15 = vld [vmem:[%s4426_s12 + $0x1c8] sm:$0xff]  ;;  %v4627_v29 = vpack.c.bf16 %v1095_v27, %v1091_v26  ;;  %v1099_v38 = vld [vmem:[%s4426_s12 + $0x58] sm:$0xff] }
 0x1a1   : > { %v1148_v14 = vld [vmem:[%s4426_s12 + $0x1e0] sm:$0xff]  ;;  %v1149_v16 = vld [vmem:[%s4426_s12 + $0x1e8] sm:$0xff]  ;;  %v1103_v39 = vld [vmem:[%s4426_s12 + $0x78] sm:$0xff] }
 0x1a2   : > { %v4605_v17 = vpack.c.bf16 %v1148_v14, %v1144_v13  ;;  %v4607_v18 = vpack.c.bf16 %v1149_v16, %v1145_v15  ;;  %v1096_v0 = vld [vmem:[%s4426_s12 + $0x40] sm:$0xff]  ;;  %v1097_v21 = vld [vmem:[%s4426_s12 + $0x48] sm:$0xff]  ;;  %v1106_v50 = vld [vmem:[%s4426_s12 + $0x90] sm:$0xff] }
 0x1a3   : > { %3590 = vmatpush.bf16.msra.mxu2 %v3523_v30  ;;  %1449 = vmatpush.bf16.msra.mxu0 %v3523_v30  ;;  %v1100_v19 = vld [vmem:[%s4426_s12 + $0x60] sm:$0xff]  ;;  %v1101_v22 = vld [vmem:[%s4426_s12 + $0x68] sm:$0xff]  ;;  %v1110_v51 = vld [vmem:[%s4426_s12 + $0xb0] sm:$0xff] }
 0x1a4   : > { %3598 = vmatpush.bf16.msra.mxu3 %v3531_v31  ;;  %1498 = vmatpush.bf16.msra.mxu1 %v3531_v31  ;;  %v4613_v20 = vpack.c.bf16 %v1100_v19, %v1096_v0  ;;  %v4617_v23 = vpack.c.bf16 %v1101_v22, %v1097_v21  ;;  %v1104_v30 = vld [vmem:[%s4426_s12 + $0x80] sm:$0xff]  ;;  %v1117_v48 = vld [vmem:[%s4426_s12 + $0xe8] sm:$0xff]  ;;  %v1122_v1 = vld [vmem:[%s4426_s12 + $0x110] sm:$0xff] }
 0x1a5   : > { %v1108_v31 = vld [vmem:[%s4426_s12 + $0xa0] sm:$0xff]  ;;  %v1126_v2 = vld [vmem:[%s4426_s12 + $0x130] sm:$0xff]  ;;  %v3576_v10 = vld [vmem:[#allocation14 + $0xb8] sm:$0xff] }
 0x1a6   : > { %v4685_v7 = vpack.c.bf16 %v1126_v2, %v1122_v1  ;;  %v4694_v11 = vld [vmem:[%s5441_s4] ss:$0 sm:$0xff]  ;;  %v3560_v13 = vld [vmem:[#allocation14 + $0x38] sm:$0xff]  ;;  %v3575_v19 = vld [vmem:[#allocation14 + $0xb0] sm:$0xff] }
 0x1a7   : > { %3591 = vmatpush.bf16.msra.mxu2 %v3522_v32  ;;  %1450 = vmatpush.bf16.msra.mxu0 %v3522_v32  ;;  %v4633_v32 = vpack.c.bf16 %v1108_v31, %v1104_v30  ;;  %v3584_v14 = vld [vmem:[#allocation14 + $0xf8] sm:$0xff]  ;;  %v3559_v22 = vld [vmem:[#allocation14 + $0x30] sm:$0xff]  ;;  %v3574_v27 = vld [vmem:[#allocation14 + $0xa8] sm:$0xff] }
 0x1a8   : > { %3599 = vmatpush.bf16.msra.mxu3 %v3530_v33  ;;  %1499 = vmatpush.bf16.msra.mxu1 %v3530_v33  ;;  %v1105_v33 = vld [vmem:[%s4426_s12 + $0x88] sm:$0xff]  ;;  %v3568_v0 = vld [vmem:[#allocation14 + $0x78] sm:$0xff]  ;;  %v3583_v24 = vld [vmem:[#allocation14 + $0xf0] sm:$0xff] }
 0x1a9   : > { %v3567_v26 = vld [vmem:[#allocation14 + $0x70] sm:$0xff] }
 0x1aa   : > { %v1130_v30 = vld [vmem:[%s4426_s12 + $0x150] sm:$0xff] }
 0x1ab   : > { %3592 = vmatpush.bf16.msra.mxu2 %v3521_v34  ;;  %1451 = vmatpush.bf16.msra.mxu0 %v3521_v34  ;;  %v1109_v34 = vld [vmem:[%s4426_s12 + $0xa8] sm:$0xff]  ;;  %v1134_v31 = vld [vmem:[%s4426_s12 + $0x170] sm:$0xff] }
 0x1ac   : > { %3600 = vmatpush.bf16.msra.mxu3 %v3529_v35  ;;  %1500 = vmatpush.bf16.msra.mxu1 %v3529_v35  ;;  %v4637_v35 = vpack.c.bf16 %v1109_v34, %v1105_v33  ;;  %v1131_v33 = vld [vmem:[%s4426_s12 + $0x158] sm:$0xff] }
 0x1ad   : > { %v1135_v34 = vld [vmem:[%s4426_s12 + $0x178] sm:$0xff] }
 0x1ae   : > { %1472 = vmatmul.bf16.vlgmr.msra.gmra.mxu2 %v4565_v40  ;;  %1452 = vmatmul.bf16.vlgmr.msra.gmra.mxu0 %v4593_v9 }
 0x1af   : > { %1521 = vmatmul.bf16.vlgmr.msra.gmra.mxu3 %v4567_v41  ;;  %1542 = vmatpush.bf16.msrb.mxu2 %v3544_v42  ;;  %v4645_v42 = vpack.c.bf16 %v1102_v37, %v1098_v36  ;;  %v3558_v36 = vld [vmem:[#allocation14 + $0x28] sm:$0xff] }
 0x1b0   : > { %1591 = vmatpush.bf16.msrb.mxu3 %v3552_v43  ;;  %1501 = vmatmul.bf16.vlgmr.msra.gmra.mxu1 %v4597_v12  ;;  %v4647_v43 = vpack.c.bf16 %v1103_v39, %v1099_v38  ;;  %v3582_v37 = vld [vmem:[#allocation14 + $0xe8] sm:$0xff] }
 0x1b1   : > { %1900 = vmatpush.bf16.msrb.mxu0 %v3560_v13  ;;  %1949 = vmatpush.bf16.msrb.mxu1 %v3568_v0  ;;  %v3555_v13 = vld [vmem:[#allocation14 + $0x10] sm:$0xff]  ;;  %v3570_v0 = vld [vmem:[#allocation14 + $0x88] sm:$0xff] }
 0x1b3   : > { %1543 = vmatpush.bf16.msrb.mxu2 %v3543_v44  ;;  %v1112_v44 = vld [vmem:[%s4426_s12 + $0xc0] sm:$0xff] }
 0x1b4   : > { %1592 = vmatpush.bf16.msrb.mxu3 %v3551_v45  ;;  %v1116_v45 = vld [vmem:[%s4426_s12 + $0xe0] sm:$0xff] }
 0x1b5   : > { %1901 = vmatpush.bf16.msrb.mxu0 %v3559_v22  ;;  %1950 = vmatpush.bf16.msrb.mxu1 %v3567_v26  ;;  %v1139_v22 = vld [vmem:[%s4426_s12 + $0x198] sm:$0xff]  ;;  %v3554_v26 = vld [vmem:[#allocation14 + $0x8] sm:$0xff] }
 0x1b7   : > { %1544 = vmatpush.bf16.msrb.mxu2 %v3542_v46  ;;  %v4653_v46 = vpack.c.bf16 %v1116_v45, %v1112_v44  ;;  %v3566_v44 = vld [vmem:[#allocation14 + $0x68] sm:$0xff]  ;;  %v3573_v45 = vld [vmem:[#allocation14 + $0xa0] sm:$0xff] }
 0x1b8   : > { %1593 = vmatpush.bf16.msrb.mxu3 %v3550_v47  ;;  %v1113_v47 = vld [vmem:[%s4426_s12 + $0xc8] sm:$0xff] }
 0x1b9   : > { %v4657_v49 = vpack.c.bf16 %v1117_v48, %v1113_v47  ;;  %1902 = vmatpush.bf16.msrb.mxu0 %v3558_v36  ;;  %v4704_v48 = vpack.c.bf16 %v1134_v31, %v1130_v30  ;;  %1951 = vmatpush.bf16.msrb.mxu1 %v3566_v44  ;;  %v3577_v44 = vld [vmem:[#allocation14 + $0xc0] sm:$0xff] }
 0x1bb   : > { %1545 = vmatpush.bf16.msrb.mxu2 %v3541_v52  ;;  %v1107_v52 = vld [vmem:[%s4426_s12 + $0x98] sm:$0xff] }
 0x1bc   : > { %1594 = vmatpush.bf16.msrb.mxu3 %v3549_v53  ;;  %v1111_v53 = vld [vmem:[%s4426_s12 + $0xb8] sm:$0xff] }
 0x1be   : > { %1477 = vmatmul.bf16.gmra.mxu2 %v4575_v54  ;;  %1457 = vmatmul.bf16.gmra.mxu0 %v4613_v20 }
 0x1bf   : > { %1526 = vmatmul.bf16.gmra.mxu3 %v4577_v55  ;;  %1546 = vmatpush.bf16.msrb.mxu2 %v3540_v56  ;;  %v4665_v56 = vpack.c.bf16 %v1110_v51, %v1106_v50  ;;  %v4706_v50 = vpack.c.bf16 %v1135_v34, %v1131_v33  ;;  %v3557_v51 = vld [vmem:[#allocation14 + $0x20] sm:$0xff]  ;;  %v3562_v33 = vld [vmem:[#allocation14 + $0x48] sm:$0xff] }
 0x1c0   : > { %1595 = vmatpush.bf16.msrb.mxu3 %v3548_v57  ;;  %1506 = vmatmul.bf16.gmra.mxu1 %v4617_v23  ;;  %v4667_v57 = vpack.c.bf16 %v1111_v53, %v1107_v52  ;;  %v3581_v52 = vld [vmem:[#allocation14 + $0xe0] sm:$0xff] }
 0x1c1   : > { %1903 = vmatpush.bf16.msrb.mxu0 %v3557_v51  ;;  %v3569_v34 = vld [vmem:[#allocation14 + $0x80] sm:$0xff] }
 0x1c2   : > { %v3561_v51 = vld [vmem:[#allocation14 + $0x40] sm:$0xff] }
 0x1c3   : > { %1547 = vmatpush.bf16.msrb.mxu2 %v3539_v58  ;;  %v1114_v58 = vld [vmem:[%s4426_s12 + $0xd0] sm:$0xff] }
 0x1c4   : > { %1596 = vmatpush.bf16.msrb.mxu3 %v3547_v59  ;;  %v1118_v59 = vld [vmem:[%s4426_s12 + $0xf0] sm:$0xff] }
 0x1c5   : > { %v4675_v62 = vpack.c.bf16 %v1118_v59, %v1114_v58  ;;  %v3565_v58 = vld [vmem:[#allocation14 + $0x60] sm:$0xff]  ;;  %v3572_v59 = vld [vmem:[#allocation14 + $0x98] sm:$0xff] }
 0x1c6   : > { %1952 = vmatpush.bf16.msrb.mxu1 %v3565_v58 }
 0x1c7   : > { %1548 = vmatpush.bf16.msrb.mxu2 %v3538_v60  ;;  %v1115_v60 = vld [vmem:[%s4426_s12 + $0xd8] sm:$0xff] }
 0x1c8   : > { %1597 = vmatpush.bf16.msrb.mxu3 %v3546_v61  ;;  %v1119_v61 = vld [vmem:[%s4426_s12 + $0xf8] sm:$0xff] }
 0x1c9   : > { %v4677_v63 = vpack.c.bf16 %v1119_v61, %v1115_v60  ;;  %v3556_v60 = vld [vmem:[#allocation14 + $0x18] sm:$0xff] }
 0x1ca   : > { %v3580_v61 = vld [vmem:[#allocation14 + $0xd8] sm:$0xff]  ;;  %1904 = vmatpush.bf16.msrb.mxu0 %v3556_v60 }
 0x1cb   : > { %1549 = vmatpush.bf16.msrb.mxu2 %v3537_v3  ;;  %v1123_v3 = vld [vmem:[%s4426_s12 + $0x118] sm:$0xff] }
 0x1cc   : > { %1598 = vmatpush.bf16.msrb.mxu3 %v3545_v4  ;;  %v1127_v4 = vld [vmem:[%s4426_s12 + $0x138] sm:$0xff] }
 0x1cd   : > { %v4687_v8 = vpack.c.bf16 %v1127_v4, %v1123_v3  ;;  %v3564_v3 = vld [vmem:[#allocation14 + $0x58] sm:$0xff]  ;;  %v3571_v4 = vld [vmem:[#allocation14 + $0x90] sm:$0xff] }
 0x1ce   : > { %1482 = vmatmul.bf16.gmra.mxu2 %v4585_v5  ;;  %1462 = vmatmul.bf16.gmra.mxu0 %v4633_v32 }
 0x1cf   : > { %1531 = vmatmul.bf16.gmra.mxu3 %v4587_v6  ;;  %1998 = vmatpush.bf16.msra.mxu2 %v3576_v10 }
 0x1d0   : > { %1511 = vmatmul.bf16.gmra.mxu1 %v4637_v35  ;;  %2047 = vmatpush.bf16.msra.mxu3 %v3584_v14  ;;  %v3579_v14 = vld [vmem:[#allocation14 + $0xd0] sm:$0xff] }
 0x1d1   : > { %1953 = vmatpush.bf16.msrb.mxu1 %v3564_v3  ;;  %1905 = vmatpush.bf16.msrb.mxu0 %v3555_v13  ;;  %v1150_v13 = vld [vmem:[%s4426_s12 + $0x1f0] sm:$0xff] }
 0x1d3   : > { %1999 = vmatpush.bf16.msra.mxu2 %v3575_v19  ;;  %v1138_v19 = vld [vmem:[%s4426_s12 + $0x190] sm:$0xff] }
 0x1d4   : > { %2048 = vmatpush.bf16.msra.mxu3 %v3583_v24  ;;  %v1143_v24 = vld [vmem:[%s4426_s12 + $0x1b8] sm:$0xff] }
 0x1d5   : > { %1906 = vmatpush.bf16.msrb.mxu0 %v3554_v26 }
 0x1d7   : > { %2000 = vmatpush.bf16.msra.mxu2 %v3574_v27  ;;  %v3578_v27 = vld [vmem:[#allocation14 + $0xc8] sm:$0xff] }
 0x1d8   : > { %2049 = vmatpush.bf16.msra.mxu3 %v3582_v37 }
 0x1db   : > { %2001 = vmatpush.bf16.msra.mxu2 %v3573_v45 }
 0x1dc   : > { %2050 = vmatpush.bf16.msra.mxu3 %v3581_v52 }
 0x1de   : > { %1487 = vmatmul.bf16.gmra.mxu2 %v4605_v17  ;;  %1467 = vmatmul.bf16.gmra.mxu0 %v4653_v46 }
 0x1df   : > { %1536 = vmatmul.bf16.gmra.mxu3 %v4607_v18  ;;  %2002 = vmatpush.bf16.msra.mxu2 %v3572_v59 }
 0x1e0   : > { %1516 = vmatmul.bf16.gmra.mxu1 %v4657_v49  ;;  %2051 = vmatpush.bf16.msra.mxu3 %v3580_v61 }
 0x1e3   : > { %2003 = vmatpush.bf16.msra.mxu2 %v3571_v4  ;;  %v1146_v4 = vld [vmem:[%s4426_s12 + $0x1d0] sm:$0xff] }
 0x1e4   : > { %2052 = vmatpush.bf16.msra.mxu3 %v3579_v14  ;;  %v1147_v14 = vld [vmem:[%s4426_s12 + $0x1d8] sm:$0xff] }
 0x1e7   : > { %2004 = vmatpush.bf16.msra.mxu2 %v3570_v0 }
 0x1e8   : > { %2053 = vmatpush.bf16.msra.mxu3 %v3578_v27 }
 0x1eb   : > { %2005 = vmatpush.bf16.msra.mxu2 %v3569_v34 }
 0x1ec   : > { %2054 = vmatpush.bf16.msra.mxu3 %v3577_v44 }
 0x1ee   : > { %1550 = vmatmul.bf16.vlgmr.msrb.gmra.mxu2 %v4625_v28 }
 0x1ef   : > { %1599 = vmatmul.bf16.vlgmr.msrb.gmra.mxu3 %v4627_v29 }
 0x1fe   : > { %1555 = vmatmul.bf16.gmra.mxu2 %v4645_v42 }
 0x1ff   : > { %1604 = vmatmul.bf16.gmra.mxu3 %v4647_v43 }
 0x20e   : > { %1560 = vmatmul.bf16.gmra.mxu2 %v4665_v56 }
 0x20f   : > { %1609 = vmatmul.bf16.gmra.mxu3 %v4667_v57 }
 0x21e   : > { %1565 = vmatmul.bf16.gmra.mxu2 %v4675_v62 }
 0x21f   : > { %1614 = vmatmul.bf16.gmra.mxu3 %v4677_v63 }
 0x22d   : > { %v1502_v58 = vpop.f32.mrf.mxu1 }
 0x22e   : > { %1570 = vmatmul.bf16.gmra.mxu2 %v4685_v7 }
 0x22f   : > { %1619 = vmatmul.bf16.gmra.mxu3 %v4687_v8 }
 0x231   : > { %v1473_v15 = vpop.f32.mrf.mxu2 }
 0x232   : > { %v1522_v16 = vpop.f32.mrf.mxu3  ;;  %v1474_v21 = vadd.f32 %v4694_v11, %v1473_v15 }
 0x234   : > { %v4697_v25 = vadd.f32 %v1522_v16, %v1474_v21  ;;  %v3563_v16 = vld [vmem:[#allocation14 + $0x50] sm:$0xff] }
 0x235   : > { %v1142_v21 = vld [vmem:[%s4426_s12 + $0x1b0] sm:$0xff]  ;;  %1954 = vmatpush.bf16.msrb.mxu1 %v3563_v16  ;;  %v1151_v16 = vld [vmem:[%s4426_s12 + $0x1f8] sm:$0xff] }
 0x236   : > { %v4720_v37 = vpack.c.bf16 %v1142_v21, %v1138_v19 }
 0x239   : > { %v1475_v38 = vpop.f32.mrf.mxu2  ;;  %1955 = vmatpush.bf16.msrb.mxu1 %v3562_v33 }
 0x23a   : > { %v1524_v39 = vpop.f32.mrf.mxu3  ;;  %v1476_v47 = vadd.f32 %v4694_v11, %v1475_v38  ;;  %v4722_v38 = vpack.c.bf16 %v1143_v24, %v1139_v22  ;;  %v4739_v22 = vpack.c.bf16 %v1150_v13, %v1146_v4 }
 0x23c   : > { %v4708_v53 = vadd.f32 %v1524_v39, %v1476_v47  ;;  %v3553_v39 = vld [vmem:[#allocation14] sm:$0xff]  ;;  %v1453_v47 = vpop.f32.mrf.mxu0 }
 0x23d   : > { %1907 = vmatpush.bf16.msrb.mxu0 %v3553_v39  ;;  %v1454_v52 = vadd.f32 %v4694_v11, %v1453_v47  ;;  %1956 = vmatpush.bf16.msrb.mxu1 %v3561_v51 }
 0x23e   : > { %1575 = vmatmul.bf16.gmra.mxu2 %v4704_v48 }
 0x23f   : > { %1624 = vmatmul.bf16.gmra.mxu3 %v4706_v50  ;;  %v1503_v59 = vadd.f32 %v1502_v58, %v1454_v52 }
 0x240   : > { %1908 = vmatmul.bf16.vlgmr.msrb.gmra.mxu0 %v4593_v9  ;;  %1957 = vmatmul.bf16.vlgmr.msrb.gmra.mxu1 %v4597_v12  ;;  %v4741_v9 = vpack.c.bf16 %v1151_v16, %v1147_v14 }
 0x241   : > { %v1478_v1 = vpop.f32.mrf.mxu2 }
 0x242   : > { %v1527_v2 = vpop.f32.mrf.mxu3  ;;  %v1479_v10 = vadd.f32 %v4694_v11, %v1478_v1 }
 0x244   : > { %v4713_v15 = vadd.f32 %v1527_v2, %v1479_v10  ;;  %v1455_v3 = vpop.f32.mrf.mxu0  ;;  %v1504_v10 = vpop.f32.mrf.mxu1 }
 0x245   : > { %v1456_v14 = vadd.f32 %v4694_v11, %v1455_v3 }
 0x249   : > { %v1480_v30 = vpop.f32.mrf.mxu2 }
 0x24a   : > { %v1529_v31 = vpop.f32.mrf.mxu3  ;;  %v1481_v36 = vadd.f32 %v4694_v11, %v1480_v30 }
 0x24c   : > { %v4724_v45 = vadd.f32 %v1529_v31, %v1481_v36  ;;  %v1458_v26 = vpop.f32.mrf.mxu0  ;;  %v1507_v27 = vpop.f32.mrf.mxu1 }
 0x24d   : > { %v1459_v12 = vadd.f32 %v4694_v11, %v1458_v26 }
 0x24e   : > { %1580 = vmatmul.bf16.gmra.mxu2 %v4720_v37 }
 0x24f   : > { %1629 = vmatmul.bf16.gmra.mxu3 %v4722_v38  ;;  %v1508_v30 = vadd.f32 %v1507_v27, %v1459_v12 }
 0x250   : > { %1913 = vmatmul.bf16.gmra.mxu0 %v4613_v20  ;;  %1962 = vmatmul.bf16.gmra.mxu1 %v4617_v23 }
 0x251   : > { %v1483_v60 = vpop.f32.mrf.mxu2 }
 0x252   : > { %v1532_v61 = vpop.f32.mrf.mxu3  ;;  %v1484_v1 = vadd.f32 %v4694_v11, %v1483_v60 }
 0x254   : > { %v4732_v2 = vadd.f32 %v1532_v61, %v1484_v1  ;;  %v1460_v39 = vpop.f32.mrf.mxu0  ;;  %v1509_v44 = vpop.f32.mrf.mxu1 }
 0x255   : > { %v1461_v3 = vadd.f32 %v4694_v11, %v1460_v39 }
 0x257   : > { %v1510_v12 = vadd.f32 %v1509_v44, %v1461_v3 }
 0x259   : > { %v1485_v0 = vpop.f32.mrf.mxu2 }
 0x25a   : > { %v1534_v19 = vpop.f32.mrf.mxu3  ;;  %v1486_v21 = vadd.f32 %v4694_v11, %v1485_v0  ;;  %v1505_v0 = vadd.f32 %v1504_v10, %v1456_v14 }
 0x25c   : > { %v4743_v24 = vadd.f32 %v1534_v19, %v1486_v21  ;;  %v1463_v60 = vpop.f32.mrf.mxu0  ;;  %v1512_v61 = vpop.f32.mrf.mxu1 }
 0x25d   : > { %v1464_v20 = vadd.f32 %v4694_v11, %v1463_v60 }
 0x25e   : > { %1585 = vmatmul.bf16.gmra.mxu2 %v4739_v22 }
 0x25f   : > { %1634 = vmatmul.bf16.gmra.mxu3 %v4741_v9  ;;  %v1513_v1 = vadd.f32 %v1512_v61, %v1464_v20 }
 0x260   : > { %1918 = vmatmul.bf16.gmra.mxu0 %v4633_v32  ;;  %1967 = vmatmul.bf16.gmra.mxu1 %v4637_v35 }
 0x261   : > { %v1488_v31 = vpop.f32.mrf.mxu2 }
 0x262   : > { %v1537_v33 = vpop.f32.mrf.mxu3  ;;  %v1489_v34 = vadd.f32 %v4694_v11, %v1488_v31 }
 0x264   : > { %v4751_v36 = vadd.f32 %v1537_v33, %v1489_v34  ;;  %v1465_v34 = vpop.f32.mrf.mxu0 }
 0x265   : > { %v1466_v39 = vadd.f32 %v4694_v11, %v1465_v34 }
 0x269   : > { %v1490_v47 = vpop.f32.mrf.mxu2 }
 0x26a   : > { %v1539_v51 = vpop.f32.mrf.mxu3  ;;  %v1491_v52 = vadd.f32 %v4694_v11, %v1490_v47 }
 0x26c   : > { %v4754_v58 = vadd.f32 %v1539_v51, %v1491_v52  ;;  %v1468_v51 = vpop.f32.mrf.mxu0 }
 0x26e   : > { %2006 = vmatmul.bf16.vlgmr.msra.gmra.mxu2 %v4625_v28 }
 0x26f   : > { %2055 = vmatmul.bf16.vlgmr.msra.gmra.mxu3 %v4627_v29 }
 0x270   : > { %1923 = vmatmul.bf16.gmra.mxu0 %v4653_v46  ;;  %1972 = vmatmul.bf16.gmra.mxu1 %v4657_v49 }
 0x271   : > { %v1551_v23 = vpop.f32.mrf.mxu2 }
 0x272   : > { %v1600_v4 = vpop.f32.mrf.mxu3  ;;  %v1552_v13 = vadd.f32 %v1551_v23, %v1503_v59 }
 0x274   : > { %v4762_v16 = vadd.f32 %v1600_v4, %v1552_v13 }
 0x279   : > { %v1553_v19 = vpop.f32.mrf.mxu2 }
 0x27a   : > { %v1602_v28 = vpop.f32.mrf.mxu3  ;;  %v1554_v21 = vadd.f32 %v1553_v19, %v1505_v0 }
 0x27c   : > { %v4764_v29 = vadd.f32 %v1602_v28, %v1554_v21 }
 0x27e   : > { %v2120_v26 = vpack.c.bf16 %v4764_v29, %v4762_v16  ;;  %2011 = vmatmul.bf16.gmra.mxu2 %v4645_v42  ;;  %v2098_v29 = vld [vmem:[#allocation2 + $0x58] sm:$0xff] }
 0x27f   : > { %2060 = vmatmul.bf16.gmra.mxu3 %v4647_v43  ;;  %v1514_v43 = vpop.f32.mrf.mxu1 }
 0x280   : > { %1928 = vmatmul.bf16.gmra.mxu0 %v4565_v40  ;;  %1977 = vmatmul.bf16.gmra.mxu1 %v4567_v41  ;;  %v1515_v52 = vadd.f32 %v1514_v43, %v1466_v39  ;;  %v1470_v41 = vpop.f32.mrf.mxu0 }
 0x281   : > { %v1556_v32 = vpop.f32.mrf.mxu2  ;;  %v1471_v0 = vadd.f32 %v4694_v11, %v1470_v41 }
 0x282   : > { %v1605_v59 = vpop.f32.mrf.mxu3  ;;  %v1557_v35 = vadd.f32 %v1556_v32, %v1508_v30 }
 0x284   : > { %v4773_v10 = vadd.f32 %v1605_v59, %v1557_v35 }
 0x287   : > { %v1517_v60 = vpop.f32.mrf.mxu1 }
 0x289   : > { %v1558_v27 = vpop.f32.mrf.mxu2 }
 0x28a   : > { %v1607_v31 = vpop.f32.mrf.mxu3  ;;  %v1559_v33 = vadd.f32 %v1558_v27, %v1510_v12 }
 0x28c   : > { %v4775_v47 = vadd.f32 %v1607_v31, %v1559_v33 }
 0x28e   : > { %v2121_v42 = vpack.c.bf16 %v4775_v47, %v4773_v10  ;;  %2016 = vmatmul.bf16.gmra.mxu2 %v4665_v56 }
 0x28f   : > { %2065 = vmatmul.bf16.gmra.mxu3 %v4667_v57  ;;  %v1469_v57 = vadd.f32 %v4694_v11, %v1468_v51  ;;  %v1519_v19 = vpop.f32.mrf.mxu1 }
 0x290   : > { %1933 = vmatmul.bf16.gmra.mxu0 %v4575_v54  ;;  %1982 = vmatmul.bf16.gmra.mxu1 %v4577_v55  ;;  %v1520_v21 = vadd.f32 %v1519_v19, %v1471_v0 }
 0x291   : > { %v1561_v46 = vpop.f32.mrf.mxu2 }
 0x292   : > { %v1610_v49 = vpop.f32.mrf.mxu3  ;;  %v1562_v30 = vadd.f32 %v1561_v46, %v1513_v1  ;;  %v1518_v1 = vadd.f32 %v1517_v60, %v1469_v57 }
 0x294   : > { %v4784_v44 = vadd.f32 %v1610_v49, %v1562_v30 }
 0x299   : > { %v1563_v20 = vpop.f32.mrf.mxu2 }
 0x29a   : > { %v1612_v61 = vpop.f32.mrf.mxu3  ;;  %v1564_v56 = vadd.f32 %v1563_v20, %v1515_v52 }
 0x29c   : > { %v4787_v23 = vadd.f32 %v1612_v61, %v1564_v56 }
 0x29e   : > { %v2122_v40 = vpack.c.bf16 %v4787_v23, %v4784_v44  ;;  %2021 = vmatmul.bf16.gmra.mxu2 %v4675_v62 }
 0x29f   : > { %2070 = vmatmul.bf16.gmra.mxu3 %v4677_v63 }
 0x2a0   : > { %1938 = vmatmul.bf16.gmra.mxu0 %v4585_v5  ;;  %1987 = vmatmul.bf16.gmra.mxu1 %v4587_v6 }
 0x2a1   : > { %v1566_v4 = vpop.f32.mrf.mxu2 }
 0x2a2   : > { %v1615_v13 = vpop.f32.mrf.mxu3  ;;  %v1567_v14 = vadd.f32 %v1566_v4, %v1518_v1 }
 0x2a4   : > { %v4796_v28 = vadd.f32 %v1615_v13, %v1567_v14 }
 0x2a9   : > { %v1568_v32 = vpop.f32.mrf.mxu2 }
 0x2aa   : > { %v1617_v59 = vpop.f32.mrf.mxu3  ;;  %v1569_v62 = vadd.f32 %v1568_v32, %v1520_v21 }
 0x2ac   : > { %v4798_v35 = vadd.f32 %v1617_v59, %v1569_v62 }
 0x2ae   : > { %v2123_v63 = vpack.c.bf16 %v4798_v35, %v4796_v28  ;;  %2026 = vmatmul.bf16.gmra.mxu2 %v4685_v7 }
 0x2af   : > { %2075 = vmatmul.bf16.gmra.mxu3 %v4687_v8 }
 0x2b0   : > { %1943 = vmatmul.bf16.gmra.mxu0 %v4605_v17  ;;  %1992 = vmatmul.bf16.gmra.mxu1 %v4607_v18  ;;  %v4825_v17 = vld [vmem:[%s5442_s3] ss:$0 sm:$0xff] }
 0x2b1   : > { %v1571_v54 = vpop.f32.mrf.mxu2 }
 0x2b2   : > { %v1620_v55 = vpop.f32.mrf.mxu3  ;;  %v1572_v11 = vadd.f32 %v1571_v54, %v4697_v25 }
 0x2b4   : > { %v4807_v3 = vadd.f32 %v1620_v55, %v1572_v11 }
 0x2b9   : > { %v1573_v12 = vpop.f32.mrf.mxu2 }
 0x2ba   : > { %v1622_v27 = vpop.f32.mrf.mxu3  ;;  %v1574_v31 = vadd.f32 %v1573_v12, %v4708_v53 }
 0x2bc   : > { %v4810_v33 = vadd.f32 %v1622_v27, %v1574_v31 }
 0x2bd   : > { %v1909_v49 = vpop.f32.mrf.mxu0  ;;  %v1958_v18 = vpop.f32.mrf.mxu1 }
 0x2be   : > { %v2124_v7 = vpack.c.bf16 %v4810_v33, %v4807_v3  ;;  %2031 = vmatmul.bf16.gmra.mxu2 %v4704_v48  ;;  %v1910_v48 = vadd.f32 %v4825_v17, %v1909_v49 }
 0x2bf   : > { %2080 = vmatmul.bf16.gmra.mxu3 %v4706_v50 }
 0x2c0   : > { %v1959_v39 = vadd.f32 %v1958_v18, %v1910_v48 }
 0x2c1   : > { %v1576_v5 = vpop.f32.mrf.mxu2 }
 0x2c2   : > { %v1625_v8 = vpop.f32.mrf.mxu3  ;;  %v1577_v6 = vadd.f32 %v1576_v5, %v4713_v15 }
 0x2c4   : > { %v1626_v43 = vadd.f32 %v1625_v8, %v1577_v6 }
 0x2c5   : > { %v1960_v51 = vpop.f32.mrf.mxu1 }
 0x2c9   : > { %v1578_v25 = vpop.f32.mrf.mxu2 }
 0x2ca   : > { %v1627_v34 = vpop.f32.mrf.mxu3  ;;  %v1579_v53 = vadd.f32 %v1578_v25, %v4724_v45  ;;  %v1911_v45 = vpop.f32.mrf.mxu0 }
 0x2cb   : > { %v1912_v5 = vadd.f32 %v4825_v17, %v1911_v45 }
 0x2cc   : > { %v1628_v46 = vadd.f32 %v1627_v34, %v1579_v53 }
 0x2cd   : > { %v1963_v41 = vpop.f32.mrf.mxu1  ;;  %v1961_v6 = vadd.f32 %v1960_v51, %v1912_v5 }
 0x2ce   : > { %v2125_v30 = vpack.c.bf16 %v1628_v46, %v1626_v43  ;;  %2036 = vmatmul.bf16.gmra.mxu2 %v4720_v37 }
 0x2cf   : > { %2085 = vmatmul.bf16.gmra.mxu3 %v4722_v38 }
 0x2d1   : > { %v1581_v50 = vpop.f32.mrf.mxu2 }
 0x2d2   : > { %v1630_v15 = vpop.f32.mrf.mxu3  ;;  %v1582_v52 = vadd.f32 %v1581_v50, %v4732_v2  ;;  %v1914_v56 = vpop.f32.mrf.mxu0 }
 0x2d3   : > { %v1915_v1 = vadd.f32 %v4825_v17, %v1914_v56 }
 0x2d4   : > { %v1631_v38 = vadd.f32 %v1630_v15, %v1582_v52 }
 0x2d5   : > { %v1964_v4 = vadd.f32 %v1963_v41, %v1915_v1  ;;  %v1965_v2 = vpop.f32.mrf.mxu1 }
 0x2d9   : > { %v1583_v60 = vpop.f32.mrf.mxu2 }
 0x2da   : > { %v1632_v20 = vpop.f32.mrf.mxu3  ;;  %v1584_v37 = vadd.f32 %v1583_v60, %v4743_v24  ;;  %v1916_v0 = vpop.f32.mrf.mxu0 }
 0x2db   : > { %v1917_v51 = vadd.f32 %v4825_v17, %v1916_v0 }
 0x2dc   : > { %v1633_v61 = vadd.f32 %v1632_v20, %v1584_v37 }
 0x2dd   : > { %v1968_v55 = vpop.f32.mrf.mxu1  ;;  %v1966_v20 = vadd.f32 %v1965_v2, %v1917_v51 }
 0x2de   : > { %v2126_v57 = vpack.c.bf16 %v1633_v61, %v1631_v38  ;;  %2041 = vmatmul.bf16.gmra.mxu2 %v4739_v22 }
 0x2df   : > { %2090 = vmatmul.bf16.gmra.mxu3 %v4741_v9 }
 0x2e1   : > { %v1586_v13 = vpop.f32.mrf.mxu2 }
 0x2e2   : > { %v1635_v14 = vpop.f32.mrf.mxu3  ;;  %v1587_v19 = vadd.f32 %v1586_v13, %v4751_v36  ;;  %v1919_v54 = vpop.f32.mrf.mxu0 }
 0x2e3   : > { %v1920_v9 = vadd.f32 %v4825_v17, %v1919_v54 }
 0x2e4   : > { %v1636_v59 = vadd.f32 %v1635_v14, %v1587_v19 }
 0x2e5   : > { %v1969_v11 = vadd.f32 %v1968_v55, %v1920_v9  ;;  %v1970_v25 = vpop.f32.mrf.mxu1  ;;  %v2097_v9 = vld [vmem:[#allocation2] sm:$0xff] }
 0x2e9   : > { %v1588_v21 = vpop.f32.mrf.mxu2 }
 0x2ea   : > { %v1637_v24 = vpop.f32.mrf.mxu3  ;;  %v1589_v32 = vadd.f32 %v1588_v21, %v4754_v58  ;;  %v1921_v36 = vpop.f32.mrf.mxu0 }
 0x2ec   : > { %v1638_v62 = vadd.f32 %v1637_v24, %v1589_v32 }
 0x2ed   : > { %v1973_v48 = vpop.f32.mrf.mxu1 }
 0x2ee   : > { %v2127_v22 = vpack.c.bf16 %v1638_v62, %v1636_v59 }
 0x2f0   : > { %2128 = vmatpush.bf16.xpose.msra.mxu0 %v2127_v22  ;;  %v2096_v22 = vld [vmem:[#allocation2 + $0x30] sm:$0xff] }
 0x2f1   : > { %v2007_v12 = vpop.f32.mrf.mxu2  ;;  %v2112_v55 = vpack.c.bf16 %v2097_v9, %v2096_v22 }
 0x2f2   : > { %v2056_v27 = vpop.f32.mrf.mxu3  ;;  %v2008_v31 = vadd.f32 %v2007_v12, %v1959_v39  ;;  %v1924_v46 = vpop.f32.mrf.mxu0 }
 0x2f3   : > { %v1925_v18 = vadd.f32 %v4825_v17, %v1924_v46 }
 0x2f4   : > { %v4837_v8 = vadd.f32 %v2056_v27, %v2008_v31 }
 0x2f5   : > { %v1974_v50 = vadd.f32 %v1973_v48, %v1925_v18  ;;  %v1975_v37 = vpop.f32.mrf.mxu1 }
 0x2f8   : > { %2129 = vmatpush.bf16.xpose.msra.mxu0 %v2126_v57 }
 0x2f9   : > { %v2009_v58 = vpop.f32.mrf.mxu2 }
 0x2fa   : > { %v2058_v34 = vpop.f32.mrf.mxu3  ;;  %v2010_v53 = vadd.f32 %v2009_v58, %v1961_v6  ;;  %v1926_v60 = vpop.f32.mrf.mxu0 }
 0x2fb   : > { %v1927_v62 = vadd.f32 %v4825_v17, %v1926_v60 }
 0x2fc   : > { %v4839_v43 = vadd.f32 %v2058_v34, %v2010_v53 }
 0x2fd   : > { %v1976_v23 = vadd.f32 %v1975_v37, %v1927_v62 }
 0x2fe   : > { %v2634_v49 = vpack.c.bf16 %v4839_v43, %v4837_v8 }
 0x300   : > { %2130 = vmatpush.bf16.xpose.msra.mxu0 %v2125_v30 }
 0x301   : > { %v2012_v15 = vpop.f32.mrf.mxu2 }
 0x302   : > { %v2061_v39 = vpop.f32.mrf.mxu3  ;;  %v2013_v45 = vadd.f32 %v2012_v15, %v1964_v4  ;;  %v1929_v30 = vpop.f32.mrf.mxu0 }
 0x303   : > { %v1930_v41 = vadd.f32 %v4825_v17, %v1929_v30  ;;  %v1978_v4 = vpop.f32.mrf.mxu1 }
 0x304   : > { %v4845_v52 = vadd.f32 %v2061_v39, %v2013_v45  ;;  %v2100_v39 = vld [vmem:[#allocation2 + $0x50] sm:$0xff]  ;;  %v2101_v45 = vld [vmem:[#allocation2 + $0x68] sm:$0xff] }
 0x305   : > { %v1979_v13 = vadd.f32 %v1978_v4, %v1930_v41  ;;  %v2102_v4 = vld [vmem:[#allocation2 + $0x8] sm:$0xff] }
 0x308   : > { %2131 = vmatpush.bf16.xpose.msra.mxu0 %v2124_v7  ;;  %v1922_v7 = vadd.f32 %v4825_v17, %v1921_v36 }
 0x309   : > { %v2014_v38 = vpop.f32.mrf.mxu2 }
 0x30a   : > { %v2063_v61 = vpop.f32.mrf.mxu3  ;;  %v2015_v56 = vadd.f32 %v2014_v38, %v1966_v20  ;;  %v1971_v2 = vadd.f32 %v1970_v25, %v1922_v7  ;;  %v4872_v54 = vpop.f32.mrf.mxu0  ;;  %v2114_v20 = vpack.c.bf16 %v2101_v45, %v2100_v39 }
 0x30b   : > { %v1932_v39 = vadd.f32 %v4825_v17, %v4872_v54  ;;  %v2106_v54 = vld [vmem:[#allocation2 + $0x10] sm:$0xff] }
 0x30c   : > { %v4850_v57 = vadd.f32 %v2063_v61, %v2015_v56 }
 0x30e   : > { %v2635_v1 = vpack.c.bf16 %v4850_v57, %v4845_v52 }
 0x310   : > { %2132 = vmatpush.bf16.xpose.msra.mxu0 %v2123_v63 }
 0x311   : > { %v2017_v14 = vpop.f32.mrf.mxu2 }
 0x312   : > { %v2066_v3 = vpop.f32.mrf.mxu3  ;;  %v2018_v33 = vadd.f32 %v2017_v14, %v1969_v11  ;;  %v1934_v12 = vpop.f32.mrf.mxu0 }
 0x313   : > { %v1935_v62 = vadd.f32 %v4825_v17, %v1934_v12 }
 0x314   : > { %v4859_v0 = vadd.f32 %v2066_v3, %v2018_v33 }
 0x318   : > { %2133 = vmatpush.bf16.xpose.msra.mxu0 %v2122_v40  ;;  %v4876_v40 = vpop.f32.mrf.mxu1 }
 0x319   : > { %v2019_v19 = vpop.f32.mrf.mxu2 }
 0x31a   : > { %v2068_v21 = vpop.f32.mrf.mxu3  ;;  %v2020_v24 = vadd.f32 %v2019_v19, %v1971_v2  ;;  %v1936_v16 = vpop.f32.mrf.mxu0 }
 0x31b   : > { %v1937_v22 = vadd.f32 %v4825_v17, %v1936_v16 }
 0x31c   : > { %v4864_v32 = vadd.f32 %v2068_v21, %v2020_v24 }
 0x31e   : > { %v2636_v28 = vpack.c.bf16 %v4864_v32, %v4859_v0 }
 0x320   : > { %2134 = vmatpush.bf16.xpose.msra.mxu0 %v2121_v42  ;;  %v1983_v31 = vpop.f32.mrf.mxu1 }
 0x321   : > { %v2022_v35 = vpop.f32.mrf.mxu2 }
 0x322   : > { %v2071_v63 = vpop.f32.mrf.mxu3  ;;  %v2023_v59 = vadd.f32 %v2022_v35, %v1974_v50  ;;  %v1939_v18 = vpop.f32.mrf.mxu0 }
 0x323   : > { %v1940_v19 = vadd.f32 %v4825_v17, %v1939_v18 }
 0x324   : > { %v4874_v44 = vadd.f32 %v2071_v63, %v2023_v59 }
 0x328   : > { %2135 = vmatpush.bf16.xpose.msra.mxu0 %v2120_v26  ;;  %v2099_v26 = vld [vmem:[#allocation2 + $0x18] sm:$0xff]  ;;  %v1985_v53 = vpop.f32.mrf.mxu1 }
 0x329   : > { %v2024_v10 = vpop.f32.mrf.mxu2  ;;  %v2113_v46 = vpack.c.bf16 %v2099_v26, %v2098_v29  ;;  %v2104_v29 = vld [vmem:[#allocation2 + $0x40] sm:$0xff] }
 0x32a   : > { %v2073_v47 = vpop.f32.mrf.mxu3  ;;  %v2025_v42 = vadd.f32 %v2024_v10, %v1976_v23  ;;  %v1941_v37 = vpop.f32.mrf.mxu0  ;;  %v2105_v26 = vld [vmem:[#allocation2 + $0x20] sm:$0xff] }
 0x32b   : > { %v1942_v21 = vadd.f32 %v4825_v17, %v1941_v37  ;;  %v2116_v37 = vpack.c.bf16 %v2105_v26, %v2104_v29  ;;  %v5003_v26 = vld [vmem:[#allocation3 + $0x28] sm:$0xff] }
 0x32c   : > { %v4881_v11 = vadd.f32 %v2073_v47, %v2025_v42 }
 0x32e   : > { %v2637_v27 = vpack.c.bf16 %v4881_v11, %v4874_v44  ;;  %v4181_v11 = vmov 0  }
 0x32f   : > { %2136 = vmatmul.bf16.vlgmr.msra.gmra.mxu0 %v2112_v55  ;;  %v1984_v55 = vadd.f32 %v1983_v31, %v1935_v62  ;;  %v1981_v31 = vadd.f32 %v4876_v40, %v1932_v39  ;;  %v2108_v40 = vld [vmem:[#allocation2 + $0x60] sm:$0xff]  ;;  %3766 = vset.pattern.permute.xlu0 %v4181_v11 }
 0x330   : > { %v1988_v15 = vpop.f32.mrf.mxu1  ;;  %3767 = vset.pattern.permute.xlu1 %v4181_v11  ;;  %3768 = vset.pattern.permute.xlu2 %v4181_v11 }
 0x331   : > { %v2027_v5 = vpop.f32.mrf.mxu2  ;;  %v1989_v9 = vadd.f32 %v1988_v15, %v1940_v19 }
 0x332   : > { %v2076_v36 = vpop.f32.mrf.mxu3  ;;  %v2028_v6 = vadd.f32 %v2027_v5, %v1979_v13  ;;  %v1944_v30 = vpop.f32.mrf.mxu0  ;;  %v2103_v13 = vld [vmem:[#allocation2 + $0x48] sm:$0xff]  ;;  %v1986_v5 = vadd.f32 %v1985_v53, %v1937_v22  ;;  %v2110_v22 = vld [vmem:[#allocation2 + $0x78] sm:$0xff] }
 0x333   : > { %v2115_v33 = vpack.c.bf16 %v2103_v13, %v2102_v4  ;;  %v1945_v7 = vadd.f32 %v4825_v17, %v1944_v30 }
 0x334   : > { %v4885_v25 = vadd.f32 %v2076_v36, %v2028_v6 }
 0x338   : > { %v1990_v38 = vpop.f32.mrf.mxu1 }
 0x339   : > { %v4887_v58 = vpop.f32.mrf.mxu2  ;;  %v1991_v10 = vadd.f32 %v1990_v38, %v1942_v21 }
 0x33a   : > { %v4889_v34 = vpop.f32.mrf.mxu3  ;;  %v1946_v2 = vpop.f32.mrf.mxu0  ;;  %v2030_v13 = vadd.f32 %v4887_v58, %v1981_v31  ;;  %v2109_v58 = vld [vmem:[#allocation2 + $0x70] sm:$0xff]  ;;  %v5033_v31 = vld [vmem:[#allocation3 + $0x40] sm:$0xff] }
 0x33b   : > { %v1947_v59 = vadd.f32 %v4825_v17, %v1946_v2  ;;  %v4963_v2 = vld [vmem:[#allocation3 + $0x8] sm:$0xff] }
 0x33c   : > { %v2079_v17 = vadd.f32 %v4889_v34, %v2030_v13  ;;  %v2118_v34 = vpack.c.bf16 %v2109_v58, %v2108_v40 }
 0x33f   : > { %2141 = vmatmul.bf16.gmra.mxu0 %v2113_v46 }
 0x340   : > { %v1993_v41 = vpop.f32.mrf.mxu1 }
 0x341   : > { %v2032_v48 = vpop.f32.mrf.mxu2  ;;  %v1994_v63 = vadd.f32 %v1993_v41, %v1945_v7 }
 0x342   : > { %v2081_v50 = vpop.f32.mrf.mxu3 }
 0x348   : > { %v1995_v23 = vpop.f32.mrf.mxu1 }
 0x349   : > { %v2034_v51 = vpop.f32.mrf.mxu2  ;;  %v1996_v42 = vadd.f32 %v1995_v23, %v1947_v59  ;;  %v4983_v23 = vld [vmem:[#allocation3 + $0x18] sm:$0xff] }
 0x34a   : > { %v2083_v60 = vpop.f32.mrf.mxu3  ;;  %v2035_v16 = vadd.f32 %v2034_v51, %v1986_v5  ;;  %v2638_v51 = vpack.c.bf16 %v2079_v17, %v4885_v25  ;;  %v4993_v5 = vld [vmem:[#allocation3 + $0x20] sm:$0xff] }
 0x34c   : > { %v2084_v41 = vadd.f32 %v2083_v60, %v2035_v16  ;;  %v4953_v60 = vld [vmem:[#allocation3] sm:$0xff]  ;;  %v5023_v16 = vld [vmem:[#allocation3 + $0x38] sm:$0xff] }
 0x34f   : > { %2146 = vmatmul.bf16.gmra.mxu0 %v2114_v20  ;;  %v2033_v20 = vadd.f32 %v2032_v48, %v1984_v55  ;;  %v2107_v48 = vld [vmem:[#allocation2 + $0x38] sm:$0xff] }
 0x351   : > { %v2037_v61 = vpop.f32.mrf.mxu2 }
 0x352   : > { %v2086_v56 = vpop.f32.mrf.mxu3  ;;  %v2038_v36 = vadd.f32 %v2037_v61, %v1989_v9  ;;  %v2082_v61 = vadd.f32 %v2081_v50, %v2033_v20  ;;  %v2111_v9 = vld [vmem:[#allocation2 + $0x28] sm:$0xff] }
 0x354   : > { %v2087_v15 = vadd.f32 %v2086_v56, %v2038_v36  ;;  %v2117_v56 = vpack.c.bf16 %v2107_v48, %v2106_v54  ;;  %v5053_v54 = vld [vmem:[#allocation3 + $0x58] sm:$0xff] }
 0x359   : > { %v2039_v14 = vpop.f32.mrf.mxu2 }
 0x35a   : > { %v2088_v3 = vpop.f32.mrf.mxu3  ;;  %v2040_v6 = vadd.f32 %v2039_v14, %v1991_v10  ;;  %v2639_v14 = vpack.c.bf16 %v2084_v41, %v2082_v61 }
 0x35c   : > { %v2089_v38 = vadd.f32 %v2088_v3, %v2040_v6 }
 0x35e   : > { %v2640_v4 = vpack.c.bf16 %v2089_v38, %v2087_v15 }
 0x35f   : > { %2151 = vmatmul.bf16.gmra.mxu0 %v2115_v33 }
 0x361   : > { %v2042_v24 = vpop.f32.mrf.mxu2 }
 0x362   : > { %v2091_v35 = vpop.f32.mrf.mxu3  ;;  %v2043_v47 = vadd.f32 %v2042_v24, %v1994_v63 }
 0x364   : > { %v2092_v45 = vadd.f32 %v2091_v35, %v2043_v47  ;;  %v4973_v35 = vld [vmem:[#allocation3 + $0x10] sm:$0xff]  ;;  %v2119_v47 = vpack.c.bf16 %v2111_v9, %v2110_v22 }
 0x369   : > { %v2044_v46 = vpop.f32.mrf.mxu2 }
 0x36a   : > { %v2093_v18 = vpop.f32.mrf.mxu3  ;;  %v2045_v12 = vadd.f32 %v2044_v46, %v1996_v42 }
 0x36c   : > { %v2094_v30 = vadd.f32 %v2093_v18, %v2045_v12 }
 0x36e   : > { %v2641_v53 = vpack.c.bf16 %v2094_v30, %v2092_v45  ;;  %v5014_v45 = vld [vmem:[#allocation3 + $0x30] sm:$0xff] }
 0x36f   : > { %2156 = vmatmul.bf16.gmra.mxu0 %v2116_v37 }
 0x370   : > { %2642 = vmatpush.bf16.msra.mxu1 %v2641_v53 }
 0x374   : > { %2643 = vmatpush.bf16.msra.mxu1 %v2640_v4  ;;  %v5044_v4 = vld [vmem:[#allocation3 + $0x50] sm:$0xff] }
 0x378   : > { %2644 = vmatpush.bf16.msra.mxu1 %v2639_v14 }
 0x37c   : > { %2645 = vmatpush.bf16.msra.mxu1 %v2638_v51 }
 0x37f   : > { %2161 = vmatmul.bf16.gmra.mxu0 %v2117_v56  ;;  %v5060_v56 = vld [vmem:[#allocation3 + $0x60] sm:$0xff] }
 0x380   : > { %2646 = vmatpush.bf16.msra.mxu1 %v2637_v27 }
 0x384   : > { %2647 = vmatpush.bf16.msra.mxu1 %v2636_v28 }
 0x388   : > { %2648 = vmatpush.bf16.msra.mxu1 %v2635_v1 }
 0x38c   : > { %2649 = vmatpush.bf16.msra.mxu1 %v2634_v49 }
 0x38f   : > { %2166 = vmatmul.bf16.gmra.mxu0 %v2118_v34 }
 0x39f   : > { %2171 = vmatmul.bf16.gmra.mxu0 %v2119_v47 }
 0x3ac   : > { %v4915_v25 = vpop.f32.mrf.mxu0 }
 0x3ad   : > { %2193 = vmax.xlane.f32.xlu0 %v4915_v25 }
 0x3b4   : > { %v4918_v44 = vpop.f32.mrf.mxu0 }
 0x3b5   : > { %2195 = vmax.xlane.f32.xlu0 %v4918_v44 }
 0x3bc   : > { %v4921_v0 = vpop.f32.mrf.mxu0 }
 0x3bd   : > { %2197 = vmax.xlane.f32.xlu1 %v4921_v0 }
 0x3c4   : > { %v4924_v52 = vpop.f32.mrf.mxu0 }
 0x3c5   : > { %2199 = vmax.xlane.f32.xlu1 %v4924_v52 }
 0x3cc   : > { %v4927_v57 = vpop.f32.mrf.mxu0 }
 0x3cd   : > { %2201 = vmax.xlane.f32.xlu2 %v4927_v57 }
 0x3d4   : > { %v4930_v8 = vpop.f32.mrf.mxu0 }
 0x3d5   : > { %2203 = vmax.xlane.f32.xlu2 %v4930_v8 }
 0x3dc   : > { %v4933_v43 = vpop.f32.mrf.mxu0 }
 0x3dd   : > { %2205 = vmax.xlane.f32.xlu2 %v4933_v43 }
 0x3e4   : > { %v4936_v49 = vpop.f32.mrf.mxu0 }
 0x3e5   : > { %2207 = vmax.xlane.f32.xlu2 %v4936_v49 }
 0x3ec   : > { %v4939_v1 = vpop.f32.mrf.mxu0 }
 0x3ed   : > { %2209 = vmax.xlane.f32.xlu1 %v4939_v1 }
 0x3f4   : > { %v4942_v32 = vpop.f32.mrf.mxu0 }
 0x3fc   : > { %v4944_v28 = vpop.f32.mrf.mxu0 }
 0x3fd   : > { %2213 = vmax.xlane.f32.xlu2 %v4944_v28 }
 0x404   : > { %v4947_v27 = vpop.f32.mrf.mxu0 }
 0x405   : > { %2215 = vmax.xlane.f32.xlu1 %v4947_v27 }
 0x40c   : > { %v4950_v50 = vpop.f32.mrf.mxu0 }
 0x40d   : > { %2217 = vmax.xlane.f32.xlu2 %v4950_v50 }
 0x414   : > { %v5069_v11 = vpop.f32.mrf.mxu0 }
 0x420   : > { %v2194_v3 = vpop.xlane.xlu0 %2193 }
 0x421   : > { %v4956_v33 = vmax.f32 %v4953_v60, %v2194_v3 }
 0x423   : > { %v2241_v7 = vsub.f32 %v4953_v60, %v4956_v33  ;;  %2723 = vst.msk [vmem:[#allocation3] sm:$0xff] %vm2497_vm1, %v4956_v33  ;;  %2291 = vperm.xlu0 %3766, %v4956_v33  }
 0x428   : > { %v2196_v19 = vpop.xlane.xlu0 %2195 }
 0x429   : > { %v4966_v21 = vmax.f32 %v4963_v2, %v2196_v19 }
 0x42b   : > { %v2242_v24 = vsub.f32 %v4963_v2, %v4966_v21  ;;  %2724 = vst.msk [vmem:[#allocation3 + $0x8] sm:$0xff] %vm2497_vm1, %v4966_v21  ;;  %2296 = vperm.xlu1 %3767, %v4966_v21  }
 0x430   : > { %v2198_v63 = vpop.xlane.xlu1 %2197 }
 0x431   : > { %v4976_v59 = vmax.f32 %v4973_v35, %v2198_v63 }
 0x433   : > { %v2243_v62 = vsub.f32 %v4973_v35, %v4976_v59  ;;  %2725 = vst.msk [vmem:[#allocation3 + $0x10] sm:$0xff] %vm2497_vm1, %v4976_v59  ;;  %2301 = vperm.xlu2 %3768, %v4976_v59  }
 0x438   : > { %v2200_v10 = vpop.xlane.xlu1 %2199 }
 0x439   : > { %v4986_v42 = vmax.f32 %v4983_v23, %v2200_v10 }
 0x43b   : > { %v2244_v55 = vsub.f32 %v4983_v23, %v4986_v42  ;;  %2726 = vst.msk [vmem:[#allocation3 + $0x18] sm:$0xff] %vm2497_vm1, %v4986_v42  ;;  %2306 = vperm.xlu1 %3767, %v4986_v42  }
 0x43d   : > { %v2263_v35 = vmul.f32 1.442695, %v2244_v55  ;;  %v2514_v55 = vld [vmem:[#allocation5 + $0x28] sm:$0xff] }
 0x440   : > { %v2202_v36 = vpop.xlane.xlu2 %2201 }
 0x441   : > { %v4996_v6 = vmax.f32 %v4993_v5, %v2202_v36 }
 0x443   : > { %v2245_v29 = vsub.f32 %v4993_v5, %v4996_v6  ;;  %2727 = vst.msk [vmem:[#allocation3 + $0x20] sm:$0xff] %vm2497_vm1, %v4996_v6  ;;  %2311 = vperm.xlu2 %3768, %v4996_v6  }
 0x445   : > { %v2265_v2 = vmul.f32 1.442695, %v2245_v29 }
 0x448   : > { %v2204_v46 = vpop.xlane.xlu2 %2203 }
 0x449   : > { %v5006_v18 = vmax.f32 %v5003_v26, %v2204_v46 }
 0x44b   : > { %v2246_v39 = vsub.f32 %v5003_v26, %v5006_v18  ;;  %2728 = vst.msk [vmem:[#allocation3 + $0x28] sm:$0xff] %vm2497_vm1, %v5006_v18  ;;  %2316 = vperm.xlu2 %3768, %v5006_v18  }
 0x44d   : > { %2211 = vmax.xlane.f32.xlu0 %v4942_v32 }
 0x450   : > { %v2206_v12 = vpop.xlane.xlu2 %2205 }
 0x451   : > { %v5017_v20 = vmax.f32 %v5014_v45, %v2206_v12 }
 0x453   : > { %v2247_v37 = vsub.f32 %v5014_v45, %v5017_v20  ;;  %2729 = vst.msk [vmem:[#allocation3 + $0x30] sm:$0xff] %vm2497_vm1, %v5017_v20 }
 0x458   : > { %v2208_v15 = vpop.xlane.xlu2 %2207 }
 0x459   : > { %v5026_v38 = vmax.f32 %v5023_v16, %v2208_v15 }
 0x45b   : > { %v2248_v30 = vsub.f32 %v5023_v16, %v5026_v38  ;;  %2730 = vst.msk [vmem:[#allocation3 + $0x38] sm:$0xff] %vm2497_vm1, %v5026_v38  ;;  %2326 = vperm.xlu1 %3767, %v5026_v38  }
 0x460   : > { %v2210_v53 = vpop.xlane.xlu1 %2209 }
 0x461   : > { %v5036_v61 = vmax.f32 %v5033_v31, %v2210_v53  ;;  %2321 = vperm.xlu0 %3766, %v5017_v20  }
 0x463   : > { %v2249_v41 = vsub.f32 %v5033_v31, %v5036_v61  ;;  %2731 = vst.msk [vmem:[#allocation3 + $0x40] sm:$0xff] %vm2497_vm1, %v5036_v61  ;;  %2331 = vperm.xlu2 %3768, %v5036_v61  }
 0x465   : > { %v2273_v60 = vmul.f32 1.442695, %v2249_v41 }
 0x470   : > { %v2214_v13 = vpop.xlane.xlu2 %2213 }
 0x471   : > { %v5047_v14 = vmax.f32 %v5044_v4, %v2214_v13 }
 0x473   : > { %v2251_v17 = vsub.f32 %v5044_v4, %v5047_v14  ;;  %2733 = vst.msk [vmem:[#allocation3 + $0x50] sm:$0xff] %vm2497_vm1, %v5047_v14  ;;  %v5175_v4 = vld [vmem:[#allocation3 + $0x78] sm:$0xff] }
 0x475   : > { %v2277_v26 = vmul.f32 1.442695, %v2251_v17 }
 0x478   : > { %v2216_v48 = vpop.xlane.xlu1 %2215 }
 0x479   : > { %v5056_v51 = vmax.f32 %v5053_v54, %v2216_v48 }
 0x47b   : > { %2734 = vst.msk [vmem:[#allocation3 + $0x58] sm:$0xff] %vm2497_vm1, %v5056_v51 }
 0x480   : > { %v2218_v40 = vpop.xlane.xlu2 %2217 }
 0x481   : > { %v5063_v58 = vmax.f32 %v5060_v56, %v2218_v40 }
 0x483   : > { %v2253_v34 = vsub.f32 %v5060_v56, %v5063_v58  ;;  %2735 = vst.msk [vmem:[#allocation3 + $0x60] sm:$0xff] %vm2497_vm1, %v5063_v58 }
 0x48b   : > { %2219 = vmax.xlane.f32.xlu0 %v5069_v11 }
 0x48d   : > { %v2302_v47 = vpop.permute.xlu2 %2301 }
 0x48e   : > { %v2371_v12 = vsub.f32 %v4921_v0, %v2302_v47  ;;  %v5089_v0 = vpop.f32.mrf.mxu0  ;;  %v5094_v47 = vld [vmem:[#allocation3 + $0x48] sm:$0xff] }
 0x495   : > { %v2292_v3 = vpop.permute.xlu0 %2291 }
 0x496   : > { %v2369_v19 = vsub.f32 %v4915_v25, %v2292_v3 }
 0x498   : > { %v2385_v63 = vmul.f32 1.442695, %v2369_v19 }
 0x49a   : > { %3771 = vpow2.f32 %v2385_v63 }
 0x49d   : > { %v2297_v22 = vpop.permute.xlu1 %2296  ;;  %v2312_v15 = vpop.permute.xlu2 %2311 }
 0x49e   : > { %v2370_v9 = vsub.f32 %v4918_v44, %v2297_v22  ;;  %v2389_v44 = vmul.f32 1.442695, %v2371_v12 }
 0x49f   : > { %2341 = vperm.xlu0 %3766, %v5047_v14  }
 0x4a0   : > { %v2387_v10 = vmul.f32 1.442695, %v2370_v9  ;;  %v5075_v36 = vpop.eup %3771  ;;  %v2373_v9 = vsub.f32 %v4927_v57, %v2312_v15 }
 0x4a2   : > { %3773 = vpow2.f32 %v2387_v10 }
 0x4a3   : > { %3775 = vpow2.f32 %v2389_v44 }
 0x4a5   : > { %v2317_v40 = vpop.permute.xlu2 %2316 }
 0x4a6   : > { %v2374_v63 = vsub.f32 %v4930_v8, %v2317_v40 }
 0x4a7   : > { %2351 = vperm.xlu0 %3766, %v5063_v58  }
 0x4a8   : > { %v5078_v46 = vpop.eup %3773  ;;  %v2395_v10 = vmul.f32 1.442695, %v2374_v63 }
 0x4a9   : > { %v2626_v25 = vpack.c.bf16 %v5078_v46, %v5075_v36  ;;  %v5084_v3 = vpop.eup %3775 }
 0x4ab   : > { %2650 = vmatmul.bf16.vlgmr.msra.gmra.mxu1 %v2626_v25  ;;  %v5096_v25 = vpop.f32.mrf.mxu0 }
 0x4ac   : > { %2223 = vmax.xlane.f32.xlu2 %v5096_v25 }
 0x4ad   : > { %v2307_v53 = vpop.permute.xlu1 %2306 }
 0x4ae   : > { %v2372_v13 = vsub.f32 %v4924_v52, %v2307_v53  ;;  %v2393_v52 = vmul.f32 1.442695, %v2373_v9 }
 0x4b0   : > { %v2391_v48 = vmul.f32 1.442695, %v2372_v13 }
 0x4b2   : > { %3777 = vpow2.f32 %v2391_v48 }
 0x4b3   : > { %3779 = vpow2.f32 %v2395_v10 }
 0x4b4   : > { %3781 = vpow2.f32 %v2393_v52 }
 0x4b8   : > { %v5086_v19 = vpop.eup %3777 }
 0x4b9   : > { %v2627_v22 = vpack.c.bf16 %v5086_v19, %v5084_v3  ;;  %v5107_v57 = vpop.eup %3779 }
 0x4ba   : > { %v5109_v15 = vpop.eup %3781 }
 0x4bb   : > { %2655 = vmatmul.bf16.gmra.mxu1 %v2627_v22  ;;  %v2628_v53 = vpack.c.bf16 %v5107_v57, %v5109_v15 }
 0x4bd   : > { %v2332_v31 = vpop.permute.xlu2 %2331 }
 0x4be   : > { %v2377_v41 = vsub.f32 %v4939_v1, %v2332_v31 }
 0x4c0   : > { %v2212_v12 = vpop.xlane.xlu0 %2211  ;;  %v2401_v17 = vmul.f32 1.442695, %v2377_v41  ;;  %v2261_v41 = vmul.f32 1.442695, %v2243_v62 }
 0x4c1   : > { %v5099_v44 = vmax.f32 %v5094_v47, %v2212_v12 }
 0x4c3   : > { %v2250_v8 = vsub.f32 %v5094_v47, %v5099_v44  ;;  %2732 = vst.msk [vmem:[#allocation3 + $0x48] sm:$0xff] %vm2497_vm1, %v5099_v44  ;;  %2336 = vperm.xlu1 %3767, %v5099_v44  }
 0x4cb   : > { %2660 = vmatmul.bf16.gmra.mxu1 %v2628_v53  ;;  %v2190_v53 = vld [vmem:[#allocation3 + $0x68] sm:$0xff] }
 0x4cd   : > { %v2327_v13 = vpop.permute.xlu1 %2326 }
 0x4ce   : > { %v2376_v48 = vsub.f32 %v4936_v49, %v2327_v13  ;;  %v2259_v49 = vmul.f32 1.442695, %v2242_v24  ;;  %v2271_v24 = vmul.f32 1.442695, %v2248_v30 }
 0x4d0   : > { %v2399_v40 = vmul.f32 1.442695, %v2376_v48  ;;  %v2257_v48 = vmul.f32 1.442695, %v2241_v7  ;;  %v2252_v7 = vsub.f32 %v5053_v54, %v5056_v51 }
 0x4d2   : > { %3783 = vpow2.f32 %v2399_v40  ;;  %v2267_v40 = vmul.f32 1.442695, %v2246_v39  ;;  %v2279_v6 = vmul.f32 1.442695, %v2252_v7 }
 0x4d3   : > { %v2322_v63 = vpop.permute.xlu0 %2321 }
 0x4d4   : > { %v2375_v22 = vsub.f32 %v4933_v43, %v2322_v63 }
 0x4d6   : > { %v2397_v9 = vmul.f32 1.442695, %v2375_v22 }
 0x4d8   : > { %3785 = vpow2.f32 %v2397_v9  ;;  %v5115_v10 = vpop.eup %3783 }
 0x4d9   : > { %3787 = vpow2.f32 %v2259_v49 }
 0x4da   : > { %3789 = vpow2.f32 %v2257_v48 }
 0x4db   : > { %3791 = vpow2.f32 %v2267_v40 }
 0x4dc   : > { %3793 = vpow2.f32 %v2265_v2  ;;  %v2191_v2 = vld [vmem:[#allocation3 + $0x70] sm:$0xff] }
 0x4dd   : > { %3795 = vpow2.f32 %v2273_v60 }
 0x4de   : > { %v5117_v52 = vpop.eup %3785  ;;  %3797 = vpow2.f32 %v2271_v24  ;;  %v2515_v24 = vld [vmem:[#allocation5 + $0x68] sm:$0xff] }
 0x4df   : > { %v2629_v12 = vpack.c.bf16 %v5115_v10, %v5117_v52  ;;  %v5133_v63 = vpop.eup %3787  ;;  %3799 = vpow2.f32 %v2279_v6 }
 0x4e0   : > { %v5139_v21 = vpop.eup %3789  ;;  %3801 = vpow2.f32 %v2277_v26 }
 0x4e1   : > { %2665 = vmatmul.bf16.gmra.mxu1 %v2629_v12  ;;  %v5145_v33 = vpop.eup %3791 }
 0x4e2   : > { %v5153_v5 = vpop.eup %3793 }
 0x4e3   : > { %v5156_v29 = vpop.eup %3795 }
 0x4e4   : > { %v5162_v18 = vpop.eup %3797 }
 0x4e5   : > { %v5165_v16 = vpop.eup %3799 }
 0x4e6   : > { %v5168_v30 = vpop.eup %3801 }
 0x4ed   : > { %2221 = vmax.xlane.f32.xlu1 %v5089_v0 }
 0x4fe   : > { %v2220_v13 = vpop.xlane.xlu0 %2219 }
 0x4ff   : > { %v2238_v43 = vmax.f32 %v2190_v53, %v2220_v13 }
 0x501   : > { %2736 = vst.msk [vmem:[#allocation3 + $0x68] sm:$0xff] %vm2497_vm1, %v2238_v43  ;;  %2356 = vperm.xlu2 %3768, %v2238_v43   ;;  %v2254_v39 = vsub.f32 %v2190_v53, %v2238_v43 }
 0x503   : > { %v2283_v38 = vmul.f32 1.442695, %v2254_v39 }
 0x505   : > { %3803 = vpow2.f32 %v2283_v38 }
 0x506   : > { %2346 = vperm.xlu1 %3767, %v5056_v51   ;;  %3805 = vpow2.f32 %v2401_v17 }
 0x509   : > { %2537 = vperm.xlu2 %3768, %v5133_v63  }
 0x50b   : > { %v5171_v61 = vpop.eup %3803 }
 0x50c   : > { %v3806_v53 = vpop.eup %3805 }
 0x50e   : > { %2532 = vperm.xlu1 %3767, %v5139_v21  }
 0x511   : > { %2557 = vperm.xlu2 %3768, %v5145_v33   ;;  %v2342_v59 = vpop.permute.xlu0 %2341 }
 0x516   : > { %2552 = vperm.xlu1 %3767, %v5153_v5  }
 0x519   : > { %2572 = vperm.xlu2 %3768, %v5156_v29  }
 0x51e   : > { %2567 = vperm.xlu1 %3767, %v5162_v18  }
 0x51f   : > { %v2224_v14 = vpop.xlane.xlu2 %2223 }
 0x520   : > { %v5178_v51 = vmax.f32 %v5175_v4, %v2224_v14 }
 0x521   : > { %2587 = vperm.xlu2 %3768, %v5165_v16  }
 0x522   : > { %v2256_v9 = vsub.f32 %v5175_v4, %v5178_v51  ;;  %2738 = vst.msk [vmem:[#allocation3 + $0x78] sm:$0xff] %vm2497_vm1, %v5178_v51 }
 0x524   : > { %v2287_v56 = vmul.f32 1.442695, %v2256_v9 }
 0x526   : > { %2582 = vperm.xlu1 %3767, %v5168_v30  }
 0x528   : > { %v5185_v1 = vpop.f32.mrf.mxu1 }
 0x52e   : > { %2597 = vperm.xlu1 %3767, %v5171_v61  }
 0x530   : > { %v2653_v43 = vpop.f32.mrf.mxu1 }
 0x535   : > { %v2337_v54 = vpop.permute.xlu1 %2336 }
 0x536   : > { %v2378_v22 = vsub.f32 %v4942_v32, %v2337_v54 }
 0x538   : > { %v2403_v12 = vmul.f32 1.442695, %v2378_v22  ;;  %v5190_v48 = vpop.f32.mrf.mxu1 }
 0x53a   : > { %3807 = vpow2.f32 %v2403_v12 }
 0x540   : > { %v5187_v49 = vpop.eup %3807  ;;  %v5193_v32 = vpop.f32.mrf.mxu1 }
 0x541   : > { %v2630_v13 = vpack.c.bf16 %v5187_v49, %v3806_v53 }
 0x543   : > { %2670 = vmatmul.bf16.gmra.mxu1 %v2630_v13  ;;  %v2269_v13 = vmul.f32 1.442695, %v2247_v37 }
 0x548   : > { %v5198_v6 = vpop.f32.mrf.mxu1 }
 0x550   : > { %v2663_v22 = vpop.f32.mrf.mxu1 }
 0x558   : > { %2449 = vadd.xlane.f32.xlu1 %v5075_v36 }
 0x55b   : > { %v5195_v40 = vpop.permute.xlu2 %2356 }
 0x560   : > { %2455 = vadd.xlane.f32.xlu1 %v5086_v19  ;;  %v2222_v60 = vpop.xlane.xlu1 %2221  ;;  %v2519_v19 = vld [vmem:[#allocation5 + $0x30] sm:$0xff] }
 0x561   : > { %v2239_v7 = vmax.f32 %v2191_v2, %v2222_v60 }
 0x563   : > { %v2255_v26 = vsub.f32 %v2191_v2, %v2239_v7  ;;  %2737 = vst.msk [vmem:[#allocation3 + $0x70] sm:$0xff] %vm2497_vm1, %v2239_v7  ;;  %2361 = vperm.xlu0 %3766, %v2239_v7   ;;  %v2538_v39 = vpop.permute.xlu2 %2537 }
 0x564   : > { %v2611_v38 = vmul.f32 %v2538_v39, %v2515_v24  ;;  %v2382_v24 = vsub.f32 %v5069_v11, %v5195_v40 }
 0x565   : > { %v2285_v31 = vmul.f32 1.442695, %v2255_v26 }
 0x566   : > { %v2692_v36 = vadd.f32 %v2653_v43, %v2611_v38  ;;  %v2411_v39 = vmul.f32 1.442695, %v2382_v24  ;;  %v2281_v38 = vmul.f32 1.442695, %v2253_v34 }
 0x567   : > { %3809 = vpow2.f32 %v2285_v31  ;;  %v5239_v31 = vpop.f32.mrf.mxu1 }
 0x568   : > { %2708 = vst [vmem:[#allocation5 + $0x68] sm:$0xff] %v2692_v36  ;;  %2459 = vadd.xlane.f32.xlu1 %v5107_v57  ;;  %3811 = vpow2.f32 %v2261_v41  ;;  %v2379_v57 = vsub.f32 %v4944_v28, %v2342_v59  ;;  %v2275_v28 = vmul.f32 1.442695, %v2250_v8  ;;  %v2518_v8 = vld [vmem:[#allocation5 + $0x48] sm:$0xff] }
 0x569   : > { %3813 = vpow2.f32 %v2263_v35 }
 0x56a   : > { %v2405_v43 = vmul.f32 1.442695, %v2379_v57  ;;  %3815 = vpow2.f32 %v2269_v13 }
 0x56b   : > { %2366 = vperm.xlu0 %3766, %v5178_v51   ;;  %v2558_v14 = vpop.permute.xlu2 %2557  ;;  %v2522_v51 = vld [vmem:[#allocation5 + $0x20] sm:$0xff] }
 0x56c   : > { %v2615_v17 = vmul.f32 %v2558_v14, %v2519_v19  ;;  %3817 = vpow2.f32 %v2405_v43 }
 0x56d   : > { %v5206_v54 = vpop.eup %3809 }
 0x56e   : > { %v2696_v12 = vadd.f32 %v2663_v22, %v2615_v17  ;;  %2602 = vperm.xlu2 %3768, %v5206_v54   ;;  %v5212_v62 = vpop.eup %3811 }
 0x56f   : > { %v5220_v23 = vpop.eup %3813  ;;  %v2668_v17 = vpop.f32.mrf.mxu1 }
 0x570   : > { %2712 = vst [vmem:[#allocation5 + $0x30] sm:$0xff] %v2696_v12  ;;  %2465 = vadd.xlane.f32.xlu1 %v3806_v53  ;;  %v5226_v45 = vpop.eup %3815 }
 0x572   : > { %v5228_v37 = vpop.eup %3817 }
 0x573   : > { %2542 = vperm.xlu0 %3766, %v5212_v62   ;;  %v2573_v9 = vpop.permute.xlu2 %2572 }
 0x574   : > { %v2618_v59 = vmul.f32 %v2573_v9, %v2522_v51  ;;  %v2523_v51 = vld [vmem:[#allocation5 + $0x78] sm:$0xff] }
 0x578   : > { %v2347_v2 = vpop.permute.xlu1 %2346 }
 0x579   : > { %v2380_v60 = vsub.f32 %v4947_v27, %v2347_v2  ;;  %v2352_v27 = vpop.permute.xlu0 %2351 }
 0x57a   : > { %v2381_v44 = vsub.f32 %v4950_v50, %v2352_v27  ;;  %v2521_v50 = vld [vmem:[#allocation5 + $0x38] sm:$0xff] }
 0x57b   : > { %v2407_v42 = vmul.f32 1.442695, %v2380_v60  ;;  %2547 = vperm.xlu0 %3766, %v5220_v23  }
 0x57d   : > { %3819 = vpow2.f32 %v2407_v42 }
 0x57e   : > { %3821 = vpow2.f32 %v2275_v28 }
 0x57f   : > { %3823 = vpow2.f32 %v2411_v39 }
 0x580   : > { %v2533_v53 = vpop.permute.xlu1 %2532  ;;  %3825 = vpow2.f32 %v2281_v38 }
 0x581   : > { %v2610_v20 = vmul.f32 %v2533_v53, %v2514_v55 }
 0x583   : > { %v3820_v7 = vpop.eup %3819  ;;  %v2691_v26 = vadd.f32 %v5185_v1, %v2610_v20  ;;  %2562 = vperm.xlu0 %3766, %v5226_v45   ;;  %v2409_v1 = vmul.f32 1.442695, %v2381_v44  ;;  %v2422_v20 = vld [vmem:[#allocation4 + $0x28] sm:$0xff] }
 0x584   : > { %2471 = vadd.xlane.f32.xlu1 %v3820_v7  ;;  %v2631_v47 = vpack.c.bf16 %v3820_v7, %v5228_v37  ;;  %v5241_v36 = vpop.eup %3821  ;;  %v2438_v27 = vmul.f32 %v5145_v33, %v2422_v20 }
 0x585   : > { %2707 = vst [vmem:[#allocation5 + $0x28] sm:$0xff] %v2691_v26  ;;  %3827 = vpow2.f32 %v2409_v1  ;;  %v3824_v34 = vpop.eup %3823  ;;  %v2425_v26 = vld [vmem:[#allocation4 + $0x40] sm:$0xff] }
 0x586   : > { %2675 = vmatmul.bf16.gmra.mxu1 %v2631_v47  ;;  %v5248_v14 = vpop.eup %3825  ;;  %3829 = vpow2.f32 %v2287_v56  ;;  %v2517_v1 = vld [vmem:[#allocation5 + $0x40] sm:$0xff]  ;;  %v2428_v56 = vld [vmem:[#allocation4 + $0x58] sm:$0xff] }
 0x588   : > { %v2553_v11 = vpop.permute.xlu1 %2552 }
 0x589   : > { %v2614_v40 = vmul.f32 %v2553_v11, %v2518_v8  ;;  %v2516_v8 = vld [vmem:[#allocation5 + $0x10] sm:$0xff] }
 0x58b   : > { %v2695_v41 = vadd.f32 %v5198_v6, %v2614_v40  ;;  %2577 = vperm.xlu0 %3766, %v5241_v36   ;;  %v3828_v22 = vpop.eup %3827 }
 0x58c   : > { %v2632_v6 = vpack.c.bf16 %v3824_v34, %v3828_v22  ;;  %v5252_v35 = vpop.eup %3829 }
 0x58d   : > { %2711 = vst [vmem:[#allocation5 + $0x48] sm:$0xff] %v2695_v41 }
 0x590   : > { %v2568_v58 = vpop.permute.xlu1 %2567 }
 0x591   : > { %v2617_v19 = vmul.f32 %v2568_v58, %v2521_v50  ;;  %v2520_v50 = vld [vmem:[#allocation5 + $0x70] sm:$0xff] }
 0x593   : > { %v2698_v12 = vadd.f32 %v2668_v17, %v2617_v19  ;;  %2592 = vperm.xlu0 %3766, %v5248_v14   ;;  %v2444_v19 = vmul.f32 %v5165_v16, %v2428_v56 }
 0x595   : > { %2714 = vst [vmem:[#allocation5 + $0x38] sm:$0xff] %v2698_v12  ;;  %v2588_v12 = vpop.permute.xlu2 %2587 }
 0x596   : > { %2680 = vmatmul.bf16.gmra.mxu1 %v2632_v6 }
 0x597   : > { %2453 = vadd.xlane.f32.xlu2 %v5084_v3  ;;  %v2417_v3 = vld [vmem:[#allocation4] sm:$0xff] }
 0x598   : > { %v5257_v4 = vpop.permute.xlu1 %2582  ;;  %v2433_v2 = vmul.f32 %v5139_v21, %v2417_v3 }
 0x59b   : > { %2607 = vperm.xlu0 %3766, %v5252_v35  }
 0x59f   : > { %2461 = vadd.xlane.f32.xlu2 %v5117_v52 }
 0x5a0   : > { %v5259_v43 = vpop.permute.xlu1 %2597 }
 0x5a7   : > { %2467 = vadd.xlane.f32.xlu2 %v5187_v49  ;;  %v2420_v49 = vld [vmem:[#allocation4 + $0x18] sm:$0xff] }
 0x5a8   : > { %v2436_v42 = vmul.f32 %v5220_v23, %v2420_v49 }
 0x5af   : > { %2473 = vadd.xlane.f32.xlu2 %v3828_v22 }
 0x5c0   : > { %v2671_v57 = vpop.f32.mrf.mxu1 }
 0x5c1   : > { %v2699_v13 = vadd.f32 %v2671_v57, %v2618_v59 }
 0x5c3   : > { %2715 = vst [vmem:[#allocation5 + $0x20] sm:$0xff] %v2699_v13 }
 0x5c5   : > { %2451 = vadd.xlane.f32.xlu0 %v5078_v46 }
 0x5c8   : > { %v2673_v6 = vpop.f32.mrf.mxu1  ;;  %v5281_v3 = vpop.permute.xlu2 %2602 }
 0x5cb   : > { %v2450_v60 = vpop.xlane.xlu1 %2449 }
 0x5cc   : > { %v2481_v52 = vadd.f32 %v2450_v60, %v2433_v2  ;;  %v2525_v60 = vld [vmem:[#allocation5 + $0x58] sm:$0xff] }
 0x5cd   : > { %2457 = vadd.xlane.f32.xlu0 %v5109_v15  ;;  %v2621_v49 = vmul.f32 %v2588_v12, %v2525_v60  ;;  %v2529_v60 = vld [vmem:[#allocation5 + $0x50] sm:$0xff] }
 0x5ce   : > { %2498 = vst.msk [vmem:[#allocation4] sm:$0xff] %vm2497_vm1, %v2481_v52 }
 0x5d3   : > { %v2456_v55 = vpop.xlane.xlu1 %2455 }
 0x5d4   : > { %v2484_v28 = vadd.f32 %v2456_v55, %v2436_v42 }
 0x5d5   : > { %v2362_v53 = vpop.permute.xlu0 %2361  ;;  %2463 = vadd.xlane.f32.xlu0 %v5115_v10 }
 0x5d6   : > { %2501 = vst.msk [vmem:[#allocation4 + $0x18] sm:$0xff] %vm2497_vm1, %v2484_v28  ;;  %v2383_v46 = vsub.f32 %v5089_v0, %v2362_v53  ;;  %v2441_v0 = vmul.f32 %v5156_v29, %v2425_v26  ;;  %v2527_v26 = vld [vmem:[#allocation5 + $0x8] sm:$0xff] }
 0x5d8   : > { %v2413_v21 = vmul.f32 1.442695, %v2383_v46  ;;  %v2423_v46 = vld [vmem:[#allocation4 + $0x30] sm:$0xff] }
 0x5da   : > { %3831 = vpow2.f32 %v2413_v21  ;;  %v2439_v21 = vmul.f32 %v5226_v45, %v2423_v46  ;;  %v2429_v45 = vld [vmem:[#allocation4 + $0x60] sm:$0xff] }
 0x5db   : > { %v2460_v15 = vpop.xlane.xlu1 %2459 }
 0x5dc   : > { %v2486_v7 = vadd.f32 %v2460_v15, %v2438_v27 }
 0x5dd   : > { %v2367_v24 = vpop.permute.xlu0 %2366  ;;  %2469 = vadd.xlane.f32.xlu0 %v5228_v37 }
 0x5de   : > { %2503 = vst.msk [vmem:[#allocation4 + $0x28] sm:$0xff] %vm2497_vm1, %v2486_v7  ;;  %v2384_v23 = vsub.f32 %v5096_v25, %v2367_v24 }
 0x5e0   : > { %v3832_v10 = vpop.eup %3831  ;;  %v2415_v47 = vmul.f32 1.442695, %v2384_v23 }
 0x5e1   : > { %2477 = vadd.xlane.f32.xlu1 %v3832_v10 }
 0x5e2   : > { %3833 = vpow2.f32 %v2415_v47  ;;  %v2623_v47 = vmul.f32 %v5259_v43, %v2527_v26 }
 0x5e3   : > { %v2466_v44 = vpop.xlane.xlu1 %2465 }
 0x5e4   : > { %v2489_v39 = vadd.f32 %v2466_v44, %v2441_v0 }
 0x5e5   : > { %v2543_v33 = vpop.permute.xlu0 %2542  ;;  %2475 = vadd.xlane.f32.xlu0 %v3824_v34 }
 0x5e6   : > { %2506 = vst.msk [vmem:[#allocation4 + $0x40] sm:$0xff] %vm2497_vm1, %v2489_v39  ;;  %v2612_v38 = vmul.f32 %v2543_v33, %v2516_v8  ;;  %v2445_v33 = vmul.f32 %v5248_v14, %v2429_v45  ;;  %v2424_v14 = vld [vmem:[#allocation4 + $0x38] sm:$0xff] }
 0x5e7   : > { %v2440_v56 = vmul.f32 %v5162_v18, %v2424_v14 }
 0x5e8   : > { %v3834_v37 = vpop.eup %3833  ;;  %v2693_v11 = vadd.f32 %v5190_v48, %v2612_v38 }
 0x5e9   : > { %2479 = vadd.xlane.f32.xlu2 %v3834_v37  ;;  %v2633_v25 = vpack.c.bf16 %v3834_v37, %v3832_v10 }
 0x5ea   : > { %2709 = vst [vmem:[#allocation5 + $0x10] sm:$0xff] %v2693_v11 }
 0x5eb   : > { %2685 = vmatmul.bf16.gmra.mxu1 %v2633_v25  ;;  %v2418_v25 = vld [vmem:[#allocation4 + $0x8] sm:$0xff] }
 0x5ed   : > { %v2548_v40 = vpop.permute.xlu0 %2547 }
 0x5ee   : > { %v2613_v41 = vmul.f32 %v2548_v40, %v2517_v1  ;;  %v2421_v40 = vld [vmem:[#allocation4 + $0x20] sm:$0xff] }
 0x5f0   : > { %v2694_v29 = vadd.f32 %v5193_v32, %v2613_v41  ;;  %v2524_v32 = vld [vmem:[#allocation5 + $0x18] sm:$0xff]  ;;  %v2437_v41 = vmul.f32 %v5153_v5, %v2421_v40 }
 0x5f1   : > { %v2620_v13 = vmul.f32 %v5257_v4, %v2524_v32  ;;  %v2526_v4 = vld [vmem:[#allocation5] sm:$0xff] }
 0x5f2   : > { %2710 = vst [vmem:[#allocation5 + $0x40] sm:$0xff] %v2694_v29 }
 0x5f5   : > { %v2563_v58 = vpop.permute.xlu0 %2562 }
 0x5f6   : > { %v2616_v34 = vmul.f32 %v2563_v58, %v2520_v50 }
 0x5f7   : > { %v2472_v17 = vpop.xlane.xlu1 %2471 }
 0x5f8   : > { %v2697_v22 = vadd.f32 %v5239_v31, %v2616_v34  ;;  %v2492_v48 = vadd.f32 %v2472_v17, %v2444_v19  ;;  %v2419_v31 = vld [vmem:[#allocation4 + $0x10] sm:$0xff] }
 0x5f9   : > { %v2435_v52 = vmul.f32 %v5212_v62, %v2419_v31  ;;  %v2426_v62 = vld [vmem:[#allocation4 + $0x48] sm:$0xff]  ;;  %v2427_v19 = vld [vmem:[#allocation4 + $0x50] sm:$0xff] }
 0x5fa   : > { %2713 = vst [vmem:[#allocation5 + $0x70] sm:$0xff] %v2697_v22  ;;  %v2442_v10 = vmul.f32 %v5241_v36, %v2426_v62  ;;  %v2434_v36 = vmul.f32 %v5133_v63, %v2418_v25  ;;  %v2443_v63 = vmul.f32 %v5168_v30, %v2427_v19  ;;  %v2431_v22 = vld [vmem:[#allocation4 + $0x70] sm:$0xff] }
 0x5fb   : > { %2509 = vst.msk [vmem:[#allocation4 + $0x58] sm:$0xff] %vm2497_vm1, %v2492_v48  ;;  %v2447_v5 = vmul.f32 %v5206_v54, %v2431_v22 }
 0x5fd   : > { %v2578_v9 = vpop.permute.xlu0 %2577 }
 0x5fe   : > { %v2619_v59 = vmul.f32 %v2578_v9, %v2523_v51 }
 0x600   : > { %v2700_v57 = vadd.f32 %v2673_v6, %v2619_v59  ;;  %v2430_v6 = vld [vmem:[#allocation4 + $0x68] sm:$0xff]  ;;  %v2432_v59 = vld [vmem:[#allocation4 + $0x78] sm:$0xff] }
 0x601   : > { %v2446_v18 = vmul.f32 %v5171_v61, %v2430_v6  ;;  %v2448_v30 = vmul.f32 %v5252_v35, %v2432_v59 }
 0x602   : > { %2716 = vst [vmem:[#allocation5 + $0x78] sm:$0xff] %v2700_v57 }
 0x603   : > { %v2676_v16 = vpop.f32.mrf.mxu1 }
 0x604   : > { %v2701_v2 = vadd.f32 %v2676_v16, %v2620_v13  ;;  %v2528_v16 = vld [vmem:[#allocation5 + $0x60] sm:$0xff] }
 0x605   : > { %v2593_v20 = vpop.permute.xlu0 %2592  ;;  %v2624_v54 = vmul.f32 %v5281_v3, %v2528_v16 }
 0x606   : > { %2717 = vst [vmem:[#allocation5 + $0x18] sm:$0xff] %v2701_v2  ;;  %v2622_v27 = vmul.f32 %v2593_v20, %v2526_v4 }
 0x60a   : > { %v2454_v42 = vpop.xlane.xlu2 %2453 }
 0x60b   : > { %v2483_v55 = vadd.f32 %v2454_v42, %v2435_v52  ;;  %v2678_v28 = vpop.f32.mrf.mxu1 }
 0x60c   : > { %v2702_v53 = vadd.f32 %v2678_v28, %v2621_v49 }
 0x60d   : > { %2500 = vst.msk [vmem:[#allocation4 + $0x10] sm:$0xff] %vm2497_vm1, %v2483_v55  ;;  %v2608_v11 = vpop.permute.xlu0 %2607 }
 0x60e   : > { %2718 = vst [vmem:[#allocation5 + $0x58] sm:$0xff] %v2702_v53  ;;  %v2625_v52 = vmul.f32 %v2608_v11, %v2529_v60 }
 0x612   : > { %v2462_v15 = vpop.xlane.xlu2 %2461 }
 0x613   : > { %v2487_v7 = vadd.f32 %v2462_v15, %v2439_v21  ;;  %v2681_v24 = vpop.f32.mrf.mxu1 }
 0x614   : > { %v2703_v23 = vadd.f32 %v2681_v24, %v2622_v27 }
 0x615   : > { %2504 = vst.msk [vmem:[#allocation4 + $0x30] sm:$0xff] %vm2497_vm1, %v2487_v7 }
 0x616   : > { %2719 = vst [vmem:[#allocation5] sm:$0xff] %v2703_v23 }
 0x61a   : > { %v2468_v0 = vpop.xlane.xlu2 %2467 }
 0x61b   : > { %v2490_v44 = vadd.f32 %v2468_v0, %v2442_v10  ;;  %v2683_v8 = vpop.f32.mrf.mxu1 }
 0x61c   : > { %v2704_v39 = vadd.f32 %v2683_v8, %v2623_v47 }
 0x61d   : > { %2507 = vst.msk [vmem:[#allocation4 + $0x48] sm:$0xff] %vm2497_vm1, %v2490_v44 }
 0x61e   : > { %2720 = vst [vmem:[#allocation5 + $0x8] sm:$0xff] %v2704_v39 }
 0x622   : > { %v2474_v38 = vpop.xlane.xlu2 %2473 }
 0x623   : > { %v2493_v37 = vadd.f32 %v2474_v38, %v2445_v33 }
 0x625   : > { %2510 = vst.msk [vmem:[#allocation4 + $0x60] sm:$0xff] %vm2497_vm1, %v2493_v37 }
 0x638   : > { %v2452_v1 = vpop.xlane.xlu0 %2451 }
 0x639   : > { %v2482_v43 = vadd.f32 %v2452_v1, %v2434_v36 }
 0x63b   : > { %2499 = vst.msk [vmem:[#allocation4 + $0x8] sm:$0xff] %vm2497_vm1, %v2482_v43 }
 0x640   : > { %v2458_v29 = vpop.xlane.xlu0 %2457 }
 0x641   : > { %v2485_v50 = vadd.f32 %v2458_v29, %v2437_v41 }
 0x643   : > { %2502 = vst.msk [vmem:[#allocation4 + $0x20] sm:$0xff] %vm2497_vm1, %v2485_v50 }
 0x648   : > { %v2464_v58 = vpop.xlane.xlu0 %2463 }
 0x649   : > { %v2488_v34 = vadd.f32 %v2464_v58, %v2440_v56 }
 0x64b   : > { %2505 = vst.msk [vmem:[#allocation4 + $0x38] sm:$0xff] %vm2497_vm1, %v2488_v34 }
 0x650   : > { %v2470_v17 = vpop.xlane.xlu0 %2469 }
 0x651   : > { %v2491_v48 = vadd.f32 %v2470_v17, %v2443_v63 }
 0x653   : > { %2508 = vst.msk [vmem:[#allocation4 + $0x50] sm:$0xff] %vm2497_vm1, %v2491_v48 }
 0x654   : > { %v2478_v12 = vpop.xlane.xlu1 %2477 }
 0x655   : > { %v2495_v51 = vadd.f32 %v2478_v12, %v2447_v5 }
 0x657   : > { %2512 = vst.msk [vmem:[#allocation4 + $0x70] sm:$0xff] %vm2497_vm1, %v2495_v51 }
 0x658   : > { %v2476_v9 = vpop.xlane.xlu0 %2475 }
 0x659   : > { %v2494_v32 = vadd.f32 %v2476_v9, %v2446_v18 }
 0x65b   : > { %2511 = vst.msk [vmem:[#allocation4 + $0x68] sm:$0xff] %vm2497_vm1, %v2494_v32 }
 0x65c   : > { %v2480_v57 = vpop.xlane.xlu2 %2479 }
 0x65d   : > { %v2496_v13 = vadd.f32 %v2480_v57, %v2448_v30 }
 0x65f   : > { %2513 = vst.msk [vmem:[#allocation4 + $0x78] sm:$0xff] %vm2497_vm1, %v2496_v13 }
 0x668   : > { %v2686_v2 = vpop.f32.mrf.mxu1 }
 0x669   : > { %v2705_v31 = vadd.f32 %v2686_v2, %v2624_v54 }
 0x66b   : > { %2721 = vst [vmem:[#allocation5 + $0x60] sm:$0xff] %v2705_v31 }
 0x66f   : > { %2742 = sbr.rel (%p3480_p1) target bundleno = 1820 (0x71c), region = 80 }
 0x670   : > { %v2688_v61 = vpop.f32.mrf.mxu1 }
 0x671   : > { %v2706_v49 = vadd.f32 %v2688_v61, %v2625_v52 }
 0x673   : > { %2722 = vst [vmem:[#allocation5 + $0x50] sm:$0xff] %v2706_v49 }
 0x674   : > { %v2747_v42 = vld [vmem:[#allocation4 + $0x20] sm:$0xff]  ;;  %v2745_v35 = vld [vmem:[#allocation4 + $0x10] sm:$0xff]  ;;  %v4182_v28 = vmov 0   ;;  %v2748_v3 = vld [vmem:[#allocation4 + $0x28] sm:$0xff] }
 0x675   : > { %v2743_v55 = vld [vmem:[#allocation4] sm:$0xff]  ;;  %3837 = vset.pattern.permute.xlu2 %v4182_v28  ;;  %3836 = vset.pattern.permute.xlu1 %v4182_v28  ;;  %3838 = vrcp.f32 %v2747_v42  ;;  %v2746_v53 = vld [vmem:[#allocation4 + $0x18] sm:$0xff]  ;;  %v2744_v46 = vld [vmem:[#allocation4 + $0x8] sm:$0xff] }
 0x676   : > { %3835 = vset.pattern.permute.xlu0 %v4182_v28  ;;  %3840 = vrcp.f32 %v2745_v35  ;;  %v2751_v27 = vld [vmem:[#allocation4 + $0x40] sm:$0xff]  ;;  %v2750_v7 = vld [vmem:[#allocation4 + $0x38] sm:$0xff]  ;;  %v2749_v23 = vld [vmem:[#allocation4 + $0x30] sm:$0xff] }
 0x677   : > { %3842 = vrcp.f32 %v2743_v55  ;;  %v2754_v26 = vld [vmem:[#allocation4 + $0x58] sm:$0xff]  ;;  %v2753_v47 = vld [vmem:[#allocation4 + $0x50] sm:$0xff]  ;;  %v2752_v44 = vld [vmem:[#allocation4 + $0x48] sm:$0xff] }
 0x678   : > { %3844 = vrcp.f32 %v2748_v3  ;;  %v2757_v39 = vld [vmem:[#allocation4 + $0x70] sm:$0xff]  ;;  %v2756_v33 = vld [vmem:[#allocation4 + $0x68] sm:$0xff]  ;;  %v2755_v37 = vld [vmem:[#allocation4 + $0x60] sm:$0xff] }
 0x679   : > { %3846 = vrcp.f32 %v2746_v53  ;;  %v2758_v1 = vld [vmem:[#allocation4 + $0x78] sm:$0xff]  ;;  %v2779_v41 = vld [vmem:[#allocation5 + $0x48] sm:$0xff]  ;;  %v2780_v14 = vld [vmem:[#allocation5 + $0x30] sm:$0xff] }
 0x67a   : > { %3848 = vrcp.f32 %v2744_v46  ;;  %v2783_v34 = vld [vmem:[#allocation5 + $0x20] sm:$0xff]  ;;  %v2786_v17 = vld [vmem:[#allocation5 + $0x58] sm:$0xff]  ;;  %v2777_v22 = vld [vmem:[#allocation5 + $0x10] sm:$0xff] }
 0x67b   : > { %v3839_v4 = vpop.eup %3838  ;;  %3850 = vrcp.f32 %v2751_v27  ;;  %v2775_v5 = vld [vmem:[#allocation5 + $0x28] sm:$0xff]  ;;  %v2789_v59 = vld [vmem:[#allocation5 + $0x60] sm:$0xff]  ;;  %v2782_v60 = vld [vmem:[#allocation5 + $0x38] sm:$0xff] }
 0x67c   : > { %v3841_v20 = vpop.eup %3840  ;;  %2813 = vperm.xlu2 %3837, %v3839_v4   ;;  %3852 = vrcp.f32 %v2750_v7  ;;  %v2778_v32 = vld [vmem:[#allocation5 + $0x40] sm:$0xff]  ;;  %v2776_v57 = vld [vmem:[#allocation5 + $0x68] sm:$0xff]  ;;  %v2781_v52 = vld [vmem:[#allocation5 + $0x70] sm:$0xff] }
 0x67d   : > { %v3843_v21 = vpop.eup %3842  ;;  %2803 = vperm.xlu1 %3836, %v3841_v20   ;;  %3854 = vrcp.f32 %v2749_v23  ;;  %v2785_v55 = vld [vmem:[#allocation5 + $0x18] sm:$0xff]  ;;  %v2788_v20 = vld [vmem:[#allocation5 + $0x8] sm:$0xff]  ;;  %v2790_v23 = vld [vmem:[#allocation5 + $0x50] sm:$0xff] }
 0x67e   : > { %2793 = vperm.xlu0 %3835, %v3843_v21   ;;  %v3845_v15 = vpop.eup %3844  ;;  %3856 = vrcp.f32 %v2754_v26  ;;  %v2784_v28 = vld [vmem:[#allocation5 + $0x78] sm:$0xff]  ;;  %v2787_v21 = vld [vmem:[#allocation5] sm:$0xff] }
 0x67f   : > { %v3847_v24 = vpop.eup %3846  ;;  %3858 = vrcp.f32 %v2753_v47 }
 0x680   : > { %v3849_v62 = vpop.eup %3848  ;;  %3860 = vrcp.f32 %v2752_v44 }
 0x681   : > { %v3851_v10 = vpop.eup %3850  ;;  %3862 = vrcp.f32 %v2757_v39 }
 0x682   : > { %v3853_v0 = vpop.eup %3852  ;;  %3864 = vrcp.f32 %v2756_v33 }
 0x683   : > { %v3855_v8 = vpop.eup %3854  ;;  %3866 = vrcp.f32 %v2755_v37 }
 0x684   : > { %2818 = vperm.xlu2 %3837, %v3845_v15   ;;  %v3857_v45 = vpop.eup %3856  ;;  %3868 = vrcp.f32 %v2758_v1 }
 0x685   : > { %2808 = vperm.xlu1 %3836, %v3847_v24   ;;  %v3859_v38 = vpop.eup %3858 }
 0x686   : > { %2798 = vperm.xlu0 %3835, %v3849_v62   ;;  %v3861_v11 = vpop.eup %3860 }
 0x687   : > { %v3863_v25 = vpop.eup %3862 }
 0x688   : > { %v3865_v36 = vpop.eup %3864 }
 0x689   : > { %v3867_v43 = vpop.eup %3866 }
 0x68a   : > { %v3869_v40 = vpop.eup %3868 }
 0x68c   : > { %2833 = vperm.xlu2 %3837, %v3851_v10  }
 0x68d   : > { %2828 = vperm.xlu1 %3836, %v3853_v0  }
 0x68e   : > { %2823 = vperm.xlu0 %3835, %v3855_v8  }
 0x694   : > { %2848 = vperm.xlu2 %3837, %v3857_v45  }
 0x695   : > { %2843 = vperm.xlu1 %3836, %v3859_v38  }
 0x696   : > { %2838 = vperm.xlu0 %3835, %v3861_v11  }
 0x69c   : > { %2863 = vperm.xlu2 %3837, %v3863_v25  }
 0x69d   : > { %2858 = vperm.xlu1 %3836, %v3865_v36  }
 0x69e   : > { %2853 = vperm.xlu0 %3835, %v3867_v43  }
 0x6a6   : > { %2868 = vperm.xlu0 %3835, %v3869_v40  }
 0x6d6   : > { %v2814_v29 = vpop.permute.xlu2 %2813 }
 0x6d7   : > { %v2875_v50 = vmul.f32 %v2814_v29, %v2779_v41 }
 0x6d9   : > { %2891 = vst [vmem:[%s4441_s6 + $0x20] sm:$0xff] %v2875_v50 }
 0x6de   : > { %v2819_v56 = vpop.permute.xlu2 %2818 }
 0x6df   : > { %v2876_v58 = vmul.f32 %v2819_v56, %v2780_v14 }
 0x6e1   : > { %2892 = vst [vmem:[%s4441_s6 + $0x28] sm:$0xff] %v2876_v58 }
 0x6e6   : > { %v2834_v19 = vpop.permute.xlu2 %2833 }
 0x6e7   : > { %v2879_v63 = vmul.f32 %v2834_v19, %v2783_v34 }
 0x6e9   : > { %2895 = vst [vmem:[%s4441_s6 + $0x40] sm:$0xff] %v2879_v63 }
 0x6ee   : > { %v2849_v48 = vpop.permute.xlu2 %2848 }
 0x6ef   : > { %v2882_v12 = vmul.f32 %v2849_v48, %v2786_v17  ;;  %v2804_v6 = vpop.permute.xlu1 %2803 }
 0x6f0   : > { %v2873_v51 = vmul.f32 %v2804_v6, %v2777_v22  ;;  %v2794_v18 = vpop.permute.xlu0 %2793 }
 0x6f1   : > { %2898 = vst [vmem:[%s4441_s6 + $0x58] sm:$0xff] %v2882_v12  ;;  %v2871_v9 = vmul.f32 %v2794_v18, %v2775_v5 }
 0x6f2   : > { %2889 = vst [vmem:[%s4441_s6 + $0x10] sm:$0xff] %v2873_v51 }
 0x6f3   : > { %2887 = vst [vmem:[%s4441_s6] sm:$0xff] %v2871_v9 }
 0x6f6   : > { %v2864_v30 = vpop.permute.xlu2 %2863 }
 0x6f7   : > { %v2885_v13 = vmul.f32 %v2864_v30, %v2789_v59  ;;  %v2809_v16 = vpop.permute.xlu1 %2808 }
 0x6f8   : > { %v2874_v54 = vmul.f32 %v2809_v16, %v2778_v32  ;;  %v2799_v2 = vpop.permute.xlu0 %2798 }
 0x6f9   : > { %2901 = vst [vmem:[%s4441_s6 + $0x70] sm:$0xff] %v2885_v13  ;;  %v2872_v31 = vmul.f32 %v2799_v2, %v2776_v57 }
 0x6fa   : > { %2890 = vst [vmem:[%s4441_s6 + $0x18] sm:$0xff] %v2874_v54 }
 0x6fb   : > { %2888 = vst [vmem:[%s4441_s6 + $0x8] sm:$0xff] %v2872_v31 }
 0x6ff   : > { %v2829_v61 = vpop.permute.xlu1 %2828 }
 0x700   : > { %v2878_v49 = vmul.f32 %v2829_v61, %v2782_v60  ;;  %v2824_v42 = vpop.permute.xlu0 %2823 }
 0x701   : > { %v2877_v35 = vmul.f32 %v2824_v42, %v2781_v52 }
 0x702   : > { %2894 = vst [vmem:[%s4441_s6 + $0x38] sm:$0xff] %v2878_v49 }
 0x703   : > { %2893 = vst [vmem:[%s4441_s6 + $0x30] sm:$0xff] %v2877_v35 }
 0x707   : > { %v2844_v3 = vpop.permute.xlu1 %2843 }
 0x708   : > { %v2881_v53 = vmul.f32 %v2844_v3, %v2785_v55  ;;  %v2839_v46 = vpop.permute.xlu0 %2838 }
 0x709   : > { %v2880_v4 = vmul.f32 %v2839_v46, %v2784_v28 }
 0x70a   : > { %2897 = vst [vmem:[%s4441_s6 + $0x50] sm:$0xff] %v2881_v53 }
 0x70b   : > { %2896 = vst [vmem:[%s4441_s6 + $0x48] sm:$0xff] %v2880_v4 }
 0x70f   : > { %v2859_v27 = vpop.permute.xlu1 %2858 }
 0x710   : > { %v2884_v15 = vmul.f32 %v2859_v27, %v2788_v20  ;;  %v2854_v7 = vpop.permute.xlu0 %2853 }
 0x711   : > { %v2883_v24 = vmul.f32 %v2854_v7, %v2787_v21 }
 0x712   : > { %2900 = vst [vmem:[%s4441_s6 + $0x68] sm:$0xff] %v2884_v15 }
 0x713   : > { %2899 = vst [vmem:[%s4441_s6 + $0x60] sm:$0xff] %v2883_v24 }
 0x718   : > { %v2869_v62 = vpop.permute.xlu0 %2868 }
 0x719   : > { %v2886_v26 = vmul.f32 %v2869_v62, %v2790_v23 }
 0x71b   : > { %2902 = vst [vmem:[%s4441_s6 + $0x78] sm:$0xff] %v2886_v26 }
 0x71c PF: > { %s5444_s16 = sld [smem:[#allocation23_spill]]  ;;  %s2918_s7 = sshll.u32 %s4441_s6, 4  ;;  %s2919_s7 = int_to_ptr.vmem [resolvable:$true] %s2918_s7 }
 0x71d   : > { %s5445_s25 = sld [smem:[#allocation24_spill]]  ;;  %s2904_s8 = scalar_lea.sflag [#allocation8], %s4414_s15 }
 0x71e   : > { %s5447_s18 = sld [smem:[#allocation39_spill]] }
 0x722   : > { %s3482_s0 = sshll.u32 %s5444_s16, 4 }
 0x723   : > { %s3483_s20 = sshll.u32 %s5445_s25, 5 }
 0x724   : > { %s2915_s5 = sadd.s32 %s3483_s20, %s3482_s0  ;;  %s4040_s6 = scalar_lea.hbm %s5447_s18, 512 }
 0x725   : > { %s3484_s12 = sshll.u32 %s2915_s5, 3 }
 0x726   : > { %s2917_s19 = scalar_lea.hbm %s5447_s18, %s3484_s12 }
 0x727   : > { %s2920_s24 = sshll.u32 %s2917_s19, 4  ;;  %s2921_s24 = int_to_ptr.hbm [resolvable:$true] %s2920_s24 }
 0x728   : > { %s4034_s26 = sshra.s32 %s2921_s24, 4  ;;  %s4035_s26 = int_to_ptr.hbm [resolvable:$true] %s4034_s26 }
 0x729   : > { %s4036_s4 = scalar_lea.hbm %s4035_s26, 128  ;;  %p4041_p9 = scmp.lt.s32.totalorder %s4035_s26, %s5447_s18 }
 0x72a   : > { %p4037_p5 = scmp.ne.s32.totalorder %s4035_s26, %s4036_s4  ;;  %p4042_p2 = scmp.lt.s32.totalorder %s4040_s6, %s4036_s4 }
 0x72c   : > { %p4038_p11 = pnand %p4037_p5, %p4368_p7  ;;  %p4043_p10 = por %p4042_p2, %p4041_p9 }
 0x72e   : > { %p4039_p3 = pneg %p4038_p11 }
 0x730   : > { %p4044_p13 = pnand %p4043_p10, %p4039_p3 }
 0x732   : > { %4047 = shalt.err (!%p4044_p13)
}
 0x733   : > { %s4183_s15 = smov 128   ;;  %s4184_s16 = smov 8  }
 0x734   : > { %3617 = dma.vmem_to_hbm [thread:$0]  (%p4368_p7), %s2919_s7, 2048, %s2921_s24, %s2904_s8, %s4183_s15, %s4183_s15, %s4184_s16  }
 0x735 PF: > { %s5448_s25 = sld [smem:[#allocation21_spill]]  ;;  %p3647_p0 = scmp.ge.s32.totalorder %s4170_s17, 2 }
 0x737   : > { %p3637_p4 = pnand %p3647_p0, %p4375_p12 }
 0x739   : > { %p3638_p8 = pneg %p3637_p4 }
 0x73b   : > { %s2935_s20 = sand.u32 1, %s5448_s25  }
 0x73c   : > { %s2936_s5 = scalar_lea.sflag [#allocation8], %s2935_s20 }
 0x73d   : > { %4117 = dma.done.wait (%p3638_p8), %s2936_s5, 2048  }
 0x73e   : > { %4119 = vsyncadd (%p3638_p8), %s2936_s5, 4294965248  ;;  %s28_s17 = sadd.s32 1, %s4170_s17   ;;  %s5451_s7 = sld [smem:[#allocation25_spill]] }
 0x73f   : > { %p5346_p6 = scmp.ge.s32.totalorder %s28_s17, 10   ;;  %s5452_s21 = sld [smem:[#allocation26_spill]] }
 0x740   : > { %s5453_s23 = sld [smem:[#allocation27_spill]]  ;;  %s5457_s27 = smov %s4126_s28 }
 0x741   : > { %s5454_s15 = sld [smem:[#allocation28_spill]]  ;;  %s5458_s28 = smov %s4130_s29 }
 0x742   : > { %s5455_s16 = sld [smem:[#allocation30_spill]]  ;;  %s5459_s29 = smov %s4401_s2 }
 0x743   : > { %s5460_s30 = smov %s4138_s9  ;;  %s5461_s9 = smov %s4142_s10 }
 0x744   : > { %s5462_s10 = smov %s4384_s13  ;;  %s5463_s11 = smov %s4158_s14 }
 0x745   : > { %s5464_s12 = smov %s5451_s7  ;;  %s5465_s13 = smov %s5452_s21 }
 0x746   : > { %s5466_s14 = smov %s5453_s23  ;;  %27 = sbr.rel (!%p5346_p6) target bundleno = 22 (0x16), region = 130 }
 0x74b   :  { %2942 = vsyncpa [#allocation7], 1 }
 0x74c   :  { %2944 = vsyncpa [#allocation7 + $0x1], 1 }
 0x74d   :  { %2945 = vsyncpa [#allocation10], 1 }
 0x74e   :  { %2947 = vsyncpa [#allocation10 + $0x1], 1 }
 0x74f   :  { %2948 = vsyncpa [#allocation13], 1 }
 0x750   :  { %2949 = vsyncpa [#allocation8], 1 }
 0x751   :  { %2951 = vsyncpa [#allocation8 + $0x1], 1 }

</bundles_post_ra>
